<compile_context>
chip_gen: v5e
topology: v5e:2x2
jax: 0.10.0
libtpu: 0.0.40
codegen_flags: <defaults>
</compile_context>

<pallas_src>
import functools

import jax
import jax.numpy as jnp
from jax import lax
from jax.experimental import pallas as pl
from jax.experimental.pallas import tpu as pltpu


def me_kernel(x_ref, cmask_ref, w1s_ref, coef_ref, w3h_ref, zb_ref, zl_ref,
              o_ref, *, width):
    # x_ref:     (G, T, C, H*W)  G clips of T frames, channels-major, flat spatial
    # cmask_ref: (2, H*W)        indicators of spatial column 0 / column W-1
    # w1s_ref:   (C, Cr)         conv1 weight * bn1 scale
    # coef_ref:  (9, Cr)         conv2 + avg-pool fold coefficients per basis sum
    # w3h_ref:   (Cr, C)         conv3 weight * bn3 scale / (H*W)
    # zb_ref:    (1, C)          pre-sigmoid bias for frames 0..T-2
    # zl_ref:    (1, C)          pre-sigmoid value for frame T-1 (y == 0)
    # o_ref:     (G, T, C)       sigmoid excitation
    G, T, C, HW = x_ref.shape
    W = width
    GT = G * T

    def lane_sum(lo, hi):
        # spatial sum over a contiguous range of the flattened H*W axis
        return x_ref[:, :, :, lo:hi].sum(axis=3).reshape(GT, C)

    xall = x_ref[...]                                   # (G, T, C, HW)
    m0 = cmask_ref[0:1, :].reshape(1, 1, 1, HW)         # col 0 indicator
    m1 = cmask_ref[1:2, :].reshape(1, 1, 1, HW)         # col W-1 indicator

    # 9 linear spatial reductions of x (all that survives conv2 + avg-pool).
    reds = [
        xall.sum(axis=3).reshape(GT, C),                # full spatial sum
        lane_sum(0, W),                                 # row 0
        lane_sum(HW - W, HW),                           # row H-1
        (xall * m0).sum(axis=3).reshape(GT, C),         # col 0
        (xall * m1).sum(axis=3).reshape(GT, C),         # col W-1
        lane_sum(0, 1),                                 # corner (0, 0)
        lane_sum(W - 1, W),                             # corner (0, W-1)
        lane_sum(HW - W, HW - W + 1),                   # corner (H-1, 0)
        lane_sum(HW - 1, HW),                           # corner (H-1, W-1)
    ]

    # conv1 + bn1 on the pooled sums; conv2 + avg-pool folded via `coef`.
    w1s = w1s_ref[...]
    coef = coef_ref[...]
    q_sum = jnp.dot(reds[0], w1s, preferred_element_type=jnp.float32)  # (GT, Cr)
    p_sum = q_sum * coef[0:1, :]
    for k in range(1, 9):
        bk = jnp.dot(reds[k], w1s, preferred_element_type=jnp.float32)
        p_sum = p_sum + bk * coef[k:k + 1, :]

    # conv3 + bn3 (linear), then temporal diff y[t] = pool(conv2)[t+1] - pool[t].
    w3h = w3h_ref[...]
    zc = jnp.dot(p_sum, w3h, preferred_element_type=jnp.float32).reshape(G, T, C)
    zq = jnp.dot(q_sum, w3h, preferred_element_type=jnp.float32).reshape(G, T, C)
    z_top = zc[:, 1:, :] - zq[:, :T - 1, :] + zb_ref[...]     # (G, T-1, C)

    o_ref[:, :T - 1, :] = jax.nn.sigmoid(z_top)
    o_ref[:, T - 1:, :] = jnp.broadcast_to(
        jax.nn.sigmoid(zl_ref[...]).reshape(1, 1, C), (G, 1, C))


def _pick_group(n_clips, clip_bytes, budget_bytes=4 << 20):
    """Clips per grid step: big enough to amortise per-step overhead, small
    enough that the double-buffered block stays well inside scoped VMEM, and
    keeping >=2 grid steps so the 'parallel' batch axis can shard across
    TensorCores on multi-core chips."""
    g = max(1, min(n_clips, budget_bytes // max(clip_bytes, 1)))
    if n_clips >= 2:
        g = max(1, min(g, n_clips // 2))
    while n_clips % g:
        g -= 1
    return g


def me_module_pallas(x_nchw, params, n_segment=8):
    nt, C, H, W = x_nchw.shape
    T = n_segment
    nb = nt // T
    Cr = params["w1"].shape[0]
    HW = H * W
    eps = 1e-5

    # NCHW -> (n_batch, T, C, H*W): a pure (free) reshape, no HBM transpose.
    x = x_nchw.reshape(nb, T, C, HW).astype(jnp.float32)

    # ---- fold conv1/bn1, depthwise conv2 + avg-pool, conv3/bn3 (inference) ----
    w1p = params["w1"][:, :, 0, 0]                      # (Cr, C)
    w2p = params["w2"][:, 0, :, :]                      # (Cr, 3, 3)
    w3p = params["w3"][:, :, 0, 0]                      # (C, Cr)
    s1 = params["g1"] / jnp.sqrt(params["v1"] + eps)
    b1c = params["b1"] - params["m1"] * s1
    s3 = params["g3"] / jnp.sqrt(params["v3"] + eps)
    b3c = params["b3"] - params["m3"] * s3

    w1s = (w1p.T * s1[None, :]).astype(jnp.float32)     # (C, Cr)
    w3s = w3p.T * s3[None, :]                           # (Cr, C)
    w3h = (w3s / HW).astype(jnp.float32)                # conv3*bn3 scale / (H*W)

    # Spatial average of the zero-padded depthwise 3x3 conv == linear
    # combination of {full, boundary-row, boundary-col, corner} sums of its
    # input.  Basis order must match the kernel's `reds` list.
    coef = jnp.stack([
        w2p.sum(axis=(1, 2)),          # full sum
        -w2p[:, 2, :].sum(axis=1),     # row 0        (excluded by taps dy=2)
        -w2p[:, 0, :].sum(axis=1),     # row H-1      (taps dy=0)
        -w2p[:, :, 2].sum(axis=1),     # col 0        (taps dx=2)
        -w2p[:, :, 0].sum(axis=1),     # col W-1      (taps dx=0)
        w2p[:, 2, 2],                  # corner (0, 0)
        w2p[:, 2, 0],                  # corner (0, W-1)
        w2p[:, 0, 2],                  # corner (H-1, 0)
        w2p[:, 0, 0],                  # corner (H-1, W-1)
    ], axis=0).astype(jnp.float32)     # (9, Cr)
    counts = jnp.array([HW, W, W, H, H, 1, 1, 1, 1], jnp.float32)

    bias_p = b1c * jnp.sum(coef * counts[:, None], axis=0)   # pooled conv2 bias
    bias_q = b1c * float(HW)                                 # pooled bott  bias
    zb = ((bias_p - bias_q) @ w3h + b3c).reshape(1, C).astype(jnp.float32)
    zl = b3c.reshape(1, C).astype(jnp.float32)               # frame T-1: y == 0

    hw_idx = jnp.arange(HW, dtype=jnp.int32)
    cmask = jnp.stack([(hw_idx % W == 0), (hw_idx % W == W - 1)],
                      axis=0).astype(jnp.float32)            # (2, HW)

    G = _pick_group(nb, T * C * HW * 4)
    grid = (nb // G,)

    kernel = functools.partial(me_kernel, width=W)
    out = pl.pallas_call(
        kernel,
        out_shape=jax.ShapeDtypeStruct((nb, T, C), jnp.float32),
        grid_spec=pltpu.PrefetchScalarGridSpec(
            num_scalar_prefetch=0,
            grid=grid,
            in_specs=[
                pl.BlockSpec((G, T, C, HW), lambda b: (b, 0, 0, 0)),
                pl.BlockSpec((2, HW), lambda b: (0, 0)),
                pl.BlockSpec((C, Cr), lambda b: (0, 0)),
                pl.BlockSpec((9, Cr), lambda b: (0, 0)),
                pl.BlockSpec((Cr, C), lambda b: (0, 0)),
                pl.BlockSpec((1, C), lambda b: (0, 0)),
                pl.BlockSpec((1, C), lambda b: (0, 0)),
            ],
            out_specs=pl.BlockSpec((G, T, C), lambda b: (b, 0, 0)),
        ),
        compiler_params=pltpu.CompilerParams(
            dimension_semantics=("parallel",)),
    )(x, cmask, w1s, coef, w3h, zb, zl)

    # back to PyTorch-shaped output (nt, C, 1, 1)
    return out.reshape(nt, C)[:, :, None, None]


def me_module_ref(x, params, n_segment=8):
    """Plain-JAX reference reproducing the PyTorch forward (BN in inference mode)."""
    eps = 1e-5
    nt, C, H, W = x.shape
    Cr = params["w1"].shape[0]

    def bn(v, g, b, m, s):
        return ((v - m[None, :, None, None]) / jnp.sqrt(s[None, :, None, None] + eps)
                * g[None, :, None, None] + b[None, :, None, None])

    dn = ("NCHW", "OIHW", "NCHW")
    bott = lax.conv_general_dilated(x, params["w1"], (1, 1), "VALID", dimension_numbers=dn)
    bott = bn(bott, params["g1"], params["b1"], params["m1"], params["v1"])
    conv_b = lax.conv_general_dilated(bott, params["w2"], (1, 1), [(1, 1), (1, 1)],
                                      dimension_numbers=dn, feature_group_count=Cr)
    rb = bott.reshape(-1, n_segment, Cr, H, W)
    rc = conv_b.reshape(-1, n_segment, Cr, H, W)
    diff = rc[:, 1:] - rb[:, :n_segment - 1]
    diff = jnp.pad(diff, ((0, 0), (0, 1), (0, 0), (0, 0), (0, 0)))
    diff = diff.reshape(nt, Cr, H, W)
    y = diff.mean(axis=(2, 3), keepdims=True)
    y = lax.conv_general_dilated(y, params["w3"], (1, 1), "VALID", dimension_numbers=dn)
    y = bn(y, params["g3"], params["b3"], params["m3"], params["v3"])
    return jax.nn.sigmoid(y)


if __name__ == "__main__":
    channel, reduction, n_segment = 32, 4, 8   # Cr = channel // reduction = 8
    Cr = channel // reduction
    nb, H, W = 2, 16, 16
    nt = nb * n_segment

    key = jax.random.PRNGKey(0)
    ks = jax.random.split(key, 12)
    params = dict(
        w1=jax.random.normal(ks[0], (Cr, channel, 1, 1), jnp.float32) * 0.1,
        w2=jax.random.normal(ks[1], (Cr, 1, 3, 3), jnp.float32) * 0.1,
        w3=jax.random.normal(ks[2], (channel, Cr, 1, 1), jnp.float32) * 0.1,
        g1=jax.random.uniform(ks[3], (Cr,), jnp.float32, 0.5, 1.5),
        b1=jax.random.normal(ks[4], (Cr,), jnp.float32) * 0.1,
        m1=jax.random.normal(ks[5], (Cr,), jnp.float32) * 0.1,
        v1=jax.random.uniform(ks[6], (Cr,), jnp.float32, 0.5, 1.5),
        g3=jax.random.uniform(ks[7], (channel,), jnp.float32, 0.5, 1.5),
        b3=jax.random.normal(ks[8], (channel,), jnp.float32) * 0.1,
        m3=jax.random.normal(ks[9], (channel,), jnp.float32) * 0.1,
        v3=jax.random.uniform(ks[10], (channel,), jnp.float32, 0.5, 1.5),
    )
    x = jax.random.normal(ks[11], (nt, channel, H, W), jnp.float32)

    me_fn = jax.jit(functools.partial(me_module_pallas, n_segment=n_segment))
    out = jax.block_until_ready(me_fn(x, params))
    assert out.shape == (nt, channel, 1, 1)

    ref = me_module_ref(x, params, n_segment=n_segment)
    err = float(jnp.max(jnp.abs(out - ref)))
    # tolerance slightly widened vs 1e-4: the folded formulation reassociates
    # the spatial sums relative to the XLA conv reference.
    assert err < 2e-4, f"max abs err {err}"
    print("KERNEL_OK")
</pallas_src>

<mosaic_0001>
module attributes {stable_mosaic.version = 11 : i64} {
  func.func @me_kernel(%arg0: i32, %arg1: memref<1x8x32x256xf32, #tpu.memory_space<vmem>>, %arg2: memref<2x256xf32, #tpu.memory_space<vmem>>, %arg3: memref<32x8xf32, #tpu.memory_space<vmem>>, %arg4: memref<9x8xf32, #tpu.memory_space<vmem>>, %arg5: memref<8x32xf32, #tpu.memory_space<vmem>>, %arg6: memref<1x32xf32, #tpu.memory_space<vmem>>, %arg7: memref<1x32xf32, #tpu.memory_space<vmem>>, %arg8: memref<1x8x32xf32, #tpu.memory_space<vmem>>) attributes {dimension_semantics = [#tpu.dimension_semantics<parallel>], iteration_bounds = array<i64: 2>, scalar_prefetch = 0 : i64, scratch_operands = 0 : i64, tpu.core_type = #tpu.core_type<tc>, window_params = [{transform_indices = @transform_0, window_bounds = array<i64: 1, 8, 32, 256>}, {pipeline_mode = #tpu.pipeline_mode<synchronous>, transform_indices = @transform_1, window_bounds = array<i64: 2, 256>}, {pipeline_mode = #tpu.pipeline_mode<synchronous>, transform_indices = @transform_2, window_bounds = array<i64: 32, 8>}, {pipeline_mode = #tpu.pipeline_mode<synchronous>, transform_indices = @transform_3, window_bounds = array<i64: 9, 8>}, {pipeline_mode = #tpu.pipeline_mode<synchronous>, transform_indices = @transform_4, window_bounds = array<i64: 8, 32>}, {pipeline_mode = #tpu.pipeline_mode<synchronous>, transform_indices = @transform_5, window_bounds = array<i64: 1, 32>}, {pipeline_mode = #tpu.pipeline_mode<synchronous>, transform_indices = @transform_6, window_bounds = array<i64: 1, 32>}, {transform_indices = @transform_7, window_bounds = array<i64: 1, 8, 32>}]} {
    %c0 = arith.constant 0 : index
    %c0_0 = arith.constant 0 : index
    %c0_1 = arith.constant 0 : index
    %c0_2 = arith.constant 0 : index
    %0 = vector.load %arg1[%c0, %c0_0, %c0_1, %c0_2] : memref<1x8x32x256xf32, #tpu.memory_space<vmem>>, vector<1x8x32x256xf32>
    %c0_3 = arith.constant 0 : index
    %c0_4 = arith.constant 0 : index
    %1 = vector.load %arg2[%c0_3, %c0_4] : memref<2x256xf32, #tpu.memory_space<vmem>>, vector<1x256xf32>
    %2 = vector.shape_cast %1 : vector<1x256xf32> to vector<1x1x1x256xf32>
    %c1 = arith.constant 1 : index
    %c0_5 = arith.constant 0 : index
    %3 = vector.load %arg2[%c1, %c0_5] : memref<2x256xf32, #tpu.memory_space<vmem>>, vector<1x256xf32>
    %4 = vector.shape_cast %3 : vector<1x256xf32> to vector<1x1x1x256xf32>
    %cst = arith.constant dense<0.000000e+00> : vector<1x8x32xf32>
    %5 = vector.multi_reduction <add>, %0, %cst [3] : vector<1x8x32x256xf32> to vector<1x8x32xf32>
    %6 = vector.shape_cast %5 : vector<1x8x32xf32> to vector<8x32xf32>
    %c0_6 = arith.constant 0 : index
    %c0_7 = arith.constant 0 : index
    %c0_8 = arith.constant 0 : index
    %c0_9 = arith.constant 0 : index
    %7 = vector.load %arg1[%c0_6, %c0_7, %c0_8, %c0_9] : memref<1x8x32x256xf32, #tpu.memory_space<vmem>>, vector<1x8x32x16xf32>
    %cst_10 = arith.constant dense<0.000000e+00> : vector<1x8x32xf32>
    %8 = vector.multi_reduction <add>, %7, %cst_10 [3] : vector<1x8x32x16xf32> to vector<1x8x32xf32>
    %9 = vector.shape_cast %8 : vector<1x8x32xf32> to vector<8x32xf32>
    %c0_11 = arith.constant 0 : index
    %c0_12 = arith.constant 0 : index
    %c0_13 = arith.constant 0 : index
    %c240 = arith.constant 240 : index
    %10 = vector.load %arg1[%c0_11, %c0_12, %c0_13, %c240] : memref<1x8x32x256xf32, #tpu.memory_space<vmem>>, vector<1x8x32x16xf32>
    %cst_14 = arith.constant dense<0.000000e+00> : vector<1x8x32xf32>
    %11 = vector.multi_reduction <add>, %10, %cst_14 [3] : vector<1x8x32x16xf32> to vector<1x8x32xf32>
    %12 = vector.shape_cast %11 : vector<1x8x32xf32> to vector<8x32xf32>
    %13 = vector.broadcast %2 : vector<1x1x1x256xf32> to vector<1x8x32x256xf32>
    %14 = arith.mulf %0, %13 : vector<1x8x32x256xf32>
    %cst_15 = arith.constant dense<0.000000e+00> : vector<1x8x32xf32>
    %15 = vector.multi_reduction <add>, %14, %cst_15 [3] : vector<1x8x32x256xf32> to vector<1x8x32xf32>
    %16 = vector.shape_cast %15 : vector<1x8x32xf32> to vector<8x32xf32>
    %17 = vector.broadcast %4 : vector<1x1x1x256xf32> to vector<1x8x32x256xf32>
    %18 = arith.mulf %0, %17 : vector<1x8x32x256xf32>
    %cst_16 = arith.constant dense<0.000000e+00> : vector<1x8x32xf32>
    %19 = vector.multi_reduction <add>, %18, %cst_16 [3] : vector<1x8x32x256xf32> to vector<1x8x32xf32>
    %20 = vector.shape_cast %19 : vector<1x8x32xf32> to vector<8x32xf32>
    %c0_17 = arith.constant 0 : index
    %c0_18 = arith.constant 0 : index
    %c0_19 = arith.constant 0 : index
    %c0_20 = arith.constant 0 : index
    %21 = vector.load %arg1[%c0_17, %c0_18, %c0_19, %c0_20] : memref<1x8x32x256xf32, #tpu.memory_space<vmem>>, vector<1x8x32x1xf32>
    %cst_21 = arith.constant dense<0.000000e+00> : vector<1x8x32xf32>
    %22 = vector.multi_reduction <add>, %21, %cst_21 [3] : vector<1x8x32x1xf32> to vector<1x8x32xf32>
    %23 = vector.shape_cast %22 : vector<1x8x32xf32> to vector<8x32xf32>
    %c0_22 = arith.constant 0 : index
    %c0_23 = arith.constant 0 : index
    %c0_24 = arith.constant 0 : index
    %c15 = arith.constant 15 : index
    %24 = vector.load %arg1[%c0_22, %c0_23, %c0_24, %c15] : memref<1x8x32x256xf32, #tpu.memory_space<vmem>>, vector<1x8x32x1xf32>
    %cst_25 = arith.constant dense<0.000000e+00> : vector<1x8x32xf32>
    %25 = vector.multi_reduction <add>, %24, %cst_25 [3] : vector<1x8x32x1xf32> to vector<1x8x32xf32>
    %26 = vector.shape_cast %25 : vector<1x8x32xf32> to vector<8x32xf32>
    %c0_26 = arith.constant 0 : index
    %c0_27 = arith.constant 0 : index
    %c0_28 = arith.constant 0 : index
    %c240_29 = arith.constant 240 : index
    %27 = vector.load %arg1[%c0_26, %c0_27, %c0_28, %c240_29] : memref<1x8x32x256xf32, #tpu.memory_space<vmem>>, vector<1x8x32x1xf32>
    %cst_30 = arith.constant dense<0.000000e+00> : vector<1x8x32xf32>
    %28 = vector.multi_reduction <add>, %27, %cst_30 [3] : vector<1x8x32x1xf32> to vector<1x8x32xf32>
    %29 = vector.shape_cast %28 : vector<1x8x32xf32> to vector<8x32xf32>
    %c0_31 = arith.constant 0 : index
    %c0_32 = arith.constant 0 : index
    %c0_33 = arith.constant 0 : index
    %c255 = arith.constant 255 : index
    %30 = vector.load %arg1[%c0_31, %c0_32, %c0_33, %c255] : memref<1x8x32x256xf32, #tpu.memory_space<vmem>>, vector<1x8x32x1xf32>
    %cst_34 = arith.constant dense<0.000000e+00> : vector<1x8x32xf32>
    %31 = vector.multi_reduction <add>, %30, %cst_34 [3] : vector<1x8x32x1xf32> to vector<1x8x32xf32>
    %32 = vector.shape_cast %31 : vector<1x8x32xf32> to vector<8x32xf32>
    %c0_35 = arith.constant 0 : index
    %c0_36 = arith.constant 0 : index
    %33 = vector.load %arg3[%c0_35, %c0_36] : memref<32x8xf32, #tpu.memory_space<vmem>>, vector<32x8xf32>
    %c0_37 = arith.constant 0 : index
    %c0_38 = arith.constant 0 : index
    %34 = vector.load %arg4[%c0_37, %c0_38] : memref<9x8xf32, #tpu.memory_space<vmem>>, vector<9x8xf32>
    %cst_39 = arith.constant dense<0.000000e+00> : vector<8x8xf32>
    %35 = tpu.matmul %6, %33, %cst_39 {dimension_numbers = #tpu.dot_dimension_numbers<[1], [0], [0], [1], [0, 0, 1, 1], [], []>} : vector<8x32xf32>, vector<32x8xf32>, vector<8x8xf32> -> vector<8x8xf32>
    %36 = vector.extract_strided_slice %34 {offsets = [0, 0], sizes = [1, 8], strides = [1, 1]} : vector<9x8xf32> to vector<1x8xf32>
    %37 = vector.broadcast %36 : vector<1x8xf32> to vector<8x8xf32>
    %38 = arith.mulf %35, %37 : vector<8x8xf32>
    %cst_40 = arith.constant dense<0.000000e+00> : vector<8x8xf32>
    %39 = tpu.matmul %9, %33, %cst_40 {dimension_numbers = #tpu.dot_dimension_numbers<[1], [0], [0], [1], [0, 0, 1, 1], [], []>} : vector<8x32xf32>, vector<32x8xf32>, vector<8x8xf32> -> vector<8x8xf32>
    %40 = vector.extract_strided_slice %34 {offsets = [1, 0], sizes = [1, 8], strides = [1, 1]} : vector<9x8xf32> to vector<1x8xf32>
    %41 = vector.broadcast %40 : vector<1x8xf32> to vector<8x8xf32>
    %42 = arith.mulf %39, %41 : vector<8x8xf32>
    %43 = arith.addf %38, %42 : vector<8x8xf32>
    %cst_41 = arith.constant dense<0.000000e+00> : vector<8x8xf32>
    %44 = tpu.matmul %12, %33, %cst_41 {dimension_numbers = #tpu.dot_dimension_numbers<[1], [0], [0], [1], [0, 0, 1, 1], [], []>} : vector<8x32xf32>, vector<32x8xf32>, vector<8x8xf32> -> vector<8x8xf32>
    %45 = vector.extract_strided_slice %34 {offsets = [2, 0], sizes = [1, 8], strides = [1, 1]} : vector<9x8xf32> to vector<1x8xf32>
    %46 = vector.broadcast %45 : vector<1x8xf32> to vector<8x8xf32>
    %47 = arith.mulf %44, %46 : vector<8x8xf32>
    %48 = arith.addf %43, %47 : vector<8x8xf32>
    %cst_42 = arith.constant dense<0.000000e+00> : vector<8x8xf32>
    %49 = tpu.matmul %16, %33, %cst_42 {dimension_numbers = #tpu.dot_dimension_numbers<[1], [0], [0], [1], [0, 0, 1, 1], [], []>} : vector<8x32xf32>, vector<32x8xf32>, vector<8x8xf32> -> vector<8x8xf32>
    %50 = vector.extract_strided_slice %34 {offsets = [3, 0], sizes = [1, 8], strides = [1, 1]} : vector<9x8xf32> to vector<1x8xf32>
    %51 = vector.broadcast %50 : vector<1x8xf32> to vector<8x8xf32>
    %52 = arith.mulf %49, %51 : vector<8x8xf32>
    %53 = arith.addf %48, %52 : vector<8x8xf32>
    %cst_43 = arith.constant dense<0.000000e+00> : vector<8x8xf32>
    %54 = tpu.matmul %20, %33, %cst_43 {dimension_numbers = #tpu.dot_dimension_numbers<[1], [0], [0], [1], [0, 0, 1, 1], [], []>} : vector<8x32xf32>, vector<32x8xf32>, vector<8x8xf32> -> vector<8x8xf32>
    %55 = vector.extract_strided_slice %34 {offsets = [4, 0], sizes = [1, 8], strides = [1, 1]} : vector<9x8xf32> to vector<1x8xf32>
    %56 = vector.broadcast %55 : vector<1x8xf32> to vector<8x8xf32>
    %57 = arith.mulf %54, %56 : vector<8x8xf32>
    %58 = arith.addf %53, %57 : vector<8x8xf32>
    %cst_44 = arith.constant dense<0.000000e+00> : vector<8x8xf32>
    %59 = tpu.matmul %23, %33, %cst_44 {dimension_numbers = #tpu.dot_dimension_numbers<[1], [0], [0], [1], [0, 0, 1, 1], [], []>} : vector<8x32xf32>, vector<32x8xf32>, vector<8x8xf32> -> vector<8x8xf32>
    %60 = vector.extract_strided_slice %34 {offsets = [5, 0], sizes = [1, 8], strides = [1, 1]} : vector<9x8xf32> to vector<1x8xf32>
    %61 = vector.broadcast %60 : vector<1x8xf32> to vector<8x8xf32>
    %62 = arith.mulf %59, %61 : vector<8x8xf32>
    %63 = arith.addf %58, %62 : vector<8x8xf32>
    %cst_45 = arith.constant dense<0.000000e+00> : vector<8x8xf32>
    %64 = tpu.matmul %26, %33, %cst_45 {dimension_numbers = #tpu.dot_dimension_numbers<[1], [0], [0], [1], [0, 0, 1, 1], [], []>} : vector<8x32xf32>, vector<32x8xf32>, vector<8x8xf32> -> vector<8x8xf32>
    %65 = vector.extract_strided_slice %34 {offsets = [6, 0], sizes = [1, 8], strides = [1, 1]} : vector<9x8xf32> to vector<1x8xf32>
    %66 = vector.broadcast %65 : vector<1x8xf32> to vector<8x8xf32>
    %67 = arith.mulf %64, %66 : vector<8x8xf32>
    %68 = arith.addf %63, %67 : vector<8x8xf32>
    %cst_46 = arith.constant dense<0.000000e+00> : vector<8x8xf32>
    %69 = tpu.matmul %29, %33, %cst_46 {dimension_numbers = #tpu.dot_dimension_numbers<[1], [0], [0], [1], [0, 0, 1, 1], [], []>} : vector<8x32xf32>, vector<32x8xf32>, vector<8x8xf32> -> vector<8x8xf32>
    %70 = vector.extract_strided_slice %34 {offsets = [7, 0], sizes = [1, 8], strides = [1, 1]} : vector<9x8xf32> to vector<1x8xf32>
    %71 = vector.broadcast %70 : vector<1x8xf32> to vector<8x8xf32>
    %72 = arith.mulf %69, %71 : vector<8x8xf32>
    %73 = arith.addf %68, %72 : vector<8x8xf32>
    %cst_47 = arith.constant dense<0.000000e+00> : vector<8x8xf32>
    %74 = tpu.matmul %32, %33, %cst_47 {dimension_numbers = #tpu.dot_dimension_numbers<[1], [0], [0], [1], [0, 0, 1, 1], [], []>} : vector<8x32xf32>, vector<32x8xf32>, vector<8x8xf32> -> vector<8x8xf32>
    %75 = vector.extract_strided_slice %34 {offsets = [8, 0], sizes = [1, 8], strides = [1, 1]} : vector<9x8xf32> to vector<1x8xf32>
    %76 = vector.broadcast %75 : vector<1x8xf32> to vector<8x8xf32>
    %77 = arith.mulf %74, %76 : vector<8x8xf32>
    %78 = arith.addf %73, %77 : vector<8x8xf32>
    %c0_48 = arith.constant 0 : index
    %c0_49 = arith.constant 0 : index
    %79 = vector.load %arg5[%c0_48, %c0_49] : memref<8x32xf32, #tpu.memory_space<vmem>>, vector<8x32xf32>
    %cst_50 = arith.constant dense<0.000000e+00> : vector<8x32xf32>
    %80 = tpu.matmul %78, %79, %cst_50 {dimension_numbers = #tpu.dot_dimension_numbers<[1], [0], [0], [1], [0, 0, 1, 1], [], []>} : vector<8x8xf32>, vector<8x32xf32>, vector<8x32xf32> -> vector<8x32xf32>
    %81 = vector.shape_cast %80 : vector<8x32xf32> to vector<1x8x32xf32>
    %cst_51 = arith.constant dense<0.000000e+00> : vector<8x32xf32>
    %82 = tpu.matmul %35, %79, %cst_51 {dimension_numbers = #tpu.dot_dimension_numbers<[1], [0], [0], [1], [0, 0, 1, 1], [], []>} : vector<8x8xf32>, vector<8x32xf32>, vector<8x32xf32> -> vector<8x32xf32>
    %83 = vector.shape_cast %82 : vector<8x32xf32> to vector<1x8x32xf32>
    %84 = vector.extract_strided_slice %81 {offsets = [0, 1, 0], sizes = [1, 7, 32], strides = [1, 1, 1]} : vector<1x8x32xf32> to vector<1x7x32xf32>
    %85 = vector.extract_strided_slice %83 {offsets = [0, 0, 0], sizes = [1, 7, 32], strides = [1, 1, 1]} : vector<1x8x32xf32> to vector<1x7x32xf32>
    %86 = arith.subf %84, %85 : vector<1x7x32xf32>
    %c0_52 = arith.constant 0 : index
    %c0_53 = arith.constant 0 : index
    %87 = vector.load %arg6[%c0_52, %c0_53] : memref<1x32xf32, #tpu.memory_space<vmem>>, vector<1x32xf32>
    %88 = vector.shape_cast %87 : vector<1x32xf32> to vector<1x1x32xf32>
    %89 = vector.broadcast %88 : vector<1x1x32xf32> to vector<1x7x32xf32>
    %90 = arith.addf %86, %89 : vector<1x7x32xf32>
    %91 = arith.negf %90 : vector<1x7x32xf32>
    %92 = math.exp %91 : vector<1x7x32xf32>
    %cst_54 = arith.constant 1.000000e+00 : f32
    %93 = vector.broadcast %cst_54 : f32 to vector<1x7x32xf32>
    %94 = arith.addf %93, %92 : vector<1x7x32xf32>
    %95 = arith.divf %93, %94 : vector<1x7x32xf32>
    %c0_55 = arith.constant 0 : index
    %c0_56 = arith.constant 0 : index
    %c0_57 = arith.constant 0 : index
    %96 = vector.load %arg8[%c0_55, %c0_56, %c0_57] : memref<1x8x32xf32, #tpu.memory_space<vmem>>, vector<1x7x32xf32>
    tpu.vector_store %arg8[%c0_55, %c0_56, %c0_57], %95 {strides = array<i32>} : memref<1x8x32xf32, #tpu.memory_space<vmem>>, vector<1x7x32xf32>,
    %c0_58 = arith.constant 0 : index
    %c0_59 = arith.constant 0 : index
    %97 = vector.load %arg7[%c0_58, %c0_59] : memref<1x32xf32, #tpu.memory_space<vmem>>, vector<1x32xf32>
    %98 = arith.negf %97 : vector<1x32xf32>
    %99 = math.exp %98 : vector<1x32xf32>
    %cst_60 = arith.constant 1.000000e+00 : f32
    %100 = vector.broadcast %cst_60 : f32 to vector<1x32xf32>
    %101 = arith.addf %100, %99 : vector<1x32xf32>
    %102 = arith.divf %100, %101 : vector<1x32xf32>
    %103 = vector.shape_cast %102 : vector<1x32xf32> to vector<1x1x32xf32>
    %c0_61 = arith.constant 0 : index
    %c7 = arith.constant 7 : index
    %c0_62 = arith.constant 0 : index
    %104 = vector.load %arg8[%c0_61, %c7, %c0_62] : memref<1x8x32xf32, #tpu.memory_space<vmem>>, vector<1x1x32xf32>
    tpu.vector_store %arg8[%c0_61, %c7, %c0_62], %103 {strides = array<i32>} : memref<1x8x32xf32, #tpu.memory_space<vmem>>, vector<1x1x32xf32>,
    return
  }
  func.func @transform_0(%arg0: i32) -> (i32, i32, i32, i32) {
    %c0_i32 = arith.constant 0 : i32
    %c0_i32_0 = arith.constant 0 : i32
    %c0_i32_1 = arith.constant 0 : i32
    %c0_i32_2 = arith.constant 0 : i32
    return %arg0, %c0_i32, %c0_i32_0, %c0_i32_1 : i32, i32, i32, i32
  }
  func.func @transform_1(%arg0: i32) -> (i32, i32) {
    %c0_i32 = arith.constant 0 : i32
    %c0_i32_0 = arith.constant 0 : i32
    %c0_i32_1 = arith.constant 0 : i32
    return %c0_i32, %c0_i32_0 : i32, i32
  }
  func.func @transform_2(%arg0: i32) -> (i32, i32) {
    %c0_i32 = arith.constant 0 : i32
    %c0_i32_0 = arith.constant 0 : i32
    %c0_i32_1 = arith.constant 0 : i32
    return %c0_i32, %c0_i32_0 : i32, i32
  }
  func.func @transform_3(%arg0: i32) -> (i32, i32) {
    %c0_i32 = arith.constant 0 : i32
    %c0_i32_0 = arith.constant 0 : i32
    %c0_i32_1 = arith.constant 0 : i32
    return %c0_i32, %c0_i32_0 : i32, i32
  }
  func.func @transform_4(%arg0: i32) -> (i32, i32) {
    %c0_i32 = arith.constant 0 : i32
    %c0_i32_0 = arith.constant 0 : i32
    %c0_i32_1 = arith.constant 0 : i32
    return %c0_i32, %c0_i32_0 : i32, i32
  }
  func.func @transform_5(%arg0: i32) -> (i32, i32) {
    %c0_i32 = arith.constant 0 : i32
    %c0_i32_0 = arith.constant 0 : i32
    %c0_i32_1 = arith.constant 0 : i32
    return %c0_i32, %c0_i32_0 : i32, i32
  }
  func.func @transform_6(%arg0: i32) -> (i32, i32) {
    %c0_i32 = arith.constant 0 : i32
    %c0_i32_0 = arith.constant 0 : i32
    %c0_i32_1 = arith.constant 0 : i32
    return %c0_i32, %c0_i32_0 : i32, i32
  }
  func.func @transform_7(%arg0: i32) -> (i32, i32, i32) {
    %c0_i32 = arith.constant 0 : i32
    %c0_i32_0 = arith.constant 0 : i32
    %c0_i32_1 = arith.constant 0 : i32
    return %arg0, %c0_i32, %c0_i32_0 : i32, i32, i32
  }
}

</mosaic_0001>

<bundles_post_ra>
// kernel: me_module_pallas.1
= control target key start
LH: loop header
LB: loop body
LE: loop exit
PB: predicated region body
PF: predicated region fallthrough
CT: control target
= control target key end

     0   :  { %12 = vsyncpa [#allocation3], 0  ;;  %s5397_s0 = inlined_call_operand.vmem [shape: f32[2,8,32,256], index: 0, kind: input, shape index: {}]   ;;  %s5398_s1 = inlined_call_operand.vmem [shape: f32[2,256], index: 1, kind: input, shape index: {}]   ;;  %s5399_s2 = inlined_call_operand.vmem [shape: f32[32,8], index: 2, kind: input, shape index: {}]   ;;  %s5400_s3 = inlined_call_operand.vmem [shape: f32[9,8], index: 3, kind: input, shape index: {}]   ;;  %s5401_s4 = inlined_call_operand.vmem [shape: f32[8,32], index: 4, kind: input, shape index: {}]   ;;  %s5402_s5 = inlined_call_operand.vmem [shape: f32[1,32], index: 5, kind: input, shape index: {}]   ;;  %s5403_s6 = inlined_call_operand.vmem [shape: f32[1,32], index: 6, kind: input, shape index: {}]   ;;  %s5404_s7 = inlined_call_operand.hbm [shape: f32[2,8,32], index: 7, kind: output, shape index: {}]  }
   0x1   :  { %14 = vsyncpa [#allocation3 + $0x1], 0  ;;  %s3108_s24 = smov 0   ;;  %s3110_s25 = smov 0  }
   0x2   :  { %s3112_s26 = smov 0   ;;  %s3114_s27 = smov 0  }
   0x3 LB: > { %s3129_s28 = sadd.s32 4294967295, %s3061_s27   ;;  %s2783_s29 = sadd.s32 4294967294, %s3061_s27   ;;  %s3061_s27 = sphi %s3114_s27, %s5575_s27   ;;  %s3057_s26 = sphi %s3112_s26, %s5574_s26   ;;  %s3053_s25 = sphi %s3110_s25, %s5573_s25   ;;  %s3049_s24 = sphi %s3108_s24, %s5572_s24  }
   0x4   : > { %s3133_s30 = sadd.s32 1, %s3061_s27   ;;  %s179_s8 = sadd.s32 1, %s3057_s26 }
   0x5   : > { %s176_s9 = ssub.s32 %s3061_s27, %s3133_s30  ;;  %p189_p0 = scmp.ne.s32.totalorder %s3057_s26, %s3053_s25 }
   0x6   : > { %p177_p1 = scmp.eq.s32.totalorder %s176_s9, 0  ;;  %p190_p2 = scmp.eq.s32.totalorder %s3129_s28, 1 }
   0x7   : > { %p195_p3 = scmp.ne.s32.totalorder %s3053_s25, %s3049_s24  ;;  %p196_p4 = scmp.eq.s32.totalorder %s2783_s29, 1 }
   0x8   : > { %s3144_s10 = scalar_select %p177_p1, %s3057_s26, %s179_s8  }
   0x9   : > { %p3146_p5 = por %p190_p2, %p189_p0  ;;  %p3150_p6 = por %p196_p4, %p195_p3 }
   0xa   : > { %p2786_p7 = scmp.ge.s32.totalorder %s3061_s27, 1  ;;  %p240_p8 = scmp.lt.s32.totalorder %s3061_s27, 3 }
   0xc   : > { %p241_p9 = pnand %p2786_p7, %p240_p8 }
   0xe   : > { %244 = sbr.rel (%p241_p9) target bundleno = 1367 (0x557), region = 48 }
  0x13   : > { %p272_p10 = scmp.lt.s32.totalorder %s3129_s28, 1  ;;  %vm472_vm0 = vcmask 130048   ;;  %vm1230_vm1 = vcmask 130112   ;;  %vm1234_vm2 = vcmask 195712   ;;  %vm1238_vm3 = vcmask 261312   ;;  %s3063_s9 = smov 16  }
  0x14   : > { %vm1289_vm4 = vcmask 1041409   ;;  %vm1291_vm5 = vcmask 1042434   ;;  %vm1293_vm6 = vcmask 1043459   ;;  %vm1295_vm7 = vcmask 1044484   ;;  %s269_s8 = sand.u32 1, %s3053_s25   ;;  %s2805_s16 = sshll.u32 %s3129_s28, 3 }
  0x15   : > { %s273_s13 = scalar_select %p272_p10, %s3129_s28, 1  ;;  %vm1297_vm8 = vcmask 1045509   ;;  %vm1299_vm9 = vcmask 1046534   ;;  %vm1301_vm10 = vcmask 1047559   ;;  %vm1303_vm11 = vcmask 261120  }
  0x16   : > { %vm2609_vm12 = vcmask 64512   ;;  %s2709_s28 = scalar_lea.sflag [#allocation3], %s269_s8 }
  0x17   : > { %s2808_s14 = sshll.u32 %s273_s13, 9  ;;  %s3019_s13 = scalar_lea.hbm %s5404_s7, 16 }
  0x18   : > { %s3161_s17 = scalar_lea.vmem %s5397_s0, %s2808_s14 }
  0x19   : > { %v3164_v0 = vld [vmem:[%s3161_s17 + $0x40] sm:$0xff]  ;;  %v3167_v1 = vld [vmem:[%s3161_s17 + $0x48] sm:$0xff]  ;;  %v3188_v9 = vld [vmem:[%s3161_s17 + $0x50] sm:$0xff] }
  0x1a   : > { %v3170_v2 = vld [vmem:[%s3161_s17 + $0x20] sm:$0xff]  ;;  %v356_v3 = vadd.f32 %v3167_v1, %v3164_v0  ;;  %v3175_v4 = vld [vmem:[%s3161_s17 + $0x28] sm:$0xff]  ;;  %v3191_v10 = vld [vmem:[%s3161_s17 + $0x58] sm:$0xff] }
  0x1b   : > { %v3178_v5 = vld [vmem:[%s3161_s17] sm:$0xff]  ;;  %v3181_v6 = vld [vmem:[%s3161_s17 + $0x8] sm:$0xff]  ;;  %v350_v7 = vadd.f32 %v3175_v4, %v3170_v2  ;;  %v3194_v11 = vld [vmem:[%s3161_s17 + $0x30] sm:$0xff]  ;;  %v359_v15 = vadd.f32 %v3191_v10, %v3188_v9 }
  0x1c   : > { %v344_v8 = vadd.f32 %v3181_v6, %v3178_v5  ;;  %357 = vadd.xlane.f32.xlu2 %v356_v3  ;;  %v3197_v12 = vld [vmem:[%s3161_s17 + $0x38] sm:$0xff]  ;;  %v3200_v13 = vld [vmem:[%s3161_s17 + $0x10] sm:$0xff]  ;;  %v3212_v18 = vld [vmem:[%s3161_s17 + $0x80] sm:$0xff] }
  0x1d   : > { %351 = vadd.xlane.f32.xlu1 %v350_v7  ;;  %v3203_v14 = vld [vmem:[%s3161_s17 + $0x18] sm:$0xff]  ;;  %v353_v16 = vadd.f32 %v3197_v12, %v3194_v11  ;;  %v3215_v19 = vld [vmem:[%s3161_s17 + $0x88] sm:$0xff]  ;;  %v3218_v20 = vld [vmem:[%s3161_s17 + $0x70] sm:$0xff] }
  0x1e   : > { %345 = vadd.xlane.f32.xlu0 %v344_v8  ;;  %v347_v17 = vadd.f32 %v3203_v14, %v3200_v13  ;;  %v3221_v21 = vld [vmem:[%s3161_s17 + $0x78] sm:$0xff]  ;;  %v3224_v22 = vld [vmem:[%s3161_s17 + $0x60] sm:$0xff]  ;;  %v3227_v23 = vld [vmem:[%s3161_s17 + $0x68] sm:$0xff]  ;;  %v368_v24 = vadd.f32 %v3215_v19, %v3212_v18 }
  0x1f   : > { %v365_v25 = vadd.f32 %v3221_v21, %v3218_v20  ;;  %v362_v26 = vadd.f32 %v3227_v23, %v3224_v22  ;;  %v3236_v27 = vld [vmem:[%s3161_s17 + $0xb0] sm:$0xff]  ;;  %v3239_v28 = vld [vmem:[%s3161_s17 + $0xb8] sm:$0xff]  ;;  %v3242_v29 = vld [vmem:[%s3161_s17 + $0xa0] sm:$0xff] }
  0x20   : > { %v3245_v30 = vld [vmem:[%s3161_s17 + $0xa8] sm:$0xff]  ;;  %v3248_v31 = vld [vmem:[%s3161_s17 + $0x90] sm:$0xff]  ;;  %v3251_v32 = vld [vmem:[%s3161_s17 + $0x98] sm:$0xff]  ;;  %v377_v33 = vadd.f32 %v3239_v28, %v3236_v27 }
  0x21   : > { %v374_v34 = vadd.f32 %v3245_v30, %v3242_v29  ;;  %v371_v35 = vadd.f32 %v3251_v32, %v3248_v31  ;;  %v3260_v36 = vld [vmem:[%s3161_s17 + $0xe0] sm:$0xff]  ;;  %v3263_v37 = vld [vmem:[%s3161_s17 + $0xe8] sm:$0xff]  ;;  %v3266_v38 = vld [vmem:[%s3161_s17 + $0xd0] sm:$0xff] }
  0x22   : > { %v3269_v39 = vld [vmem:[%s3161_s17 + $0xd8] sm:$0xff]  ;;  %v3272_v40 = vld [vmem:[%s3161_s17 + $0xc0] sm:$0xff]  ;;  %v3275_v41 = vld [vmem:[%s3161_s17 + $0xc8] sm:$0xff]  ;;  %v386_v42 = vadd.f32 %v3263_v37, %v3260_v36 }
  0x23   : > { %v383_v43 = vadd.f32 %v3269_v39, %v3266_v38  ;;  %v380_v44 = vadd.f32 %v3275_v41, %v3272_v40  ;;  %v3284_v45 = vld [vmem:[%s3161_s17 + $0x110] sm:$0xff]  ;;  %v3287_v46 = vld [vmem:[%s3161_s17 + $0x118] sm:$0xff]  ;;  %v3290_v47 = vld [vmem:[%s3161_s17 + $0x100] sm:$0xff] }
  0x24   : > { %360 = vadd.xlane.f32.xlu2 %v359_v15  ;;  %v3293_v48 = vld [vmem:[%s3161_s17 + $0x108] sm:$0xff]  ;;  %v3296_v49 = vld [vmem:[%s3161_s17 + $0xf0] sm:$0xff]  ;;  %v3299_v50 = vld [vmem:[%s3161_s17 + $0xf8] sm:$0xff]  ;;  %v395_v51 = vadd.f32 %v3287_v46, %v3284_v45 }
  0x25   : > { %354 = vadd.xlane.f32.xlu1 %v353_v16  ;;  %v392_v52 = vadd.f32 %v3293_v48, %v3290_v47  ;;  %v389_v53 = vadd.f32 %v3299_v50, %v3296_v49  ;;  %v3308_v54 = vld [vmem:[%s3161_s17 + $0x140] sm:$0xff]  ;;  %v3311_v55 = vld [vmem:[%s3161_s17 + $0x148] sm:$0xff]  ;;  %v3314_v56 = vld [vmem:[%s3161_s17 + $0x130] sm:$0xff] }
  0x26   : > { %348 = vadd.xlane.f32.xlu0 %v347_v17  ;;  %v3317_v57 = vld [vmem:[%s3161_s17 + $0x138] sm:$0xff]  ;;  %v3320_v58 = vld [vmem:[%s3161_s17 + $0x120] sm:$0xff]  ;;  %v3323_v59 = vld [vmem:[%s3161_s17 + $0x128] sm:$0xff]  ;;  %v404_v60 = vadd.f32 %v3311_v55, %v3308_v54 }
  0x27   : > { %v401_v61 = vadd.f32 %v3317_v57, %v3314_v56  ;;  %v398_v62 = vadd.f32 %v3323_v59, %v3320_v58  ;;  %v3332_v63 = vld [vmem:[%s3161_s17 + $0x170] sm:$0xff]  ;;  %v3335_v3 = vld [vmem:[%s3161_s17 + $0x178] sm:$0xff]  ;;  %v3338_v7 = vld [vmem:[%s3161_s17 + $0x160] sm:$0xff] }
  0x28   : > { %5472 = vst [vmem:[#allocation5_spill] sm:$0xff] %v3335_v3  ;;  %v3341_v8 = vld [vmem:[%s3161_s17 + $0x168] sm:$0xff]  ;;  %v3344_v15 = vld [vmem:[%s3161_s17 + $0x150] sm:$0xff]  ;;  %v3347_v16 = vld [vmem:[%s3161_s17 + $0x158] sm:$0xff]  ;;  %v413_v17 = vadd.f32 %v3335_v3, %v3332_v63 }
  0x2c   : > { %369 = vadd.xlane.f32.xlu2 %v368_v24  ;;  %v410_v24 = vadd.f32 %v3341_v8, %v3338_v7 }
  0x2d   : > { %366 = vadd.xlane.f32.xlu1 %v365_v25  ;;  %v407_v25 = vadd.f32 %v3347_v16, %v3344_v15 }
  0x2e   : > { %363 = vadd.xlane.f32.xlu0 %v362_v26  ;;  %v3356_v26 = vld [vmem:[%s3161_s17 + $0x1a0] sm:$0xff] }
  0x34   : > { %378 = vadd.xlane.f32.xlu2 %v377_v33  ;;  %v3359_v33 = vld [vmem:[%s3161_s17 + $0x1a8] sm:$0xff] }
  0x35   : > { %375 = vadd.xlane.f32.xlu1 %v374_v34  ;;  %5473 = vst [vmem:[#allocation6_spill] sm:$0xff] %v3359_v33  ;;  %v3362_v34 = vld [vmem:[%s3161_s17 + $0x190] sm:$0xff] }
  0x36   : > { %372 = vadd.xlane.f32.xlu0 %v371_v35  ;;  %v3365_v35 = vld [vmem:[%s3161_s17 + $0x198] sm:$0xff] }
  0x37   : > { %5474 = vst [vmem:[#allocation7_spill] sm:$0xff] %v3365_v35 }
  0x3c   : > { %387 = vadd.xlane.f32.xlu2 %v386_v42  ;;  %v3368_v42 = vld [vmem:[%s3161_s17 + $0x180] sm:$0xff] }
  0x3d   : > { %384 = vadd.xlane.f32.xlu1 %v383_v43  ;;  %v3371_v43 = vld [vmem:[%s3161_s17 + $0x188] sm:$0xff] }
  0x3e   : > { %381 = vadd.xlane.f32.xlu0 %v380_v44  ;;  %5475 = vst [vmem:[#allocation8_spill] sm:$0xff] %v3371_v43  ;;  %v422_v44 = vadd.f32 %v3359_v33, %v3356_v26  ;;  %v3407_v33 = vld [vmem:[%s3161_s17 + $0x1f8] sm:$0xff] }
  0x3f   : > { %5479 = vst [vmem:[#allocation12_spill] sm:$0xff] %v3407_v33 }
  0x44   : > { %396 = vadd.xlane.f32.xlu2 %v395_v51  ;;  %v419_v51 = vadd.f32 %v3365_v35, %v3362_v34  ;;  %v3410_v35 = vld [vmem:[%s3161_s17 + $0x1e0] sm:$0xff] }
  0x45   : > { %393 = vadd.xlane.f32.xlu1 %v392_v52  ;;  %v416_v52 = vadd.f32 %v3371_v43, %v3368_v42  ;;  %v3413_v43 = vld [vmem:[%s3161_s17 + $0x1e8] sm:$0xff] }
  0x46   : > { %390 = vadd.xlane.f32.xlu0 %v389_v53  ;;  %v3380_v53 = vld [vmem:[%s3161_s17 + $0x1d0] sm:$0xff]  ;;  %5480 = vst [vmem:[#allocation13_spill] sm:$0xff] %v3413_v43 }
  0x4c   : > { %405 = vadd.xlane.f32.xlu2 %v404_v60  ;;  %v3383_v60 = vld [vmem:[%s3161_s17 + $0x1d8] sm:$0xff] }
  0x4d   : > { %402 = vadd.xlane.f32.xlu1 %v401_v61  ;;  %5476 = vst [vmem:[#allocation9_spill] sm:$0xff] %v3383_v60  ;;  %v3386_v61 = vld [vmem:[%s3161_s17 + $0x1c0] sm:$0xff] }
  0x4e   : > { %399 = vadd.xlane.f32.xlu0 %v398_v62  ;;  %v3389_v62 = vld [vmem:[%s3161_s17 + $0x1c8] sm:$0xff] }
  0x4f   : > { %5477 = vst [vmem:[#allocation10_spill] sm:$0xff] %v3389_v62 }
  0x54   : > { %414 = vadd.xlane.f32.xlu2 %v413_v17  ;;  %v3392_v17 = vld [vmem:[%s3161_s17 + $0x1b0] sm:$0xff] }
  0x55   : > { %411 = vadd.xlane.f32.xlu1 %v410_v24  ;;  %v3395_v24 = vld [vmem:[%s3161_s17 + $0x1b8] sm:$0xff] }
  0x56   : > { %408 = vadd.xlane.f32.xlu0 %v407_v25  ;;  %5478 = vst [vmem:[#allocation11_spill] sm:$0xff] %v3395_v24  ;;  %v431_v25 = vadd.f32 %v3383_v60, %v3380_v53  ;;  %v473_v60 = vsel %vm472_vm0, %v3178_v5, 0.0  ;;  %v491_v5 = vsel %vm472_vm0, %v3224_v22, 0.0  ;;  %v503_v22 = vsel %vm472_vm0, %v3242_v29, 0.0 }
  0x5c   : > { %423 = vadd.xlane.f32.xlu2 %v422_v44  ;;  %v428_v44 = vadd.f32 %v3389_v62, %v3386_v61 }
  0x5d   : > { %420 = vadd.xlane.f32.xlu1 %v419_v51  ;;  %v425_v51 = vadd.f32 %v3395_v24, %v3392_v17  ;;  %v476_v24 = vsel %vm472_vm0, %v3200_v13, 0.0  ;;  %v494_v13 = vsel %vm472_vm0, %v3218_v20, 0.0 }
  0x5e   : > { %417 = vadd.xlane.f32.xlu0 %v416_v52  ;;  %v3404_v52 = vld [vmem:[%s3161_s17 + $0x1f0] sm:$0xff] }
  0x5f   : > { %v437_v62 = vadd.f32 %v3407_v33, %v3404_v52 }
  0x64   : > { %432 = vadd.xlane.f32.xlu2 %v431_v25  ;;  %v434_v25 = vadd.f32 %v3413_v43, %v3410_v35 }
  0x65   : > { %429 = vadd.xlane.f32.xlu1 %v428_v44  ;;  %v482_v44 = vsel %vm472_vm0, %v3194_v11, 0.0  ;;  %v497_v11 = vsel %vm472_vm0, %v3212_v18, 0.0 }
  0x66   : > { %426 = vadd.xlane.f32.xlu0 %v425_v51  ;;  %v479_v51 = vsel %vm472_vm0, %v3170_v2, 0.0  ;;  %v500_v2 = vsel %vm472_vm0, %v3248_v31, 0.0 }
  0x6c   : > { %474 = vadd.xlane.f32.xlu2 %v473_v60  ;;  %v488_v60 = vsel %vm472_vm0, %v3188_v9, 0.0  ;;  %v509_v9 = vsel %vm472_vm0, %v3272_v40, 0.0  ;;  %v515_v40 = vsel %vm472_vm0, %v3260_v36, 0.0  ;;  %v521_v36 = vsel %vm472_vm0, %v3290_v47, 0.0 }
  0x6d   : > { %438 = vadd.xlane.f32.xlu1 %v437_v62  ;;  %v485_v62 = vsel %vm472_vm0, %v3164_v0, 0.0  ;;  %v506_v0 = vsel %vm472_vm0, %v3236_v27, 0.0  ;;  %v512_v27 = vsel %vm472_vm0, %v3266_v38, 0.0 }
  0x6e   : > { %435 = vadd.xlane.f32.xlu0 %v434_v25 }
  0x74   : > { %483 = vadd.xlane.f32.xlu2 %v482_v44 }
  0x75   : > { %480 = vadd.xlane.f32.xlu1 %v479_v51  ;;  %v527_v51 = vsel %vm472_vm0, %v3320_v58, 0.0  ;;  %v533_v58 = vsel %vm472_vm0, %v3308_v54, 0.0  ;;  %v539_v54 = vsel %vm472_vm0, %v3338_v7, 0.0 }
  0x76   : > { %477 = vadd.xlane.f32.xlu0 %v476_v24  ;;  %v518_v24 = vsel %vm472_vm0, %v3296_v49, 0.0  ;;  %v524_v49 = vsel %vm472_vm0, %v3284_v45, 0.0  ;;  %v530_v45 = vsel %vm472_vm0, %v3314_v56, 0.0 }
  0x7c   : > { %492 = vadd.xlane.f32.xlu2 %v491_v5 }
  0x7d   : > { %489 = vadd.xlane.f32.xlu1 %v488_v60 }
  0x7e   : > { %486 = vadd.xlane.f32.xlu0 %v485_v62  ;;  %v536_v62 = vsel %vm472_vm0, %v3344_v15, 0.0  ;;  %v542_v15 = vsel %vm472_vm0, %v3332_v63, 0.0  ;;  %v548_v63 = vsel %vm472_vm0, %v3362_v34, 0.0  ;;  %v3520_v34 = vld [vmem:[%s5399_s2 + $0x18] sm:$0xff] }
  0x7f   : > { %1318 = vmatpush.msra.mxu0 %v3520_v34  ;;  %1437 = vmatpush.msra.mxu1 %v3520_v34 }
  0x80   : > { %1557 = vmatpush.msra.mxu2 %v3520_v34  ;;  %1677 = vmatpush.msra.mxu3 %v3520_v34 }
  0x84   : > { %501 = vadd.xlane.f32.xlu2 %v500_v2 }
  0x85   : > { %498 = vadd.xlane.f32.xlu1 %v497_v11 }
  0x86   : > { %495 = vadd.xlane.f32.xlu0 %v494_v13  ;;  %v545_v13 = vsel %vm472_vm0, %v3368_v42, 0.0  ;;  %v551_v42 = vsel %vm472_vm0, %v3356_v26, 0.0  ;;  %v557_v26 = vsel %vm472_vm0, %v3386_v61, 0.0  ;;  %v3533_v61 = vld [vmem:[%s5399_s2 + $0x10] sm:$0xff] }
  0x87   : > { %1319 = vmatpush.msra.mxu0 %v3533_v61  ;;  %1438 = vmatpush.msra.mxu1 %v3533_v61 }
  0x88   : > { %1558 = vmatpush.msra.mxu2 %v3533_v61  ;;  %1678 = vmatpush.msra.mxu3 %v3533_v61 }
  0x8c   : > { %510 = vadd.xlane.f32.xlu2 %v509_v9 }
  0x8d   : > { %507 = vadd.xlane.f32.xlu1 %v506_v0 }
  0x8e   : > { %504 = vadd.xlane.f32.xlu0 %v503_v22  ;;  %v554_v22 = vsel %vm472_vm0, %v3392_v17, 0.0  ;;  %v560_v17 = vsel %vm472_vm0, %v3380_v53, 0.0 }
  0x8f   : > { %v3445_v31 = vpop.xlane.xlu2 %357 }
  0x90   : > { %v3447_v18 = vpop.xlane.xlu1 %351 }
  0x91   : > { %v3449_v20 = vpop.xlane.xlu0 %345 }
  0x94   : > { %519 = vadd.xlane.f32.xlu2 %v518_v24 }
  0x95   : > { %516 = vadd.xlane.f32.xlu1 %v515_v40 }
  0x96   : > { %513 = vadd.xlane.f32.xlu0 %v512_v27  ;;  %v563_v27 = vsel %vm472_vm0, %v3410_v35, 0.0 }
  0x97   : > { %v3457_v29 = vpop.xlane.xlu2 %360 }
  0x98   : > { %v3459_v25 = vpop.xlane.xlu1 %354 }
  0x99   : > { %v3461_v44 = vpop.xlane.xlu0 %348 }
  0x9c   : > { %528 = vadd.xlane.f32.xlu2 %v527_v51 }
  0x9d   : > { %525 = vadd.xlane.f32.xlu1 %v524_v49  ;;  %v3541_v49 = vld [vmem:[%s5399_s2 + $0x8] sm:$0xff] }
  0x9e   : > { %522 = vadd.xlane.f32.xlu0 %v521_v36  ;;  %v566_v36 = vsel %vm472_vm0, %v3404_v52, 0.0  ;;  %1320 = vmatpush.msra.mxu0 %v3541_v49 }
  0x9f   : > { %v3469_v38 = vpop.xlane.xlu2 %369  ;;  %1439 = vmatpush.msra.mxu1 %v3541_v49  ;;  %1559 = vmatpush.msra.mxu2 %v3541_v49 }
  0xa0   : > { %v3471_v5 = vpop.xlane.xlu1 %366  ;;  %1679 = vmatpush.msra.mxu3 %v3541_v49 }
  0xa1   : > { %v3473_v60 = vpop.xlane.xlu0 %363 }
  0xa4   : > { %537 = vadd.xlane.f32.xlu2 %v536_v62  ;;  %v3549_v62 = vld [vmem:[%s5399_s2] sm:$0xff] }
  0xa5   : > { %534 = vadd.xlane.f32.xlu1 %v533_v58  ;;  %1321 = vmatpush.msra.mxu0 %v3549_v62  ;;  %v1225_v58 = vlaneseq }
  0xa6   : > { %531 = vadd.xlane.f32.xlu0 %v530_v45  ;;  %1440 = vmatpush.msra.mxu1 %v3549_v62 }
  0xa7   : > { %v3481_v47 = vpop.xlane.xlu2 %378  ;;  %1560 = vmatpush.msra.mxu2 %v3549_v62  ;;  %1680 = vmatpush.msra.mxu3 %v3549_v62 }
  0xa8   : > { %v3483_v2 = vpop.xlane.xlu1 %375  ;;  %1797 = vmatpush.msrb.mxu0 %v3520_v34  ;;  %2013 = vmatpush.msrb.mxu1 %v3520_v34 }
  0xa9   : > { %v3485_v11 = vpop.xlane.xlu0 %372  ;;  %2197 = vmatpush.msrb.mxu2 %v3520_v34  ;;  %2413 = vmatpush.msrb.mxu3 %v3520_v34 }
  0xaa   : > { %1798 = vmatpush.msrb.mxu0 %v3533_v61  ;;  %2014 = vmatpush.msrb.mxu1 %v3533_v61 }
  0xab   : > { %2198 = vmatpush.msrb.mxu2 %v3533_v61  ;;  %2414 = vmatpush.msrb.mxu3 %v3533_v61 }
  0xac   : > { %546 = vadd.xlane.f32.xlu2 %v545_v13  ;;  %1799 = vmatpush.msrb.mxu0 %v3541_v49 }
  0xad   : > { %543 = vadd.xlane.f32.xlu1 %v542_v15  ;;  %v3576_v15 = vand.u32 127, %v1225_v58  ;;  %2015 = vmatpush.msrb.mxu1 %v3541_v49 }
  0xae   : > { %540 = vadd.xlane.f32.xlu0 %v539_v54  ;;  %2199 = vmatpush.msrb.mxu2 %v3541_v49 }
  0xaf   : > { %v3493_v56 = vpop.xlane.xlu2 %387  ;;  %1800 = vmatpush.msrb.mxu0 %v3549_v62  ;;  %2415 = vmatpush.msrb.mxu3 %v3541_v49  ;;  %v3585_v54 = vadd.s32 4294967288, %v3576_v15  ;;  %v1247_v58 = vperm.slane %v3469_v38, %v3576_v15  ;;  %v1227_v38 = vperm.slane %v3449_v20, %v3576_v15 }
  0xb0   : > { %v3495_v9 = vpop.xlane.xlu1 %384  ;;  %2016 = vmatpush.msrb.mxu1 %v3549_v62  ;;  %2200 = vmatpush.msrb.mxu2 %v3549_v62 }
  0xb1   : > { %v3497_v0 = vpop.xlane.xlu0 %381  ;;  %2416 = vmatpush.msrb.mxu3 %v3549_v62  ;;  %v1248_v33 = vperm.slane %v3485_v11, %v3585_v54  ;;  %v1229_v43 = vperm.slane %v3461_v44, %v3585_v54 }
  0xb4   : > { %555 = vadd.xlane.f32.xlu2 %v554_v22 }
  0xb5   : > { %552 = vadd.xlane.f32.xlu1 %v551_v42  ;;  %v3591_v42 = vadd.s32 4294967280, %v3576_v15 }
  0xb6   : > { %549 = vadd.xlane.f32.xlu0 %v548_v63  ;;  %v3594_v63 = vadd.s32 4294967272, %v3576_v15 }
  0xb7   : > { %v3505_v7 = vpop.xlane.xlu2 %396  ;;  %v1233_v3 = vperm.slane %v3447_v18, %v3591_v42  ;;  %v1249_v18 = vsel %vm1230_vm1, %v1248_v33, %v1247_v58 }
  0xb8   : > { %v3507_v24 = vpop.xlane.xlu1 %393  ;;  %v1237_v44 = vperm.slane %v3459_v25, %v3594_v63  ;;  %v1231_v25 = vsel %vm1230_vm1, %v1229_v43, %v1227_v38  ;;  %v1245_v33 = vperm.slane %v3471_v5, %v3594_v63  ;;  %v1257_v5 = vperm.slane %v3493_v56, %v3591_v42 }
  0xb9   : > { %v3509_v40 = vpop.xlane.xlu0 %390  ;;  %v1235_v56 = vsel %vm1234_vm2, %v1233_v3, %v1231_v25 }
  0xbc   : > { %564 = vadd.xlane.f32.xlu2 %v563_v27 }
  0xbd   : > { %561 = vadd.xlane.f32.xlu1 %v560_v17 }
  0xbe   : > { %558 = vadd.xlane.f32.xlu0 %v557_v26  ;;  %v1240_v26 = vperm.slane %v3445_v31, %v3576_v15  ;;  %v1243_v31 = vperm.slane %v3473_v60, %v3591_v42  ;;  %v1255_v60 = vperm.slane %v3495_v9, %v3585_v54  ;;  %v1262_v9 = vperm.slane %v3505_v7, %v3585_v54 }
  0xbf   : > { %v3522_v51 = vpop.xlane.xlu2 %405 }
  0xc0   : > { %v3526_v35 = vpop.xlane.xlu1 %402 }
  0xc1   : > { %v3528_v53 = vpop.xlane.xlu0 %399 }
  0xc6   : > { %567 = vadd.xlane.f32.xlu0 %v566_v36  ;;  %v1241_v36 = vperm.slane %v3457_v29, %v3585_v54  ;;  %v1250_v29 = vperm.slane %v3483_v2, %v3591_v42  ;;  %v1254_v2 = vperm.slane %v3497_v0, %v3576_v15  ;;  %v1261_v0 = vperm.slane %v3507_v24, %v3576_v15 }
  0xc7   : > { %v3560_v52 = vpop.xlane.xlu2 %414 }
  0xc8   : > { %v3564_v45 = vpop.xlane.xlu1 %411  ;;  %v1242_v11 = vsel %vm1230_vm1, %v1241_v36, %v1240_v26  ;;  %v1251_v36 = vsel %vm1234_vm2, %v1250_v29, %v1249_v18 }
  0xc9   : > { %v3566_v13 = vpop.xlane.xlu0 %408  ;;  %v1271_v7 = vperm.slane %v3564_v45, %v3591_v42  ;;  %v1263_v45 = vsel %vm1230_vm1, %v1262_v9, %v1261_v0 }
  0xca   : > { %v1269_v20 = vperm.slane %v3566_v13, %v3585_v54  ;;  %v1252_v13 = vperm.slane %v3481_v47, %v3594_v63  ;;  %v1256_v47 = vsel %vm1230_vm1, %v1255_v60, %v1254_v2  ;;  %v1239_v2 = vsel %vm1238_vm3, %v1237_v44, %v1235_v56 }
  0xcb   : > { %v1258_v3 = vsel %vm1234_vm2, %v1257_v5, %v1256_v47 }
  0xcf   : > { %v3587_v22 = vpop.xlane.xlu2 %423 }
  0xd0   : > { %v421_v27 = vpop.xlane.xlu1 %420 }
  0xd1   : > { %v418_v17 = vpop.xlane.xlu0 %417  ;;  %v1276_v24 = vperm.slane %v421_v27, %v3585_v54  ;;  %v1266_v27 = vperm.slane %v3526_v35, %v3594_v63 }
  0xd4   : > { %603 = vrot.lane.b32.xlu2 %v3203_v14, %s3063_s9  ;;  %v1268_v14 = vperm.slane %v3522_v51, %v3576_v15  ;;  %v1244_v51 = vsel %vm1234_vm2, %v1243_v31, %v1242_v11  ;;  %v1275_v31 = vperm.slane %v418_v17, %v3576_v15  ;;  %v1253_v17 = vsel %vm1238_vm3, %v1252_v13, %v1251_v36 }
  0xd5   : > { %v1246_v38 = vsel %vm1238_vm3, %v1245_v33, %v1244_v51  ;;  %v1273_v11 = vperm.slane %v3560_v52, %v3594_v63 }
  0xd6   : > { %601 = vrot.lane.b32.xlu1 %v3181_v6, %s3063_s9  ;;  %v1264_v6 = vperm.slane %v3528_v53, %v3591_v42  ;;  %v1259_v53 = vperm.slane %v3509_v40, %v3594_v63  ;;  %v1270_v29 = vsel %vm1230_vm1, %v1269_v20, %v1268_v14  ;;  %v1278_v40 = vperm.slane %v3587_v22, %v3591_v42 }
  0xd7   : > { %v433_v26 = vpop.xlane.xlu2 %432  ;;  %v1272_v18 = vsel %vm1234_vm2, %v1271_v7, %v1270_v29  ;;  %v1277_v60 = vsel %vm1230_vm1, %v1276_v24, %v1275_v31 }
  0xd8   : > { %v430_v43 = vpop.xlane.xlu1 %429  ;;  %v1260_v14 = vsel %vm1238_vm3, %v1259_v53, %v1258_v3  ;;  %v1283_v52 = vperm.slane %v433_v26, %v3585_v54  ;;  %v1274_v0 = vsel %vm1238_vm3, %v1273_v11, %v1272_v18  ;;  %v1279_v26 = vsel %vm1234_vm2, %v1278_v40, %v1277_v60  ;;  %v5488_v11 = vld [vmem:[#allocation13_spill] sm:$0xff]  ;;  %v5489_v18 = vld [vmem:[#allocation12_spill] sm:$0xff] }
  0xd9   : > { %v427_v58 = vpop.xlane.xlu0 %426  ;;  %v1282_v20 = vperm.slane %v430_v43, %v3576_v15 }
  0xda   : > { %605 = vrot.lane.b32.xlu0 %v3175_v4, %s3063_s9  ;;  %v1265_v4 = vsel %vm1234_vm2, %v1264_v6, %v1263_v45  ;;  %v1280_v35 = vperm.slane %v427_v58, %v3594_v63 }
  0xdb   : > { %v1267_v22 = vsel %vm1238_vm3, %v1266_v27, %v1265_v4  ;;  %v1284_v6 = vsel %vm1230_vm1, %v1283_v52, %v1282_v20  ;;  %v5487_v4 = vld [vmem:[#allocation9_spill] sm:$0xff] }
  0xdc   : > { %607 = vrot.lane.b32.xlu2 %v3197_v12, %s3063_s9  ;;  %v1290_v12 = vsel %vm1289_vm4, %v1246_v38, %v1239_v2  ;;  %v1281_v36 = vsel %vm1238_vm3, %v1280_v35, %v1279_v26  ;;  %v5486_v38 = vld [vmem:[#allocation10_spill] sm:$0xff] }
  0xdd   : > { %v1292_v33 = vsel %vm1291_vm5, %v1253_v17, %v1290_v12 }
  0xde   : > { %609 = vrot.lane.b32.xlu1 %v3167_v1, %s3063_s9  ;;  %v1294_v51 = vsel %vm1293_vm6, %v1260_v14, %v1292_v33 }
  0xdf   : > { %v3680_v25 = vpop.xlane.xlu2 %474  ;;  %v1296_v43 = vsel %vm1295_vm7, %v1267_v22, %v1294_v51 }
  0xe0   : > { %v439_v44 = vpop.xlane.xlu1 %438  ;;  %v1298_v5 = vsel %vm1297_vm8, %v1274_v0, %v1296_v43  ;;  %v1360_v40 = vperm.slane %v3680_v25, %v3576_v15 }
  0xe1   : > { %v436_v9 = vpop.xlane.xlu0 %435  ;;  %v1287_v1 = vperm.slane %v439_v44, %v3594_v63  ;;  %v1300_v24 = vsel %vm1299_vm9, %v1281_v36, %v1298_v5 }
  0xe2   : > { %v1285_v13 = vperm.slane %v436_v9, %v3591_v42  ;;  %611 = vrot.lane.b32.xlu0 %v3191_v10, %s3063_s9 }
  0xe4   : > { %v1286_v58 = vsel %vm1234_vm2, %v1285_v13, %v1284_v6  ;;  %613 = vrot.lane.b32.xlu2 %v3227_v23, %s3063_s9 }
  0xe5   : > { %v1288_v7 = vsel %vm1238_vm3, %v1287_v1, %v1286_v58 }
  0xe6   : > { %v1302_v10 = vsel %vm1301_vm10, %v1288_v7, %v1300_v24  ;;  %615 = vrot.lane.b32.xlu1 %v3221_v21, %s3063_s9 }
  0xe7   : > { %2791 = vmatmul.msk.f32.vlgmr.msra.gmra.mxu0 %vm1303_vm11, %v1302_v10  ;;  %v3703_v31 = vpop.xlane.xlu2 %483 }
  0xe8   : > { %2597 = vmatpush.msra.mxu0 %v3520_v34  ;;  %v3706_v47 = vpop.xlane.xlu1 %480  ;;  %v1365_v51 = vperm.slane %v3703_v31, %v3594_v63 }
  0xe9   : > { %v478_v53 = vpop.xlane.xlu0 %477  ;;  %v1363_v20 = vperm.slane %v3706_v47, %v3591_v42 }
  0xea   : > { %617 = vrot.lane.b32.xlu0 %v3215_v19, %s3063_s9  ;;  %2598 = vmatpush.msra.mxu0 %v3533_v61  ;;  %v1361_v3 = vperm.slane %v478_v53, %v3585_v54 }
  0xec   : > { %2599 = vmatpush.msra.mxu0 %v3541_v49  ;;  %619 = vrot.lane.b32.xlu2 %v3251_v32, %s3063_s9  ;;  %v5482_v49 = vld [vmem:[#allocation8_spill] sm:$0xff]  ;;  %v1362_v12 = vsel %vm1230_vm1, %v1361_v3, %v1360_v40 }
  0xed   : > { %v1364_v1 = vsel %vm1234_vm2, %v1363_v20, %v1362_v12 }
  0xee   : > { %2600 = vmatpush.msra.mxu0 %v3549_v62  ;;  %621 = vrot.lane.b32.xlu1 %v3245_v30, %s3063_s9  ;;  %v5483_v62 = vld [vmem:[#allocation7_spill] sm:$0xff] }
  0xef   : > { %v3717_v21 = vpop.xlane.xlu2 %492 }
  0xf0   : > { %v490_v23 = vpop.xlane.xlu1 %489  ;;  %v1370_v22 = vperm.slane %v3717_v21, %v3591_v42 }
  0xf1   : > { %v487_v34 = vpop.xlane.xlu0 %486  ;;  %v1368_v35 = vperm.slane %v490_v23, %v3585_v54 }
  0xf2   : > { %623 = vrot.lane.b32.xlu0 %v3239_v28, %s3063_s9  ;;  %v1367_v2 = vperm.slane %v487_v34, %v3576_v15 }
  0xf4   : > { %625 = vrot.lane.b32.xlu2 %v3275_v41, %s3063_s9  ;;  %v1369_v44 = vsel %vm1230_vm1, %v1368_v35, %v1367_v2 }
  0xf5   : > { %v1371_v7 = vsel %vm1234_vm2, %v1370_v22, %v1369_v44 }
  0xf6   : > { %627 = vrot.lane.b32.xlu1 %v3269_v39, %s3063_s9 }
  0xf7   : > { %v3725_v19 = vpop.xlane.xlu2 %501 }
  0xf8   : > { %v3727_v32 = vpop.xlane.xlu1 %498  ;;  %v1375_v9 = vperm.slane %v3725_v19, %v3585_v54 }
  0xf9   : > { %v3729_v61 = vpop.xlane.xlu0 %495  ;;  %v1374_v0 = vperm.slane %v3727_v32, %v3576_v15 }
  0xfa   : > { %629 = vrot.lane.b32.xlu0 %v3263_v37, %s3063_s9  ;;  %v1372_v26 = vperm.slane %v3729_v61, %v3594_v63 }
  0xfb   : > { %v1376_v53 = vsel %vm1230_vm1, %v1375_v9, %v1374_v0 }
  0xfc   : > { %631 = vrot.lane.b32.xlu2 %v3299_v50, %s3063_s9  ;;  %v1373_v21 = vsel %vm1238_vm3, %v1372_v26, %v1371_v7 }
  0xfe   : > { %633 = vrot.lane.b32.xlu1 %v3293_v48, %s3063_s9 }
  0xff   : > { %v511_v28 = vpop.xlane.xlu2 %510 }
 0x100   : > { %v3737_v30 = vpop.xlane.xlu1 %507  ;;  %v1381_v25 = vperm.slane %v511_v28, %v3576_v15 }
 0x101   : > { %v3739_v41 = vpop.xlane.xlu0 %504  ;;  %v1379_v23 = vperm.slane %v3737_v30, %v3594_v63 }
 0x102   : > { %635 = vrot.lane.b32.xlu0 %v3287_v46, %s3063_s9  ;;  %v1377_v13 = vperm.slane %v3739_v41, %v3591_v42 }
 0x104   : > { %637 = vrot.lane.b32.xlu2 %v3323_v59, %s3063_s9  ;;  %v1378_v61 = vsel %vm1234_vm2, %v1377_v13, %v1376_v53 }
 0x106   : > { %639 = vrot.lane.b32.xlu1 %v3317_v57, %s3063_s9  ;;  %v5481_v57 = vld [vmem:[#allocation5_spill] sm:$0xff] }
 0x107   : > { %v3747_v37 = vpop.xlane.xlu2 %519 }
 0x108   : > { %v3749_v39 = vpop.xlane.xlu1 %516  ;;  %v1386_v28 = vperm.slane %v3747_v37, %v3594_v63 }
 0x109   : > { %v514_v50 = vpop.xlane.xlu0 %513  ;;  %v1384_v36 = vperm.slane %v3749_v39, %v3591_v42 }
 0x10a   : > { %641 = vrot.lane.b32.xlu0 %v3311_v55, %s3063_s9  ;;  %v1382_v33 = vperm.slane %v514_v50, %v3585_v54 }
 0x10c   : > { %643 = vrot.lane.b32.xlu2 %v3347_v16, %s3063_s9  ;;  %v5484_v16 = vld [vmem:[#allocation6_spill] sm:$0xff]  ;;  %v1383_v24 = vsel %vm1230_vm1, %v1382_v33, %v1381_v25 }
 0x10d   : > { %v1385_v50 = vsel %vm1234_vm2, %v1384_v36, %v1383_v24 }
 0x10e   : > { %645 = vrot.lane.b32.xlu1 %v3341_v8, %s3063_s9  ;;  %v5485_v8 = vld [vmem:[#allocation11_spill] sm:$0xff] }
 0x10f   : > { %v3757_v46 = vpop.xlane.xlu2 %528 }
 0x110   : > { %v526_v48 = vpop.xlane.xlu1 %525  ;;  %v1391_v41 = vperm.slane %v3757_v46, %v3591_v42 }
 0x111   : > { %v523_v59 = vpop.xlane.xlu0 %522  ;;  %v1389_v6 = vperm.slane %v526_v48, %v3585_v54 }
 0x112   : > { %647 = vrot.lane.b32.xlu0 %v5481_v57, %s3063_s9  ;;  %v1388_v43 = vperm.slane %v523_v59, %v3576_v15 }
 0x114   : > { %649 = vrot.lane.b32.xlu2 %v5482_v49, %s3063_s9  ;;  %v1390_v48 = vsel %vm1230_vm1, %v1389_v6, %v1388_v43 }
 0x116   : > { %651 = vrot.lane.b32.xlu1 %v5483_v62, %s3063_s9  ;;  %v1380_v62 = vsel %vm1238_vm3, %v1379_v23, %v1378_v61 }
 0x117   : > { %v538_v55 = vpop.xlane.xlu2 %537 }
 0x118   : > { %v535_v29 = vpop.xlane.xlu1 %534  ;;  %v1396_v10 = vperm.slane %v538_v55, %v3585_v54 }
 0x119   : > { %v3765_v56 = vpop.xlane.xlu0 %531  ;;  %v1395_v31 = vperm.slane %v535_v29, %v3576_v15 }
 0x11a   : > { %653 = vrot.lane.b32.xlu0 %v5484_v16, %s3063_s9  ;;  %v1393_v30 = vperm.slane %v3765_v56, %v3594_v63  ;;  %v1366_v16 = vsel %vm1238_vm3, %v1365_v51, %v1364_v1  ;;  %v1387_v56 = vsel %vm1238_vm3, %v1386_v28, %v1385_v50 }
 0x11b   : > { %v1397_v57 = vsel %vm1230_vm1, %v1396_v10, %v1395_v31 }
 0x11c   : > { %655 = vrot.lane.b32.xlu2 %v5485_v8, %s3063_s9  ;;  %v1392_v8 = vsel %vm1234_vm2, %v1391_v41, %v1390_v48 }
 0x11e   : > { %657 = vrot.lane.b32.xlu1 %v5486_v38, %s3063_s9 }
 0x11f   : > { %v547_v45 = vpop.xlane.xlu2 %546 }
 0x120   : > { %v3773_v27 = vpop.xlane.xlu1 %543  ;;  %v1402_v58 = vperm.slane %v547_v45, %v3576_v15  ;;  %v1416_v45 = vsel %vm1289_vm4, %v1373_v21, %v1366_v16 }
 0x121   : > { %v541_v17 = vpop.xlane.xlu0 %540  ;;  %v1400_v49 = vperm.slane %v3773_v27, %v3594_v63  ;;  %v1394_v27 = vsel %vm1238_vm3, %v1393_v30, %v1392_v8 }
 0x122   : > { %659 = vrot.lane.b32.xlu0 %v5487_v4, %s3063_s9  ;;  %v1398_v34 = vperm.slane %v541_v17, %v3591_v42  ;;  %v1417_v4 = vsel %vm1291_vm5, %v1380_v62, %v1416_v45 }
 0x123   : > { %v1418_v35 = vsel %vm1293_vm6, %v1387_v56, %v1417_v4 }
 0x124   : > { %661 = vrot.lane.b32.xlu2 %v5488_v11, %s3063_s9  ;;  %v1399_v55 = vsel %vm1234_vm2, %v1398_v34, %v1397_v57 }
 0x125   : > { %v1401_v40 = vsel %vm1238_vm3, %v1400_v49, %v1399_v55 }
 0x126   : > { %663 = vrot.lane.b32.xlu1 %v5489_v18, %s3063_s9  ;;  %s2787_s9 = sshll.u32 %s269_s8, 3 }
 0x127   : > { %v556_v60 = vpop.xlane.xlu2 %555  ;;  %s271_s15 = scalar_lea.vmem [#allocation2], %s2787_s9 }
 0x128   : > { %v553_v14 = vpop.xlane.xlu1 %552  ;;  %v1407_v29 = vperm.slane %v556_v60, %v3594_v63  ;;  %s2721_s20 = sshll.u32 %s271_s15, 4  ;;  %s2722_s20 = int_to_ptr.vmem [resolvable:$true] %s2721_s20 }
 0x129   : > { %v550_v52 = vpop.xlane.xlu0 %549  ;;  %v1405_v39 = vperm.slane %v553_v14, %v3591_v42  ;;  %v1419_v14 = vsel %vm1295_vm7, %v1394_v27, %v1418_v35 }
 0x12a   : > { %v1403_v5 = vperm.slane %v550_v52, %v3585_v54  ;;  %v1420_v20 = vsel %vm1297_vm8, %v1401_v40, %v1419_v14 }
 0x12c   : > { %v1404_v59 = vsel %vm1230_vm1, %v1403_v5, %v1402_v58 }
 0x12d   : > { %v1406_v38 = vsel %vm1234_vm2, %v1405_v39, %v1404_v59 }
 0x12e   : > { %v1408_v60 = vsel %vm1238_vm3, %v1407_v29, %v1406_v38 }
 0x12f   : > { %v565_v47 = vpop.xlane.xlu2 %564  ;;  %v1421_v22 = vsel %vm1299_vm9, %v1408_v60, %v1420_v20 }
 0x130   : > { %v562_v19 = vpop.xlane.xlu1 %561  ;;  %v1412_v17 = vperm.slane %v565_v47, %v3591_v42 }
 0x131   : > { %v559_v32 = vpop.xlane.xlu0 %558  ;;  %v1410_v37 = vperm.slane %v562_v19, %v3585_v54 }
 0x132   : > { %v1409_v46 = vperm.slane %v559_v32, %v3576_v15 }
 0x134   : > { %v1411_v11 = vsel %vm1230_vm1, %v1410_v37, %v1409_v46 }
 0x135   : > { %v1413_v52 = vsel %vm1234_vm2, %v1412_v17, %v1411_v11 }
 0x137   : > { %v604_v3 = vpop.permute.xlu2 %603 }
 0x138   : > { %v700_v51 = vsel %vm472_vm0, %v604_v3, 0.0 }
 0x139   : > { %v568_v18 = vpop.xlane.xlu0 %567 }
 0x13a   : > { %v1414_v2 = vperm.slane %v568_v18, %v3594_v63 }
 0x13c   : > { %v1415_v12 = vsel %vm1238_vm3, %v1414_v2, %v1413_v52  ;;  %v341_v52 = vld [vmem:[%s5398_s1] ss:$2 sm:$0x3] }
 0x13d   : > { %v1422_v25 = vsel %vm1301_vm10, %v1415_v12, %v1421_v22 }
 0x13e   : > { %2792 = vmatmul.msk.f32.vlgmr.msra.gmra.mxu1 %vm1303_vm11, %v1422_v25  ;;  %v3891_v25 = vperm.slane %v341_v52, 0 }
 0x13f   : > { %v608_v33 = vpop.permute.xlu2 %607 }
 0x140   : > { %v706_v6 = vsel %vm472_vm0, %v608_v33, 0.0  ;;  %v3893_v33 = vperm.slane %v341_v52, 1  ;;  %v3999_v52 = vld [vmem:[%s3161_s17 + $0xa0] sm:$0xff] }
 0x147   : > { %v614_v44 = vpop.permute.xlu2 %613 }
 0x148   : > { %v602_v9 = vpop.permute.xlu1 %601  ;;  %v715_v24 = vsel %vm472_vm0, %v614_v44, 0.0 }
 0x149   : > { %v697_v0 = vsel %vm472_vm0, %v602_v9, 0.0 }
 0x14c   : > { %698 = vadd.xlane.f32.xlu0 %v697_v0  ;;  %v606_v26 = vpop.permute.xlu0 %605  ;;  %v3897_v0 = vld [vmem:[%s3161_s17] sm:$0xff] }
 0x14d   : > { %701 = vadd.xlane.f32.xlu2 %v700_v51  ;;  %v703_v1 = vsel %vm472_vm0, %v606_v26, 0.0  ;;  %v798_v26 = vmul.f32 %v3897_v0, %v3891_v25  ;;  %v3902_v51 = vld [vmem:[%s3161_s17 + $0x8] sm:$0xff] }
 0x14f   : > { %v620_v36 = vpop.permute.xlu2 %619 }
 0x150   : > { %v610_v13 = vpop.permute.xlu1 %609  ;;  %704 = vadd.xlane.f32.xlu1 %v703_v1  ;;  %v724_v23 = vsel %vm472_vm0, %v620_v36, 0.0  ;;  %v799_v1 = vmul.f32 %v3902_v51, %v3893_v33 }
 0x151   : > { %v709_v58 = vsel %vm472_vm0, %v610_v13, 0.0 }
 0x154   : > { %707 = vadd.xlane.f32.xlu0 %v706_v6  ;;  %v612_v43 = vpop.permute.xlu0 %611  ;;  %v3908_v6 = vld [vmem:[%s3161_s17 + $0x10] sm:$0xff] }
 0x155   : > { %710 = vadd.xlane.f32.xlu2 %v709_v58  ;;  %v712_v5 = vsel %vm472_vm0, %v612_v43, 0.0  ;;  %5490 = vst [vmem:[#allocation5_spill] sm:$0xff] %v3908_v6  ;;  %v800_v43 = vmul.f32 %v3908_v6, %v3891_v25  ;;  %v3913_v58 = vld [vmem:[%s3161_s17 + $0x18] sm:$0xff] }
 0x157   : > { %v626_v31 = vpop.permute.xlu2 %625 }
 0x158   : > { %v616_v7 = vpop.permute.xlu1 %615  ;;  %713 = vadd.xlane.f32.xlu1 %v712_v5  ;;  %v733_v41 = vsel %vm472_vm0, %v626_v31, 0.0  ;;  %v801_v5 = vmul.f32 %v3913_v58, %v3893_v33 }
 0x159   : > { %v718_v47 = vsel %vm472_vm0, %v616_v7, 0.0 }
 0x15c   : > { %716 = vadd.xlane.f32.xlu0 %v715_v24  ;;  %v618_v10 = vpop.permute.xlu0 %617  ;;  %v862_v24 = vadd.f32 %v799_v1, %v798_v26  ;;  %v4014_v1 = vld [vmem:[%s3161_s17 + $0xb8] sm:$0xff] }
 0x15d   : > { %719 = vadd.xlane.f32.xlu2 %v718_v47  ;;  %v721_v53 = vsel %vm472_vm0, %v618_v10, 0.0  ;;  %v3919_v10 = vld [vmem:[%s3161_s17 + $0x20] sm:$0xff]  ;;  %v3924_v47 = vld [vmem:[%s3161_s17 + $0x28] sm:$0xff] }
 0x15e   : > { %v802_v31 = vmul.f32 %v3919_v10, %v3891_v25 }
 0x15f   : > { %v632_v61 = vpop.permute.xlu2 %631 }
 0x160   : > { %v622_v21 = vpop.permute.xlu1 %621  ;;  %722 = vadd.xlane.f32.xlu1 %v721_v53  ;;  %v742_v57 = vsel %vm472_vm0, %v632_v61, 0.0  ;;  %v803_v53 = vmul.f32 %v3924_v47, %v3893_v33 }
 0x161   : > { %v727_v19 = vsel %vm472_vm0, %v622_v21, 0.0  ;;  %v865_v21 = vadd.f32 %v801_v5, %v800_v43  ;;  %v4019_v43 = vld [vmem:[%s3161_s17 + $0xc0] sm:$0xff] }
 0x162   : > { %v868_v61 = vadd.f32 %v803_v53, %v802_v31  ;;  %v822_v5 = vmul.f32 %v4019_v43, %v3891_v25  ;;  %v4029_v53 = vld [vmem:[%s3161_s17 + $0xd0] sm:$0xff] }
 0x163   : > { %5492 = vst [vmem:[#allocation7_spill] sm:$0xff] %v4029_v53 }
 0x164   : > { %725 = vadd.xlane.f32.xlu0 %v724_v23  ;;  %v624_v34 = vpop.permute.xlu0 %623  ;;  %v3929_v23 = vld [vmem:[%s3161_s17 + $0x30] sm:$0xff] }
 0x165   : > { %728 = vadd.xlane.f32.xlu2 %v727_v19  ;;  %v730_v32 = vsel %vm472_vm0, %v624_v34, 0.0  ;;  %v804_v34 = vmul.f32 %v3929_v23, %v3891_v25  ;;  %v3934_v19 = vld [vmem:[%s3161_s17 + $0x38] sm:$0xff] }
 0x167   : > { %v638_v30 = vpop.permute.xlu2 %637 }
 0x168   : > { %v628_v28 = vpop.permute.xlu1 %627  ;;  %731 = vadd.xlane.f32.xlu1 %v730_v32  ;;  %v751_v29 = vsel %vm472_vm0, %v638_v30, 0.0  ;;  %v805_v32 = vmul.f32 %v3934_v19, %v3893_v33  ;;  %v3949_v30 = vld [vmem:[%s3161_s17 + $0x50] sm:$0xff] }
 0x169   : > { %v736_v50 = vsel %vm472_vm0, %v628_v28, 0.0  ;;  %v3939_v28 = vld [vmem:[%s3161_s17 + $0x40] sm:$0xff] }
 0x16c   : > { %734 = vadd.xlane.f32.xlu0 %v733_v41  ;;  %v630_v39 = vpop.permute.xlu0 %629  ;;  %v806_v41 = vmul.f32 %v3939_v28, %v3891_v25 }
 0x16d   : > { %737 = vadd.xlane.f32.xlu2 %v736_v50  ;;  %v739_v48 = vsel %vm472_vm0, %v630_v39, 0.0  ;;  %v3944_v39 = vld [vmem:[%s3161_s17 + $0x48] sm:$0xff] }
 0x16e   : > { %v807_v50 = vmul.f32 %v3944_v39, %v3893_v33 }
 0x16f   : > { %v644_v55 = vpop.permute.xlu2 %643 }
 0x170   : > { %v634_v59 = vpop.permute.xlu1 %633  ;;  %740 = vadd.xlane.f32.xlu1 %v739_v48  ;;  %v760_v45 = vsel %vm472_vm0, %v644_v55, 0.0  ;;  %v871_v48 = vadd.f32 %v805_v32, %v804_v34  ;;  %v3964_v55 = vld [vmem:[%s3161_s17 + $0x68] sm:$0xff]  ;;  %v4034_v34 = vld [vmem:[%s3161_s17 + $0xd8] sm:$0xff] }
 0x171   : > { %v745_v37 = vsel %vm472_vm0, %v634_v59, 0.0  ;;  %v808_v59 = vmul.f32 %v3949_v30, %v3891_v25  ;;  %5493 = vst [vmem:[#allocation6_spill] sm:$0xff] %v4034_v34  ;;  %v825_v32 = vmul.f32 %v4034_v34, %v3893_v33 }
 0x174   : > { %743 = vadd.xlane.f32.xlu0 %v742_v57  ;;  %v636_v49 = vpop.permute.xlu0 %635  ;;  %v3954_v57 = vld [vmem:[%s3161_s17 + $0x58] sm:$0xff] }
 0x175   : > { %746 = vadd.xlane.f32.xlu2 %v745_v37  ;;  %v748_v46 = vsel %vm472_vm0, %v636_v49, 0.0  ;;  %v809_v49 = vmul.f32 %v3954_v57, %v3893_v33  ;;  %v874_v37 = vadd.f32 %v807_v50, %v806_v41  ;;  %v4039_v41 = vld [vmem:[%s3161_s17 + $0xe0] sm:$0xff] }
 0x176   : > { %5494 = vst [vmem:[#allocation11_spill] sm:$0xff] %v4039_v41  ;;  %v826_v50 = vmul.f32 %v4039_v41, %v3891_v25 }
 0x177   : > { %v650_v27 = vpop.permute.xlu2 %649 }
 0x178   : > { %v640_v62 = vpop.permute.xlu1 %639  ;;  %749 = vadd.xlane.f32.xlu1 %v748_v46  ;;  %v769_v3 = vsel %vm472_vm0, %v650_v27, 0.0  ;;  %v3959_v46 = vld [vmem:[%s3161_s17 + $0x60] sm:$0xff] }
 0x179   : > { %v754_v56 = vsel %vm472_vm0, %v640_v62, 0.0  ;;  %v810_v62 = vmul.f32 %v3959_v46, %v3891_v25 }
 0x17c   : > { %752 = vadd.xlane.f32.xlu0 %v751_v29  ;;  %v642_v16 = vpop.permute.xlu0 %641  ;;  %v811_v29 = vmul.f32 %v3964_v55, %v3893_v33 }
 0x17d   : > { %755 = vadd.xlane.f32.xlu2 %v754_v56  ;;  %v757_v8 = vsel %vm472_vm0, %v642_v16, 0.0  ;;  %v877_v16 = vadd.f32 %v809_v49, %v808_v59  ;;  %v3969_v56 = vld [vmem:[%s3161_s17 + $0x70] sm:$0xff] }
 0x17e   : > { %v880_v27 = vadd.f32 %v811_v29, %v810_v62  ;;  %v4053_v29 = vld [vmem:[%s3161_s17 + $0xf0] sm:$0xff] }
 0x17f   : > { %v656_v35 = vpop.permute.xlu2 %655  ;;  %5496 = vst [vmem:[#allocation9_spill] sm:$0xff] %v4053_v29 }
 0x180   : > { %v646_v38 = vpop.permute.xlu1 %645  ;;  %758 = vadd.xlane.f32.xlu1 %v757_v8  ;;  %v778_v20 = vsel %vm472_vm0, %v656_v35, 0.0  ;;  %v812_v8 = vmul.f32 %v3969_v56, %v3891_v25  ;;  %v3994_v35 = vld [vmem:[%s3161_s17 + $0x98] sm:$0xff] }
 0x181   : > { %v763_v4 = vsel %vm472_vm0, %v646_v38, 0.0  ;;  %v3974_v38 = vld [vmem:[%s3161_s17 + $0x78] sm:$0xff] }
 0x184   : > { %761 = vadd.xlane.f32.xlu0 %v760_v45  ;;  %v648_v17 = vpop.permute.xlu0 %647  ;;  %v813_v45 = vmul.f32 %v3974_v38, %v3893_v33 }
 0x185   : > { %764 = vadd.xlane.f32.xlu2 %v763_v4  ;;  %v766_v11 = vsel %vm472_vm0, %v648_v17, 0.0  ;;  %v3979_v17 = vld [vmem:[%s3161_s17 + $0x80] sm:$0xff] }
 0x186   : > { %v814_v4 = vmul.f32 %v3979_v17, %v3891_v25 }
 0x187   : > { %v662_v9 = vpop.permute.xlu2 %661 }
 0x188   : > { %v652_v40 = vpop.permute.xlu1 %651  ;;  %767 = vadd.xlane.f32.xlu1 %v766_v11  ;;  %v787_v36 = vsel %vm472_vm0, %v662_v9, 0.0  ;;  %v3984_v11 = vld [vmem:[%s3161_s17 + $0x88] sm:$0xff]  ;;  %v4009_v9 = vld [vmem:[%s3161_s17 + $0xb0] sm:$0xff] }
 0x189   : > { %v772_v60 = vsel %vm472_vm0, %v652_v40, 0.0  ;;  %v815_v40 = vmul.f32 %v3984_v11, %v3893_v33  ;;  %v820_v26 = vmul.f32 %v4009_v9, %v3891_v25 }
 0x18c   : > { %770 = vadd.xlane.f32.xlu0 %v769_v3  ;;  %v654_v18 = vpop.permute.xlu0 %653  ;;  %v883_v3 = vadd.f32 %v813_v45, %v812_v8  ;;  %v4058_v8 = vld [vmem:[%s3161_s17 + $0xf8] sm:$0xff] }
 0x18d   : > { %773 = vadd.xlane.f32.xlu2 %v772_v60  ;;  %v775_v2 = vsel %vm472_vm0, %v654_v18, 0.0  ;;  %v3989_v18 = vld [vmem:[%s3161_s17 + $0x90] sm:$0xff]  ;;  %5497 = vst [vmem:[#allocation13_spill] sm:$0xff] %v4058_v8  ;;  %v829_v45 = vmul.f32 %v4058_v8, %v3893_v33 }
 0x18e   : > { %v816_v60 = vmul.f32 %v3989_v18, %v3891_v25 }
 0x190   : > { %v658_v14 = vpop.permute.xlu1 %657  ;;  %776 = vadd.xlane.f32.xlu1 %v775_v2  ;;  %v817_v2 = vmul.f32 %v3994_v35, %v3893_v33 }
 0x191   : > { %v781_v22 = vsel %vm472_vm0, %v658_v14, 0.0  ;;  %v886_v14 = vadd.f32 %v815_v40, %v814_v4  ;;  %v4065_v40 = vld [vmem:[%s3161_s17 + $0x100] sm:$0xff] }
 0x192   : > { %5498 = vst [vmem:[#allocation12_spill] sm:$0xff] %v4065_v40 }
 0x194   : > { %779 = vadd.xlane.f32.xlu0 %v778_v20  ;;  %v660_v12 = vpop.permute.xlu0 %659  ;;  %v818_v20 = vmul.f32 %v3999_v52, %v3891_v25 }
 0x195   : > { %782 = vadd.xlane.f32.xlu2 %v781_v22  ;;  %v784_v44 = vsel %vm472_vm0, %v660_v12, 0.0  ;;  %v4004_v12 = vld [vmem:[%s3161_s17 + $0xa8] sm:$0xff] }
 0x196   : > { %v819_v22 = vmul.f32 %v4004_v12, %v3893_v33 }
 0x198   : > { %785 = vadd.xlane.f32.xlu1 %v784_v44  ;;  %v664_v13 = vpop.permute.xlu1 %663  ;;  %v889_v44 = vadd.f32 %v817_v2, %v816_v60  ;;  %v4070_v60 = vld [vmem:[%s3161_s17 + $0x108] sm:$0xff] }
 0x199   : > { %v790_v7 = vsel %vm472_vm0, %v664_v13, 0.0  ;;  %v821_v13 = vmul.f32 %v4014_v1, %v3893_v33  ;;  %5499 = vst [vmem:[#allocation14_spill] sm:$0xff] %v4070_v60  ;;  %v831_v2 = vmul.f32 %v4070_v60, %v3893_v33 }
 0x19b   : > { %v895_v31 = vadd.f32 %v821_v13, %v820_v26 }
 0x19c   : > { %788 = vadd.xlane.f32.xlu0 %v787_v36  ;;  %v892_v36 = vadd.f32 %v819_v22, %v818_v20  ;;  %v4075_v20 = vld [vmem:[%s3161_s17 + $0x110] sm:$0xff] }
 0x19d   : > { %791 = vadd.xlane.f32.xlu2 %v790_v7  ;;  %v4024_v7 = vld [vmem:[%s3161_s17 + $0xc8] sm:$0xff]  ;;  %5500 = vst [vmem:[#allocation15_spill] sm:$0xff] %v4075_v20  ;;  %v832_v22 = vmul.f32 %v4075_v20, %v3891_v25 }
 0x19e   : > { %5491 = vst [vmem:[#allocation8_spill] sm:$0xff] %v4024_v7 }
 0x1a0   : > { %863 = vadd.xlane.f32.xlu1 %v862_v24  ;;  %v823_v24 = vmul.f32 %v4024_v7, %v3893_v33 }
 0x1a4   : > { %866 = vadd.xlane.f32.xlu0 %v865_v21  ;;  %v824_v21 = vmul.f32 %v4029_v53, %v3891_v25  ;;  %v4257_v53 = vld [vmem:[%s3161_s17 + $0x1f8] sm:$0xff] }
 0x1a5   : > { %869 = vadd.xlane.f32.xlu2 %v868_v61  ;;  %v898_v61 = vadd.f32 %v823_v24, %v822_v5  ;;  %v4089_v24 = vld [vmem:[%s3161_s17 + $0x120] sm:$0xff] }
 0x1a6   : > { %5502 = vst [vmem:[#allocation17_spill] sm:$0xff] %v4089_v24 }
 0x1a8   : > { %872 = vadd.xlane.f32.xlu1 %v871_v48  ;;  %v4044_v48 = vld [vmem:[%s3161_s17 + $0xe8] sm:$0xff] }
 0x1a9   : > { %5495 = vst [vmem:[#allocation10_spill] sm:$0xff] %v4044_v48  ;;  %v827_v59 = vmul.f32 %v4044_v48, %v3893_v33 }
 0x1ac   : > { %875 = vadd.xlane.f32.xlu0 %v874_v37  ;;  %v901_v37 = vadd.f32 %v825_v32, %v824_v21  ;;  %v4094_v21 = vld [vmem:[%s3161_s17 + $0x128] sm:$0xff] }
 0x1ad   : > { %878 = vadd.xlane.f32.xlu2 %v877_v16  ;;  %v828_v16 = vmul.f32 %v4053_v29, %v3891_v25  ;;  %5503 = vst [vmem:[#allocation18_spill] sm:$0xff] %v4094_v21  ;;  %v835_v32 = vmul.f32 %v4094_v21, %v3893_v33  ;;  %v4219_v29 = vld [vmem:[%s3161_s17 + $0x1d0] sm:$0xff] }
 0x1ae   : > { %5524 = vst [vmem:[#allocation39_spill] sm:$0xff] %v4219_v29 }
 0x1b0   : > { %881 = vadd.xlane.f32.xlu1 %v880_v27  ;;  %v904_v27 = vadd.f32 %v827_v59, %v826_v50  ;;  %v4101_v59 = vld [vmem:[%s3161_s17 + $0x130] sm:$0xff] }
 0x1b1   : > { %5504 = vst [vmem:[#allocation19_spill] sm:$0xff] %v4101_v59 }
 0x1b4   : > { %884 = vadd.xlane.f32.xlu0 %v883_v3  ;;  %v830_v3 = vmul.f32 %v4065_v40, %v3891_v25 }
 0x1b5   : > { %887 = vadd.xlane.f32.xlu2 %v886_v14  ;;  %v907_v14 = vadd.f32 %v829_v45, %v828_v16  ;;  %v4106_v16 = vld [vmem:[%s3161_s17 + $0x138] sm:$0xff] }
 0x1b6   : > { %5505 = vst [vmem:[#allocation20_spill] sm:$0xff] %v4106_v16  ;;  %v837_v45 = vmul.f32 %v4106_v16, %v3893_v33 }
 0x1b8   : > { %890 = vadd.xlane.f32.xlu1 %v889_v44  ;;  %v4080_v44 = vld [vmem:[%s3161_s17 + $0x118] sm:$0xff] }
 0x1b9   : > { %5501 = vst [vmem:[#allocation16_spill] sm:$0xff] %v4080_v44  ;;  %v833_v26 = vmul.f32 %v4080_v44, %v3893_v33 }
 0x1bc   : > { %893 = vadd.xlane.f32.xlu0 %v892_v36  ;;  %v910_v36 = vadd.f32 %v831_v2, %v830_v3  ;;  %v4111_v3 = vld [vmem:[%s3161_s17 + $0x140] sm:$0xff] }
 0x1bd   : > { %896 = vadd.xlane.f32.xlu2 %v895_v31  ;;  %v834_v31 = vmul.f32 %v4089_v24, %v3891_v25  ;;  %5506 = vst [vmem:[#allocation21_spill] sm:$0xff] %v4111_v3  ;;  %v838_v2 = vmul.f32 %v4111_v3, %v3891_v25 }
 0x1bf   : > { %v4048_v49 = vpop.xlane.xlu0 %698 }
 0x1c0   : > { %899 = vadd.xlane.f32.xlu1 %v898_v61  ;;  %v4050_v62 = vpop.xlane.xlu2 %701  ;;  %v913_v61 = vadd.f32 %v833_v26, %v832_v22 }
 0x1c3   : > { %v4062_v4 = vpop.xlane.xlu1 %704 }
 0x1c4   : > { %902 = vadd.xlane.f32.xlu0 %v901_v37  ;;  %v836_v37 = vmul.f32 %v4101_v59, %v3891_v25 }
 0x1c5   : > { %905 = vadd.xlane.f32.xlu2 %v904_v27  ;;  %v916_v27 = vadd.f32 %v835_v32, %v834_v31  ;;  %v4125_v31 = vld [vmem:[%s3161_s17 + $0x150] sm:$0xff] }
 0x1c6   : > { %5508 = vst [vmem:[#allocation23_spill] sm:$0xff] %v4125_v31  ;;  %v840_v32 = vmul.f32 %v4125_v31, %v3891_v25 }
 0x1c7   : > { %v4084_v13 = vpop.xlane.xlu0 %707 }
 0x1c8   : > { %908 = vadd.xlane.f32.xlu1 %v907_v14  ;;  %v4086_v5 = vpop.xlane.xlu2 %710  ;;  %v4116_v14 = vld [vmem:[%s3161_s17 + $0x148] sm:$0xff] }
 0x1c9   : > { %5507 = vst [vmem:[#allocation22_spill] sm:$0xff] %v4116_v14  ;;  %v839_v22 = vmul.f32 %v4116_v14, %v3893_v33 }
 0x1cb   : > { %v4098_v50 = vpop.xlane.xlu1 %713  ;;  %v922_v59 = vadd.f32 %v839_v22, %v838_v2  ;;  %v4152_v22 = vld [vmem:[%s3161_s17 + $0x178] sm:$0xff] }
 0x1cc   : > { %911 = vadd.xlane.f32.xlu0 %v910_v36  ;;  %v919_v36 = vadd.f32 %v837_v45, %v836_v37  ;;  %v4137_v37 = vld [vmem:[%s3161_s17 + $0x160] sm:$0xff]  ;;  %5513 = vst [vmem:[#allocation28_spill] sm:$0xff] %v4152_v22 }
 0x1cd   : > { %914 = vadd.xlane.f32.xlu2 %v913_v61  ;;  %v4130_v61 = vld [vmem:[%s3161_s17 + $0x158] sm:$0xff]  ;;  %5510 = vst [vmem:[#allocation25_spill] sm:$0xff] %v4137_v37  ;;  %v842_v45 = vmul.f32 %v4137_v37, %v3891_v25 }
 0x1ce   : > { %5509 = vst [vmem:[#allocation24_spill] sm:$0xff] %v4130_v61  ;;  %v841_v3 = vmul.f32 %v4130_v61, %v3893_v33  ;;  %v4147_v61 = vld [vmem:[%s3161_s17 + $0x170] sm:$0xff] }
 0x1cf   : > { %v4120_v26 = vpop.xlane.xlu0 %716  ;;  %5512 = vst [vmem:[#allocation27_spill] sm:$0xff] %v4147_v61  ;;  %v844_v2 = vmul.f32 %v4147_v61, %v3891_v25 }
 0x1d0   : > { %917 = vadd.xlane.f32.xlu1 %v916_v27  ;;  %v4122_v16 = vpop.xlane.xlu2 %719  ;;  %v4142_v27 = vld [vmem:[%s3161_s17 + $0x168] sm:$0xff]  ;;  %v925_v21 = vadd.f32 %v841_v3, %v840_v32 }
 0x1d1   : > { %5511 = vst [vmem:[#allocation26_spill] sm:$0xff] %v4142_v27  ;;  %v843_v31 = vmul.f32 %v4142_v27, %v3893_v33  ;;  %v4166_v32 = vld [vmem:[%s3161_s17 + $0x188] sm:$0xff] }
 0x1d2   : > { %5515 = vst [vmem:[#allocation30_spill] sm:$0xff] %v4166_v32  ;;  %v847_v61 = vmul.f32 %v4166_v32, %v3893_v33  ;;  %v4183_v32 = vld [vmem:[%s3161_s17 + $0x1a0] sm:$0xff] }
 0x1d3   : > { %v4134_v14 = vpop.xlane.xlu1 %722  ;;  %v928_v24 = vadd.f32 %v843_v31, %v842_v45  ;;  %v4173_v31 = vld [vmem:[%s3161_s17 + $0x190] sm:$0xff]  ;;  %v4178_v45 = vld [vmem:[%s3161_s17 + $0x198] sm:$0xff]  ;;  %5518 = vst [vmem:[#allocation33_spill] sm:$0xff] %v4183_v32 }
 0x1d4   : > { %920 = vadd.xlane.f32.xlu0 %v919_v36  ;;  %v845_v36 = vmul.f32 %v4152_v22, %v3893_v33  ;;  %5516 = vst [vmem:[#allocation31_spill] sm:$0xff] %v4173_v31 }
 0x1d5   : > { %923 = vadd.xlane.f32.xlu2 %v922_v59  ;;  %v4161_v59 = vld [vmem:[%s3161_s17 + $0x180] sm:$0xff]  ;;  %5517 = vst [vmem:[#allocation32_spill] sm:$0xff] %v4178_v45 }
 0x1d6   : > { %5514 = vst [vmem:[#allocation29_spill] sm:$0xff] %v4161_v59  ;;  %v846_v3 = vmul.f32 %v4161_v59, %v3891_v25  ;;  %v931_v44 = vadd.f32 %v845_v36, %v844_v2  ;;  %v849_v59 = vmul.f32 %v4178_v45, %v3893_v33  ;;  %v4188_v2 = vld [vmem:[%s3161_s17 + $0x1a8] sm:$0xff] }
 0x1d7   : > { %v4156_v37 = vpop.xlane.xlu0 %725  ;;  %5519 = vst [vmem:[#allocation34_spill] sm:$0xff] %v4188_v2  ;;  %v851_v36 = vmul.f32 %v4188_v2, %v3893_v33 }
 0x1d8   : > { %926 = vadd.xlane.f32.xlu1 %v925_v21  ;;  %v4158_v27 = vpop.xlane.xlu2 %728  ;;  %v848_v21 = vmul.f32 %v4173_v31, %v3891_v25  ;;  %v934_v20 = vadd.f32 %v847_v61, %v846_v3  ;;  %v4202_v3 = vld [vmem:[%s3161_s17 + $0x1b8] sm:$0xff] }
 0x1d9   : > { %5521 = vst [vmem:[#allocation36_spill] sm:$0xff] %v4202_v3 }
 0x1da   : > { %v937_v60 = vadd.f32 %v849_v59, %v848_v21  ;;  %v4209_v59 = vld [vmem:[%s3161_s17 + $0x1c0] sm:$0xff]  ;;  %v4214_v21 = vld [vmem:[%s3161_s17 + $0x1c8] sm:$0xff] }
 0x1db   : > { %v4170_v22 = vpop.xlane.xlu1 %731  ;;  %5522 = vst [vmem:[#allocation37_spill] sm:$0xff] %v4209_v59 }
 0x1dc   : > { %929 = vadd.xlane.f32.xlu0 %v928_v24  ;;  %v850_v24 = vmul.f32 %v4183_v32, %v3891_v25  ;;  %v853_v32 = vmul.f32 %v4202_v3, %v3893_v33  ;;  %5523 = vst [vmem:[#allocation38_spill] sm:$0xff] %v4214_v21 }
 0x1dd   : > { %932 = vadd.xlane.f32.xlu2 %v931_v44  ;;  %v4197_v44 = vld [vmem:[%s3161_s17 + $0x1b0] sm:$0xff] }
 0x1de   : > { %5520 = vst [vmem:[#allocation35_spill] sm:$0xff] %v4197_v44  ;;  %v852_v61 = vmul.f32 %v4197_v44, %v3891_v25  ;;  %v940_v40 = vadd.f32 %v851_v36, %v850_v24  ;;  %v855_v44 = vmul.f32 %v4214_v21, %v3893_v33  ;;  %v4224_v24 = vld [vmem:[%s3161_s17 + $0x1d8] sm:$0xff]  ;;  %v4241_v21 = vld [vmem:[%s3161_s17 + $0x1e8] sm:$0xff] }
 0x1df   : > { %v4192_v31 = vpop.xlane.xlu0 %734  ;;  %5525 = vst [vmem:[#allocation40_spill] sm:$0xff] %v4224_v24  ;;  %v857_v36 = vmul.f32 %v4224_v24, %v3893_v33  ;;  %v859_v24 = vmul.f32 %v4241_v21, %v3893_v33 }
 0x1e0   : > { %935 = vadd.xlane.f32.xlu1 %v934_v20  ;;  %v4194_v45 = vpop.xlane.xlu2 %737  ;;  %v854_v20 = vmul.f32 %v4209_v59, %v3891_v25  ;;  %v943_v8 = vadd.f32 %v853_v32, %v852_v61  ;;  %v2790_v59 = vld [vmem:[%s5398_s1 + $0x1] ss:$2 sm:$0x3]  ;;  %5527 = vst [vmem:[#allocation42_spill] sm:$0xff] %v4241_v21 }
 0x1e1   : > { %v4236_v61 = vld [vmem:[%s3161_s17 + $0x1e0] sm:$0xff]  ;;  %v4245_v48 = vperm.slane %v2790_v59, 0  ;;  %v4247_v34 = vperm.slane %v2790_v59, 1 }
 0x1e2   : > { %v946_v32 = vadd.f32 %v855_v44, %v854_v20  ;;  %5526 = vst [vmem:[#allocation41_spill] sm:$0xff] %v4236_v61 }
 0x1e3   : > { %v4206_v2 = vpop.xlane.xlu1 %740  ;;  %v963_v21 = vmul.f32 %v3897_v0, %v4245_v48  ;;  %v964_v59 = vmul.f32 %v3902_v51, %v4247_v34  ;;  %v968_v51 = vmul.f32 %v3924_v47, %v4247_v34  ;;  %v972_v47 = vmul.f32 %v3944_v39, %v4247_v34 }
 0x1e4   : > { %938 = vadd.xlane.f32.xlu0 %v937_v60  ;;  %v856_v60 = vmul.f32 %v4219_v29, %v3891_v25  ;;  %v858_v29 = vmul.f32 %v4236_v61, %v3891_v25  ;;  %v861_v61 = vmul.f32 %v4257_v53, %v3893_v33  ;;  %v966_v33 = vmul.f32 %v3913_v58, %v4247_v34 }
 0x1e5   : > { %941 = vadd.xlane.f32.xlu2 %v940_v40 }
 0x1e6   : > { %v949_v41 = vadd.f32 %v857_v36, %v856_v60  ;;  %v952_v7 = vadd.f32 %v859_v24, %v858_v29  ;;  %v1027_v29 = vadd.f32 %v964_v59, %v963_v21  ;;  %v967_v24 = vmul.f32 %v3919_v10, %v4245_v48 }
 0x1e7   : > { %v4231_v3 = vpop.xlane.xlu0 %743  ;;  %v971_v21 = vmul.f32 %v3939_v28, %v4245_v48 }
 0x1e8   : > { %944 = vadd.xlane.f32.xlu1 %v943_v8  ;;  %v4233_v40 = vpop.xlane.xlu2 %746  ;;  %v4252_v8 = vld [vmem:[%s3161_s17 + $0x1f0] sm:$0xff]  ;;  %v1033_v58 = vadd.f32 %v968_v51, %v967_v24  ;;  %v1480_v24 = vperm.slane %v4048_v49, %v3576_v15  ;;  %v1488_v51 = vperm.slane %v4098_v50, %v3585_v54  ;;  %v1487_v49 = vperm.slane %v4086_v5, %v3576_v15 }
 0x1e9   : > { %v860_v20 = vmul.f32 %v4252_v8, %v3891_v25  ;;  %v965_v25 = vmul.f32 %v3908_v6, %v4245_v48  ;;  %v1039_v39 = vadd.f32 %v972_v47, %v971_v21  ;;  %v1492_v50 = vperm.slane %v4122_v16, %v3594_v63 }
 0x1ea   : > { %v1494_v21 = vperm.slane %v4134_v14, %v3576_v15  ;;  %v1485_v5 = vperm.slane %v4084_v13, %v3594_v63 }
 0x1eb   : > { %v4249_v44 = vpop.xlane.xlu1 %749  ;;  %v955_v36 = vadd.f32 %v861_v61, %v860_v20  ;;  %v1030_v61 = vadd.f32 %v966_v33, %v965_v25  ;;  %v970_v20 = vmul.f32 %v3934_v19, %v4247_v34  ;;  %v1481_v25 = vperm.slane %v4050_v62, %v3585_v54 }
 0x1ec   : > { %947 = vadd.xlane.f32.xlu0 %v946_v32  ;;  %v973_v19 = vmul.f32 %v3949_v30, %v4245_v48  ;;  %v1495_v62 = vperm.slane %v4156_v37, %v3585_v54  ;;  %v1483_v37 = vperm.slane %v4062_v4, %v3591_v42  ;;  %v978_v4 = vmul.f32 %v3974_v38, %v4247_v34 }
 0x1ed   : > { %950 = vadd.xlane.f32.xlu2 %v949_v41 }
 0x1ee   : > { %v1496_v14 = vsel %vm1230_vm1, %v1495_v62, %v1494_v21  ;;  %v980_v62 = vmul.f32 %v3984_v11, %v4247_v34 }
 0x1ef   : > { %v4265_v60 = vpop.xlane.xlu0 %752 }
 0x1f0   : > { %953 = vadd.xlane.f32.xlu1 %v952_v7  ;;  %v4267_v32 = vpop.xlane.xlu2 %755  ;;  %v969_v7 = vmul.f32 %v3929_v23, %v4245_v48 }
 0x1f3   : > { %v4275_v41 = vpop.xlane.xlu1 %758 }
 0x1f4   : > { %956 = vadd.xlane.f32.xlu0 %v955_v36  ;;  %v1036_v36 = vadd.f32 %v970_v20, %v969_v7  ;;  %v975_v7 = vmul.f32 %v3959_v46, %v4245_v48  ;;  %v1482_v20 = vsel %vm1230_vm1, %v1481_v25, %v1480_v24  ;;  %v1499_v24 = vperm.slane %v4170_v22, %v3594_v63 }
 0x1f5   : > { %1028 = vadd.xlane.f32.xlu2 %v1027_v29  ;;  %v974_v29 = vmul.f32 %v3954_v57, %v4247_v34  ;;  %v976_v57 = vmul.f32 %v3964_v55, %v4247_v34  ;;  %v1502_v55 = vperm.slane %v4194_v45, %v3585_v54  ;;  %v1501_v45 = vperm.slane %v4192_v31, %v3576_v15 }
 0x1f6   : > { %v979_v31 = vmul.f32 %v3979_v17, %v4245_v48 }
 0x1f7   : > { %v4283_v6 = vpop.xlane.xlu0 %761  ;;  %v1042_v47 = vadd.f32 %v974_v29, %v973_v19  ;;  %v1045_v19 = vadd.f32 %v976_v57, %v975_v7  ;;  %v1503_v38 = vsel %vm1230_vm1, %v1502_v55, %v1501_v45  ;;  %v1484_v7 = vsel %vm1234_vm2, %v1483_v37, %v1482_v20 }
 0x1f8   : > { %1031 = vadd.xlane.f32.xlu1 %v1030_v61  ;;  %v4287_v59 = vpop.xlane.xlu2 %764  ;;  %v1490_v61 = vperm.slane %v4120_v26, %v3591_v42  ;;  %v1497_v26 = vperm.slane %v4158_v27, %v3591_v42  ;;  %v977_v27 = vmul.f32 %v3969_v56, %v4245_v48  ;;  %v1486_v22 = vsel %vm1238_vm3, %v1485_v5, %v1484_v7 }
 0x1f9   : > { %v1509_v20 = vperm.slane %v4249_v44, %v3585_v54  ;;  %v1516_v37 = vperm.slane %v4283_v6, %v3585_v54  ;;  %v1051_v55 = vadd.f32 %v980_v62, %v979_v31  ;;  %v1508_v44 = vperm.slane %v4233_v40, %v3576_v15 }
 0x1fa   : > { %v1498_v29 = vsel %vm1234_vm2, %v1497_v26, %v1496_v14  ;;  %v1048_v57 = vadd.f32 %v978_v4, %v977_v27  ;;  %v984_v27 = vmul.f32 %v4004_v12, %v4247_v34  ;;  %v1511_v6 = vperm.slane %v4265_v60, %v3591_v42 }
 0x1fb   : > { %v4293_v33 = vpop.xlane.xlu1 %767  ;;  %v1515_v4 = vperm.slane %v4275_v41, %v3576_v15  ;;  %v985_v14 = vmul.f32 %v4009_v9, %v4245_v48  ;;  %v986_v12 = vmul.f32 %v4014_v1, %v4247_v34  ;;  %v1510_v40 = vsel %vm1230_vm1, %v1509_v20, %v1508_v44  ;;  %v5530_v20 = vld [vmem:[#allocation6_spill] sm:$0xff] }
 0x1fc   : > { %1034 = vadd.xlane.f32.xlu0 %v1033_v58  ;;  %v1520_v60 = vperm.slane %v4293_v33, %v3594_v63  ;;  %v1512_v1 = vsel %vm1234_vm2, %v1511_v6, %v1510_v40  ;;  %v5528_v33 = vld [vmem:[#allocation8_spill] sm:$0xff]  ;;  %v5533_v40 = vld [vmem:[#allocation9_spill] sm:$0xff] }
 0x1fd   : > { %1037 = vadd.xlane.f32.xlu2 %v1036_v36  ;;  %v1489_v36 = vsel %vm1230_vm1, %v1488_v51, %v1487_v49  ;;  %v1504_v51 = vperm.slane %v4206_v2, %v3591_v42  ;;  %v981_v2 = vmul.f32 %v3989_v18, %v4245_v48  ;;  %v1517_v45 = vsel %vm1230_vm1, %v1516_v37, %v1515_v4  ;;  %v5531_v4 = vld [vmem:[#allocation11_spill] sm:$0xff] }
 0x1fe   : > { %v1491_v25 = vsel %vm1234_vm2, %v1490_v61, %v1489_v36  ;;  %v983_v36 = vmul.f32 %v3999_v52, %v4245_v48  ;;  %v1060_v62 = vadd.f32 %v986_v12, %v985_v14  ;;  %v990_v37 = vmul.f32 %v5530_v20, %v4247_v34 }
 0x1ff   : > { %v771_v58 = vpop.xlane.xlu0 %770  ;;  %v1493_v13 = vsel %vm1238_vm3, %v1492_v50, %v1491_v25  ;;  %v1500_v50 = vsel %vm1238_vm3, %v1499_v24, %v1498_v29  ;;  %v1505_v26 = vsel %vm1234_vm2, %v1504_v51, %v1503_v38  ;;  %v987_v51 = vmul.f32 %v4019_v43, %v4245_v48 }
 0x200   : > { %1040 = vadd.xlane.f32.xlu1 %v1039_v39  ;;  %v774_v16 = vpop.xlane.xlu2 %773  ;;  %v1506_v39 = vperm.slane %v4231_v3, %v3594_v63  ;;  %v982_v3 = vmul.f32 %v3994_v35, %v4247_v34  ;;  %v1536_v49 = vsel %vm1289_vm4, %v1493_v13, %v1486_v22  ;;  %v1522_v25 = vperm.slane %v771_v58, %v3576_v15 }
 0x201   : > { %v1523_v35 = vperm.slane %v774_v16, %v3585_v54  ;;  %v1513_v16 = vperm.slane %v4267_v32, %v3594_v63  ;;  %v1057_v29 = vadd.f32 %v984_v27, %v983_v36  ;;  %v988_v38 = vmul.f32 %v5528_v33, %v4247_v34 }
 0x202   : > { %v1507_v11 = vsel %vm1238_vm3, %v1506_v39, %v1505_v26  ;;  %v1537_v39 = vsel %vm1291_vm5, %v1500_v50, %v1536_v49  ;;  %v5529_v49 = vld [vmem:[#allocation7_spill] sm:$0xff] }
 0x203   : > { %v777_v61 = vpop.xlane.xlu1 %776  ;;  %v1524_v58 = vsel %vm1230_vm1, %v1523_v35, %v1522_v25  ;;  %v989_v50 = vmul.f32 %v5529_v49, %v4245_v48  ;;  %v1063_v35 = vadd.f32 %v988_v38, %v987_v51  ;;  %v5537_v38 = vld [vmem:[#allocation15_spill] sm:$0xff] }
 0x204   : > { %1043 = vadd.xlane.f32.xlu0 %v1042_v47  ;;  %v1518_v47 = vperm.slane %v4287_v59, %v3591_v42  ;;  %v1054_v59 = vadd.f32 %v982_v3, %v981_v2  ;;  %v1525_v41 = vperm.slane %v777_v61, %v3591_v42  ;;  %v1514_v61 = vsel %vm1238_vm3, %v1513_v16, %v1512_v1  ;;  %v5532_v16 = vld [vmem:[#allocation10_spill] sm:$0xff] }
 0x205   : > { %1046 = vadd.xlane.f32.xlu2 %v1045_v19  ;;  %v1538_v3 = vsel %vm1293_vm6, %v1507_v11, %v1537_v39  ;;  %v992_v25 = vmul.f32 %v5532_v16, %v4247_v34  ;;  %v1066_v12 = vadd.f32 %v990_v37, %v989_v50  ;;  %v5536_v1 = vld [vmem:[#allocation14_spill] sm:$0xff]  ;;  %v997_v39 = vmul.f32 %v5537_v38, %v4245_v48  ;;  %v5541_v50 = vld [vmem:[#allocation19_spill] sm:$0xff]  ;;  %v5542_v37 = vld [vmem:[#allocation20_spill] sm:$0xff] }
 0x206   : > { %v1519_v32 = vsel %vm1234_vm2, %v1518_v47, %v1517_v45  ;;  %v993_v45 = vmul.f32 %v5533_v40, %v4245_v48  ;;  %v1001_v20 = vmul.f32 %v5541_v50, %v4245_v48 }
 0x207   : > { %v780_v21 = vpop.xlane.xlu0 %779  ;;  %v1521_v7 = vsel %vm1238_vm3, %v1520_v60, %v1519_v32  ;;  %v5534_v60 = vld [vmem:[#allocation13_spill] sm:$0xff] }
 0x208   : > { %1049 = vadd.xlane.f32.xlu1 %v1048_v57  ;;  %v783_v5 = vpop.xlane.xlu2 %782  ;;  %v1527_v13 = vperm.slane %v780_v21, %v3594_v63  ;;  %v1526_v57 = vsel %vm1234_vm2, %v1525_v41, %v1524_v58  ;;  %v994_v41 = vmul.f32 %v5534_v60, %v4247_v34 }
 0x209   : > { %v1529_v22 = vperm.slane %v783_v5, %v3576_v15  ;;  %v1539_v5 = vsel %vm1295_vm7, %v1514_v61, %v1538_v3  ;;  %v5538_v61 = vld [vmem:[#allocation16_spill] sm:$0xff] }
 0x20a   : > { %v1528_v21 = vsel %vm1238_vm3, %v1527_v13, %v1526_v57  ;;  %v1540_v11 = vsel %vm1297_vm8, %v1521_v7, %v1539_v5  ;;  %v5535_v13 = vld [vmem:[#allocation12_spill] sm:$0xff]  ;;  %v1072_v51 = vadd.f32 %v994_v41, %v993_v45  ;;  %v5539_v7 = vld [vmem:[#allocation17_spill] sm:$0xff] }
 0x20b   : > { %v786_v19 = vpop.xlane.xlu1 %785  ;;  %v1541_v6 = vsel %vm1299_vm9, %v1528_v21, %v1540_v11  ;;  %v999_v57 = vmul.f32 %v5539_v7, %v4245_v48  ;;  %v5543_v5 = vld [vmem:[#allocation21_spill] sm:$0xff]  ;;  %v5544_v11 = vld [vmem:[#allocation22_spill] sm:$0xff] }
 0x20c   : > { %1052 = vadd.xlane.f32.xlu0 %v1051_v55  ;;  %v1530_v24 = vperm.slane %v786_v19, %v3585_v54  ;;  %v5547_v41 = vld [vmem:[#allocation25_spill] sm:$0xff] }
 0x20d   : > { %1055 = vadd.xlane.f32.xlu2 %v1054_v59  ;;  %v991_v59 = vmul.f32 %v5531_v4, %v4245_v48 }
 0x20e   : > { %v1531_v55 = vsel %vm1230_vm1, %v1530_v24, %v1529_v22  ;;  %v996_v24 = vmul.f32 %v5536_v1, %v4247_v34  ;;  %v5540_v22 = vld [vmem:[#allocation18_spill] sm:$0xff] }
 0x20f   : > { %v789_v31 = vpop.xlane.xlu0 %788  ;;  %v1069_v32 = vadd.f32 %v992_v25, %v991_v59  ;;  %v5545_v59 = vld [vmem:[#allocation23_spill] sm:$0xff]  ;;  %v5546_v25 = vld [vmem:[#allocation24_spill] sm:$0xff] }
 0x210   : > { %v1532_v2 = vperm.slane %v789_v31, %v3591_v42  ;;  %1058 = vadd.xlane.f32.xlu1 %v1057_v29  ;;  %v792_v26 = vpop.xlane.xlu2 %791  ;;  %v995_v29 = vmul.f32 %v5535_v13, %v4245_v48  ;;  %v998_v31 = vmul.f32 %v5538_v61, %v4247_v34  ;;  %v1005_v16 = vmul.f32 %v5545_v59, %v4245_v48 }
 0x211   : > { %v1534_v47 = vperm.slane %v792_v26, %v3594_v63 }
 0x212   : > { %v1533_v36 = vsel %vm1234_vm2, %v1532_v2, %v1531_v55  ;;  %v1000_v2 = vmul.f32 %v5540_v22, %v4247_v34  ;;  %v1078_v26 = vadd.f32 %v998_v31, %v997_v39  ;;  %v1002_v55 = vmul.f32 %v5542_v37, %v4247_v34  ;;  %v5549_v39 = vld [vmem:[#allocation27_spill] sm:$0xff]  ;;  %v5550_v31 = vld [vmem:[#allocation28_spill] sm:$0xff]  ;;  %v5551_v22 = vld [vmem:[#allocation29_spill] sm:$0xff] }
 0x213   : > { %v4413_v27 = vpop.xlane.xlu1 %863  ;;  %v1535_v44 = vsel %vm1238_vm3, %v1534_v47, %v1533_v36  ;;  %v1003_v36 = vmul.f32 %v5543_v5, %v4245_v48  ;;  %v1009_v61 = vmul.f32 %v5549_v39, %v4245_v48 }
 0x214   : > { %1061 = vadd.xlane.f32.xlu0 %v1060_v62  ;;  %v1542_v14 = vsel %vm1301_vm10, %v1535_v44, %v1541_v6  ;;  %v1075_v62 = vadd.f32 %v996_v24, %v995_v29  ;;  %v1081_v47 = vadd.f32 %v1000_v2, %v999_v57  ;;  %v1004_v44 = vmul.f32 %v5544_v11, %v4247_v34  ;;  %v5548_v29 = vld [vmem:[#allocation26_spill] sm:$0xff] }
 0x215   : > { %1064 = vadd.xlane.f32.xlu2 %v1063_v35  ;;  %2793 = vmatmul.msk.f32.vlgmr.msra.gmra.mxu2 %vm1303_vm11, %v1542_v14  ;;  %v1084_v6 = vadd.f32 %v1002_v55, %v1001_v20  ;;  %v1006_v14 = vmul.f32 %v5546_v25, %v4247_v34  ;;  %v1008_v1 = vmul.f32 %v5548_v29, %v4247_v34 }
 0x216   : > { %v1087_v45 = vadd.f32 %v1004_v44, %v1003_v36  ;;  %v1011_v2 = vmul.f32 %v5551_v22, %v4245_v48  ;;  %v5553_v36 = vld [vmem:[#allocation31_spill] sm:$0xff]  ;;  %v5554_v44 = vld [vmem:[#allocation32_spill] sm:$0xff] }
 0x217   : > { %v4427_v19 = vpop.xlane.xlu0 %866  ;;  %v1090_v24 = vadd.f32 %v1006_v14, %v1005_v16  ;;  %v1013_v11 = vmul.f32 %v5553_v36, %v4245_v48  ;;  %v5555_v14 = vld [vmem:[#allocation33_spill] sm:$0xff] }
 0x218   : > { %1067 = vadd.xlane.f32.xlu1 %v1066_v12  ;;  %v4429_v58 = vpop.xlane.xlu2 %869 }
 0x21b   : > { %v4435_v33 = vpop.xlane.xlu1 %872 }
 0x21c   : > { %1070 = vadd.xlane.f32.xlu0 %v1069_v32  ;;  %v1007_v32 = vmul.f32 %v5547_v41, %v4245_v48 }
 0x21d   : > { %1073 = vadd.xlane.f32.xlu2 %v1072_v51 }
 0x21e   : > { %v1093_v57 = vadd.f32 %v1008_v1, %v1007_v32  ;;  %v5556_v32 = vld [vmem:[#allocation34_spill] sm:$0xff] }
 0x21f   : > { %v4445_v3 = vpop.xlane.xlu0 %875  ;;  %v1016_v29 = vmul.f32 %v5556_v32, %v4247_v34 }
 0x220   : > { %1076 = vadd.xlane.f32.xlu1 %v1075_v62  ;;  %v4447_v21 = vpop.xlane.xlu2 %878  ;;  %v1010_v62 = vmul.f32 %v5550_v31, %v4247_v34  ;;  %v5558_v31 = vld [vmem:[#allocation36_spill] sm:$0xff] }
 0x222   : > { %v1096_v55 = vadd.f32 %v1010_v62, %v1009_v61  ;;  %v1018_v62 = vmul.f32 %v5558_v31, %v4247_v34  ;;  %v5561_v31 = vld [vmem:[#allocation39_spill] sm:$0xff] }
 0x223   : > { %v4453_v35 = vpop.xlane.xlu1 %881 }
 0x224   : > { %1079 = vadd.xlane.f32.xlu0 %v1078_v26  ;;  %v5552_v26 = vld [vmem:[#allocation30_spill] sm:$0xff] }
 0x225   : > { %1082 = vadd.xlane.f32.xlu2 %v1081_v47  ;;  %v1012_v20 = vmul.f32 %v5552_v26, %v4247_v34 }
 0x227   : > { %v4463_v12 = vpop.xlane.xlu0 %884  ;;  %v1099_v16 = vadd.f32 %v1012_v20, %v1011_v2 }
 0x228   : > { %1085 = vadd.xlane.f32.xlu1 %v1084_v6  ;;  %v4465_v60 = vpop.xlane.xlu2 %887  ;;  %v1014_v6 = vmul.f32 %v5554_v44, %v4247_v34 }
 0x22a   : > { %v1102_v1 = vadd.f32 %v1014_v6, %v1013_v11  ;;  %v5560_v11 = vld [vmem:[#allocation38_spill] sm:$0xff] }
 0x22b   : > { %v4471_v51 = vpop.xlane.xlu1 %890  ;;  %v1020_v6 = vmul.f32 %v5560_v11, %v4247_v34 }
 0x22c   : > { %1088 = vadd.xlane.f32.xlu0 %v1087_v45  ;;  %v1015_v45 = vmul.f32 %v5555_v14, %v4245_v48  ;;  %v5562_v14 = vld [vmem:[#allocation40_spill] sm:$0xff] }
 0x22d   : > { %1091 = vadd.xlane.f32.xlu2 %v1090_v24  ;;  %v5557_v24 = vld [vmem:[#allocation35_spill] sm:$0xff]  ;;  %v1022_v22 = vmul.f32 %v5562_v14, %v4247_v34 }
 0x22e   : > { %v1017_v61 = vmul.f32 %v5557_v24, %v4245_v48  ;;  %v1105_v26 = vadd.f32 %v1016_v29, %v1015_v45  ;;  %v1021_v24 = vmul.f32 %v5561_v31, %v4245_v48  ;;  %v5563_v45 = vld [vmem:[#allocation41_spill] sm:$0xff] }
 0x22f   : > { %v4481_v37 = vpop.xlane.xlu0 %893  ;;  %v1023_v29 = vmul.f32 %v5563_v45, %v4245_v48 }
 0x230   : > { %1094 = vadd.xlane.f32.xlu1 %v1093_v57  ;;  %v4483_v47 = vpop.xlane.xlu2 %896  ;;  %v3064_v57 = vmov 0   ;;  %v1114_v11 = vadd.f32 %v1022_v22, %v1021_v24 }
 0x231   : > { %2853 = vset.pattern.permute.xlu0 %v3064_v57  ;;  %2854 = vset.pattern.permute.xlu2 %v3064_v57 }
 0x232   : > { %2855 = vset.pattern.permute.xlu1 %v3064_v57 }
 0x233   : > { %v4489_v25 = vpop.xlane.xlu1 %899 }
 0x234   : > { %1097 = vadd.xlane.f32.xlu0 %v1096_v55  ;;  %v5559_v55 = vld [vmem:[#allocation37_spill] sm:$0xff] }
 0x235   : > { %1100 = vadd.xlane.f32.xlu2 %v1099_v16  ;;  %v1019_v44 = vmul.f32 %v5559_v55, %v4245_v48  ;;  %v1108_v16 = vadd.f32 %v1018_v62, %v1017_v61  ;;  %v1025_v62 = vmul.f32 %v4252_v8, %v4245_v48  ;;  %v1607_v48 = vperm.slane %v4445_v3, %v3576_v15 }
 0x236   : > { %v1610_v3 = vperm.slane %v4453_v35, %v3591_v42  ;;  %v1621_v35 = vperm.slane %v4489_v25, %v3576_v15  ;;  %v5565_v25 = vld [vmem:[#allocation5_spill] sm:$0xff] }
 0x237   : > { %v4499_v2 = vpop.xlane.xlu0 %902  ;;  %v1111_v57 = vadd.f32 %v1020_v6, %v1019_v44 }
 0x238   : > { %1103 = vadd.xlane.f32.xlu1 %v1102_v1  ;;  %v906_v20 = vpop.xlane.xlu2 %905  ;;  %v5564_v1 = vld [vmem:[#allocation42_spill] sm:$0xff] }
 0x239   : > { %v1024_v39 = vmul.f32 %v5564_v1, %v4247_v34 }
 0x23b   : > { %v4505_v32 = vpop.xlane.xlu1 %908  ;;  %v1117_v31 = vadd.f32 %v1024_v39, %v1023_v29  ;;  %v1600_v29 = vperm.slane %v4413_v27, %v3576_v15 }
 0x23c   : > { %1106 = vadd.xlane.f32.xlu0 %v1105_v26  ;;  %v1026_v26 = vmul.f32 %v4257_v53, %v4247_v34  ;;  %v1608_v53 = vperm.slane %v4447_v21, %v3585_v54  ;;  %v1601_v34 = vperm.slane %v4427_v19, %v3585_v54  ;;  %v1612_v21 = vperm.slane %v4463_v12, %v3594_v63 }
 0x23d   : > { %1109 = vadd.xlane.f32.xlu2 %v1108_v16  ;;  %v1614_v19 = vperm.slane %v4465_v60, %v3576_v15  ;;  %v1605_v12 = vperm.slane %v4435_v33, %v3594_v63  ;;  %v1619_v33 = vperm.slane %v4483_v47, %v3594_v63 }
 0x23e   : > { %v1120_v44 = vadd.f32 %v1026_v26, %v1025_v62  ;;  %v1602_v27 = vsel %vm1230_vm1, %v1601_v34, %v1600_v29  ;;  %v1624_v26 = vperm.slane %v906_v20, %v3591_v42  ;;  %v1617_v20 = vperm.slane %v4481_v37, %v3591_v42 }
 0x23f   : > { %v912_v59 = vpop.xlane.xlu0 %911 }
 0x240   : > { %1112 = vadd.xlane.f32.xlu1 %v1111_v57  ;;  %v915_v61 = vpop.xlane.xlu2 %914 }
 0x243   : > { %v4519_v14 = vpop.xlane.xlu1 %917 }
 0x244   : > { %1115 = vadd.xlane.f32.xlu0 %v1114_v11  ;;  %v1609_v11 = vsel %vm1230_vm1, %v1608_v53, %v1607_v48  ;;  %v1629_v53 = vperm.slane %v915_v61, %v3585_v54 }
 0x245   : > { %1118 = vadd.xlane.f32.xlu2 %v1117_v31  ;;  %v1603_v31 = vperm.slane %v4429_v58, %v3591_v42  ;;  %v1615_v58 = vperm.slane %v4471_v51, %v3585_v54  ;;  %v1611_v60 = vsel %vm1234_vm2, %v1610_v3, %v1609_v11  ;;  %v1628_v51 = vperm.slane %v912_v59, %v3576_v15 }
 0x246   : > { %v1626_v59 = vperm.slane %v4505_v32, %v3594_v63  ;;  %v1631_v3 = vperm.slane %v4519_v14, %v3591_v42 }
 0x247   : > { %v4521_v6 = vpop.xlane.xlu0 %920  ;;  %v1616_v34 = vsel %vm1230_vm1, %v1615_v58, %v1614_v19  ;;  %v1630_v47 = vsel %vm1230_vm1, %v1629_v53, %v1628_v51 }
 0x248   : > { %1121 = vadd.xlane.f32.xlu1 %v1120_v44  ;;  %v924_v16 = vpop.xlane.xlu2 %923  ;;  %v1604_v44 = vsel %vm1234_vm2, %v1603_v31, %v1602_v27  ;;  %v1633_v58 = vperm.slane %v4521_v6, %v3594_v63  ;;  %v1618_v14 = vsel %vm1234_vm2, %v1617_v20, %v1616_v34 }
 0x249   : > { %v1635_v37 = vperm.slane %v924_v16, %v3576_v15  ;;  %v1606_v27 = vsel %vm1238_vm3, %v1605_v12, %v1604_v44  ;;  %v1620_v6 = vsel %vm1238_vm3, %v1619_v33, %v1618_v14 }
 0x24b   : > { %v927_v1 = vpop.xlane.xlu1 %926 }
 0x24f   : > { %v4523_v22 = vpop.xlane.xlu0 %929 }
 0x250   : > { %v4525_v24 = vpop.xlane.xlu2 %932  ;;  %v1638_v32 = vperm.slane %v4523_v22, %v3591_v42 }
 0x251   : > { %v1640_v16 = vperm.slane %v4525_v24, %v3594_v63 }
 0x253   : > { %v936_v57 = vpop.xlane.xlu1 %935 }
 0x257   : > { %v939_v39 = vpop.xlane.xlu0 %938 }
 0x258   : > { %1841 = vperm.xlu0 %2853, %v3897_v0   ;;  %v942_v62 = vpop.xlane.xlu2 %941  ;;  %v1622_v0 = vperm.slane %v4499_v2, %v3585_v54  ;;  %v1613_v2 = vsel %vm1238_vm3, %v1612_v21, %v1611_v60  ;;  %v1643_v61 = vperm.slane %v939_v39, %v3585_v54  ;;  %v1636_v21 = vperm.slane %v927_v1, %v3585_v54 }
 0x259   : > { %v1645_v19 = vperm.slane %v942_v62, %v3591_v42  ;;  %v1642_v39 = vperm.slane %v936_v57, %v3576_v15  ;;  %v1656_v53 = vsel %vm1289_vm4, %v1613_v2, %v1606_v27 }
 0x25a   : > { %v1623_v31 = vsel %vm1230_vm1, %v1622_v0, %v1621_v35  ;;  %v1632_v35 = vsel %vm1234_vm2, %v1631_v3, %v1630_v47  ;;  %v1637_v24 = vsel %vm1230_vm1, %v1636_v21, %v1635_v37  ;;  %v1657_v20 = vsel %vm1291_vm5, %v1620_v6, %v1656_v53  ;;  %v5570_v6 = vld [vmem:[#allocation35_spill] sm:$0xff] }
 0x25b   : > { %v945_v48 = vpop.xlane.xlu1 %944  ;;  %v1625_v29 = vsel %vm1234_vm2, %v1624_v26, %v1623_v31  ;;  %v1644_v22 = vsel %vm1230_vm1, %v1643_v61, %v1642_v39  ;;  %v1634_v34 = vsel %vm1238_vm3, %v1633_v58, %v1632_v35  ;;  %v1639_v44 = vsel %vm1234_vm2, %v1638_v32, %v1637_v24 }
 0x25c   : > { %v1647_v57 = vperm.slane %v945_v48, %v3594_v63  ;;  %v1627_v26 = vsel %vm1238_vm3, %v1626_v59, %v1625_v29  ;;  %v1646_v60 = vsel %vm1234_vm2, %v1645_v19, %v1644_v22  ;;  %v1641_v48 = vsel %vm1238_vm3, %v1640_v16, %v1639_v44  ;;  %v5568_v16 = vld [vmem:[#allocation29_spill] sm:$0xff] }
 0x25d   : > { %1844 = vperm.xlu2 %2854, %v5565_v25   ;;  %v1658_v25 = vsel %vm1293_vm6, %v1627_v26, %v1657_v20 }
 0x25e   : > { %v1648_v29 = vsel %vm1238_vm3, %v1647_v57, %v1646_v60  ;;  %v1659_v59 = vsel %vm1295_vm7, %v1634_v34, %v1658_v25  ;;  %v5571_v34 = vld [vmem:[#allocation39_spill] sm:$0xff] }
 0x25f   : > { %v948_v11 = vpop.xlane.xlu0 %947  ;;  %v1660_v3 = vsel %vm1297_vm8, %v1641_v48, %v1659_v59 }
 0x260   : > { %1862 = vperm.xlu0 %2853, %v3969_v56   ;;  %v951_v0 = vpop.xlane.xlu2 %950  ;;  %v1649_v1 = vperm.slane %v948_v11, %v3576_v15  ;;  %v1661_v37 = vsel %vm1299_vm9, %v1648_v29, %v1660_v3 }
 0x261   : > { %v1650_v62 = vperm.slane %v951_v0, %v3585_v54  ;;  %1847 = vperm.xlu1 %2855, %v3919_v10  }
 0x263   : > { %v954_v51 = vpop.xlane.xlu1 %953  ;;  %v1651_v31 = vsel %vm1230_vm1, %v1650_v62, %v1649_v1  ;;  %v5569_v1 = vld [vmem:[#allocation33_spill] sm:$0xff]  ;;  %v3065_v62 = vmov 15  }
 0x264   : > { %v1652_v12 = vperm.slane %v954_v51, %v3591_v42 }
 0x265   : > { %1850 = vperm.xlu2 %2854, %v3929_v23  }
 0x266   : > { %v1653_v11 = vsel %vm1234_vm2, %v1652_v12, %v1651_v31 }
 0x267   : > { %v957_v33 = vpop.xlane.xlu0 %956 }
 0x268   : > { %v1654_v2 = vperm.slane %v957_v33, %v3594_v63  ;;  %1871 = vperm.xlu0 %2853, %v3999_v52   ;;  %v4610_v61 = vpop.xlane.xlu2 %1028 }
 0x269   : > { %1853 = vperm.xlu1 %2855, %v3939_v28   ;;  %v1720_v57 = vperm.slane %v4610_v61, %v3576_v15 }
 0x26a   : > { %v1655_v23 = vsel %vm1238_vm3, %v1654_v2, %v1653_v11 }
 0x26b   : > { %v1662_v21 = vsel %vm1301_vm10, %v1655_v23, %v1661_v37  ;;  %v4618_v19 = vpop.xlane.xlu1 %1031 }
 0x26c   : > { %2794 = vmatmul.msk.f32.vlgmr.msra.gmra.mxu3 %vm1303_vm11, %v1662_v21  ;;  %v1721_v26 = vperm.slane %v4618_v19, %v3585_v54 }
 0x26d   : > { %1856 = vperm.xlu2 %2854, %v3949_v30  }
 0x26e   : > { %v1722_v20 = vsel %vm1230_vm1, %v1721_v26, %v1720_v57 }
 0x26f   : > { %v4622_v52 = vpop.xlane.xlu0 %1034 }
 0x270   : > { %1880 = vperm.xlu0 %2853, %v5529_v49   ;;  %v4625_v47 = vpop.xlane.xlu2 %1037 }
 0x271   : > { %1859 = vperm.xlu1 %2855, %v3959_v46   ;;  %v1725_v48 = vperm.slane %v4625_v47, %v3594_v63 }
 0x273   : > { %v1041_v28 = vpop.xlane.xlu1 %1040 }
 0x274   : > { %v1727_v60 = vperm.slane %v1041_v28, %v3576_v15 }
 0x275   : > { %1865 = vperm.xlu2 %2854, %v3979_v17  }
 0x277   : > { %v1044_v58 = vpop.xlane.xlu0 %1043 }
 0x278   : > { %1889 = vperm.xlu0 %2853, %v5535_v13   ;;  %v1047_v32 = vpop.xlane.xlu2 %1046  ;;  %v1728_v22 = vperm.slane %v1044_v58, %v3585_v54 }
 0x279   : > { %1868 = vperm.xlu1 %2855, %v3989_v18   ;;  %v1730_v35 = vperm.slane %v1047_v32, %v3591_v42 }
 0x27a   : > { %v1729_v44 = vsel %vm1230_vm1, %v1728_v22, %v1727_v60 }
 0x27b   : > { %v4631_v39 = vpop.xlane.xlu1 %1049  ;;  %v1731_v31 = vsel %vm1234_vm2, %v1730_v35, %v1729_v44 }
 0x27c   : > { %v1732_v25 = vperm.slane %v4631_v39, %v3594_v63 }
 0x27d   : > { %1874 = vperm.xlu2 %2854, %v4009_v9  }
 0x27e   : > { %v1733_v47 = vsel %vm1238_vm3, %v1732_v25, %v1731_v31  ;;  %v2942_v31 = vld [vmem:[%s3161_s17 + $0x30] sm:$0xff] }
 0x27f   : > { %v1053_v30 = vpop.xlane.xlu0 %1052 }
 0x280   : > { %1898 = vperm.xlu0 %2853, %v5541_v50   ;;  %v1056_v49 = vpop.xlane.xlu2 %1055  ;;  %v1734_v51 = vperm.slane %v1053_v30, %v3576_v15 }
 0x281   : > { %1877 = vperm.xlu1 %2855, %v4019_v43   ;;  %v1735_v53 = vperm.slane %v1056_v49, %v3585_v54 }
 0x283   : > { %v4636_v46 = vpop.xlane.xlu1 %1058  ;;  %v1736_v3 = vsel %vm1230_vm1, %v1735_v53, %v1734_v51 }
 0x284   : > { %v1737_v33 = vperm.slane %v4636_v46, %v3591_v42 }
 0x285   : > { %1883 = vperm.xlu2 %2854, %v5531_v4  }
 0x286   : > { %v1738_v58 = vsel %vm1234_vm2, %v1737_v33, %v1736_v3  ;;  %v2946_v3 = vld [vmem:[%s3161_s17 + $0x100] sm:$0xff] }
 0x287   : > { %v4639_v17 = vpop.xlane.xlu0 %1061 }
 0x288   : > { %1907 = vperm.xlu0 %2853, %v5547_v41   ;;  %v4642_v13 = vpop.xlane.xlu2 %1064 }
 0x289   : > { %1886 = vperm.xlu1 %2855, %v5533_v40   ;;  %v5566_v40 = vld [vmem:[#allocation23_spill] sm:$0xff]  ;;  %v1741_v29 = vperm.slane %v4642_v13, %v3576_v15 }
 0x28b   : > { %v4645_v18 = vpop.xlane.xlu1 %1067 }
 0x28c   : > { %v1742_v2 = vperm.slane %v4645_v18, %v3585_v54 }
 0x28d   : > { %1892 = vperm.xlu2 %2854, %v5537_v38   ;;  %v5567_v38 = vld [vmem:[#allocation27_spill] sm:$0xff] }
 0x28e   : > { %v1743_v32 = vsel %vm1230_vm1, %v1742_v2, %v1741_v29  ;;  %v2943_v29 = vld [vmem:[%s3161_s17 + $0xd0] sm:$0xff] }
 0x28f   : > { %v4648_v9 = vpop.xlane.xlu0 %1070 }
 0x290   : > { %1916 = vperm.xlu0 %2853, %v5553_v36   ;;  %v4651_v43 = vpop.xlane.xlu2 %1073  ;;  %v1744_v28 = vperm.slane %v4648_v9, %v3591_v42 }
 0x291   : > { %1895 = vperm.xlu1 %2855, %v5539_v7   ;;  %v1746_v39 = vperm.slane %v4651_v43, %v3594_v63 }
 0x293   : > { %v1077_v4 = vpop.xlane.xlu1 %1076 }
 0x294   : > { %v1748_v23 = vperm.slane %v1077_v4, %v3576_v15 }
 0x295   : > { %1901 = vperm.xlu2 %2854, %v5543_v5  }
 0x297   : > { %v1080_v50 = vpop.xlane.xlu0 %1079 }
 0x298   : > { %1925 = vperm.xlu0 %2853, %v5559_v55   ;;  %v1083_v41 = vpop.xlane.xlu2 %1082  ;;  %v1749_v59 = vperm.slane %v1080_v50, %v3585_v54 }
 0x299   : > { %1904 = vperm.xlu1 %2855, %v5566_v40   ;;  %v1751_v37 = vperm.slane %v1083_v41, %v3591_v42  ;;  %v2939_v41 = vld [vmem:[%s3161_s17] sm:$0xff] }
 0x29a   : > { %v1750_v30 = vsel %vm1230_vm1, %v1749_v59, %v1748_v23  ;;  %v2944_v59 = vld [vmem:[%s3161_s17 + $0x40] sm:$0xff] }
 0x29b   : > { %v4657_v0 = vpop.xlane.xlu1 %1085  ;;  %v1752_v18 = vsel %vm1234_vm2, %v1751_v37, %v1750_v30 }
 0x29c   : > { %v1753_v49 = vperm.slane %v4657_v0, %v3594_v63  ;;  %v1745_v0 = vsel %vm1234_vm2, %v1744_v28, %v1743_v32 }
 0x29d   : > { %1910 = vperm.xlu2 %2854, %v5567_v38  }
 0x29f   : > { %v1089_v14 = vpop.xlane.xlu0 %1088 }
 0x2a0   : > { %1934 = vperm.xlu0 %2853, %v4252_v8   ;;  %v1092_v36 = vpop.xlane.xlu2 %1091  ;;  %v1755_v21 = vperm.slane %v1089_v14, %v3576_v15 }
 0x2a1   : > { %1913 = vperm.xlu1 %2855, %v5568_v16   ;;  %v1756_v19 = vperm.slane %v1092_v36, %v3585_v54  ;;  %v1747_v16 = vsel %vm1238_vm3, %v1746_v39, %v1745_v0 }
 0x2a3   : > { %v4662_v7 = vpop.xlane.xlu1 %1094  ;;  %v1757_v9 = vsel %vm1230_vm1, %v1756_v19, %v1755_v21  ;;  %v2947_v19 = vld [vmem:[%s3161_s17 + $0x60] sm:$0xff] }
 0x2a4   : > { %v1758_v46 = vperm.slane %v4662_v7, %v3591_v42 }
 0x2a5   : > { %1919 = vperm.xlu2 %2854, %v5569_v1   ;;  %v2940_v1 = vld [vmem:[%s3161_s17 + $0xa0] sm:$0xff] }
 0x2a7   : > { %v4665_v5 = vpop.xlane.xlu0 %1097 }
 0x2a8   : > { %2858 = vset.pattern.permute.xlu0 %v3065_v62  ;;  %v4669_v27 = vpop.xlane.xlu2 %1100  ;;  %v1760_v43 = vperm.slane %v4665_v5, %v3594_v63 }
 0x2a9   : > { %2031 = vperm.xlu0 %2858, %v3919_v10   ;;  %1922 = vperm.xlu1 %2855, %v5570_v6   ;;  %v1723_v10 = vperm.slane %v4622_v52, %v3591_v42  ;;  %v1759_v6 = vsel %vm1234_vm2, %v1758_v46, %v1757_v9  ;;  %v2951_v46 = vld [vmem:[%s3161_s17 + $0xb0] sm:$0xff] }
 0x2aa   : > { %v1761_v35 = vsel %vm1238_vm3, %v1760_v43, %v1759_v6  ;;  %v2953_v43 = vld [vmem:[%s3161_s17 + $0xc0] sm:$0xff]  ;;  %v2957_v6 = vld [vmem:[%s3161_s17 + $0x110] sm:$0xff] }
 0x2ab   : > { %v1104_v24 = vpop.xlane.xlu1 %1103  ;;  %v1724_v11 = vsel %vm1234_vm2, %v1723_v10, %v1722_v20  ;;  %v2941_v10 = vld [vmem:[%s3161_s17 + $0x10] sm:$0xff] }
 0x2ac   : > { %v1726_v52 = vsel %vm1238_vm3, %v1725_v48, %v1724_v11  ;;  %v1763_v13 = vperm.slane %v1104_v24, %v3585_v54 }
 0x2ad   : > { %1928 = vperm.xlu2 %2854, %v5571_v34   ;;  %v1776_v36 = vsel %vm1289_vm4, %v1733_v47, %v1726_v52  ;;  %v2948_v47 = vld [vmem:[%s3161_s17 + $0x80] sm:$0xff] }
 0x2af   : > { %v1107_v12 = vpop.xlane.xlu0 %1106 }
 0x2b0   : > { %v1110_v61 = vpop.xlane.xlu2 %1109  ;;  %v1765_v4 = vperm.slane %v1107_v12, %v3591_v42 }
 0x2b1   : > { %2046 = vperm.xlu0 %2858, %v3969_v56   ;;  %1931 = vperm.xlu1 %2855, %v5563_v45   ;;  %v1739_v56 = vperm.slane %v4639_v17, %v3594_v63  ;;  %v1762_v17 = vperm.slane %v4669_v27, %v3576_v15  ;;  %v1767_v38 = vperm.slane %v1110_v61, %v3594_v63  ;;  %v2945_v61 = vld [vmem:[%s3161_s17 + $0x50] sm:$0xff] }
 0x2b2   : > { %v1754_v27 = vsel %vm1238_vm3, %v1753_v49, %v1752_v18 }
 0x2b3   : > { %v1113_v45 = vpop.xlane.xlu1 %1112  ;;  %v1740_v40 = vsel %vm1238_vm3, %v1739_v56, %v1738_v58  ;;  %v1764_v22 = vsel %vm1230_vm1, %v1763_v13, %v1762_v17  ;;  %v2949_v56 = vld [vmem:[%s3161_s17 + $0x130] sm:$0xff]  ;;  %v2952_v13 = vld [vmem:[%s3161_s17 + $0x160] sm:$0xff] }
 0x2b4   : > { %v1769_v7 = vperm.slane %v1113_v45, %v3576_v15  ;;  %v1777_v26 = vsel %vm1291_vm5, %v1740_v40, %v1776_v36  ;;  %v1766_v24 = vsel %vm1234_vm2, %v1765_v4, %v1764_v22  ;;  %v2950_v58 = vld [vmem:[%s3161_s17 + $0x90] sm:$0xff] }
 0x2b5   : > { %2856 = vset.pattern.permute.xlu2 %v3065_v62  ;;  %v1778_v51 = vsel %vm1293_vm6, %v1747_v16, %v1777_v26  ;;  %v1768_v53 = vsel %vm1238_vm3, %v1767_v38, %v1766_v24  ;;  %v2958_v24 = vld [vmem:[%s3161_s17 + $0x120] sm:$0xff] }
 0x2b6   : > { %2025 = vperm.xlu2 %2856, %v2939_v41   ;;  %v1779_v44 = vsel %vm1295_vm7, %v1754_v27, %v1778_v51  ;;  %v2955_v41 = vld [vmem:[%s3161_s17 + $0x190] sm:$0xff] }
 0x2b7   : > { %v1116_v50 = vpop.xlane.xlu0 %1115  ;;  %v1780_v20 = vsel %vm1297_vm8, %v1761_v35, %v1779_v44  ;;  %v3066_v44 = vmov 112  }
 0x2b8   : > { %v1770_v14 = vperm.slane %v1116_v50, %v3585_v54  ;;  %v1119_v5 = vpop.xlane.xlu2 %1118  ;;  %v1781_v25 = vsel %vm1299_vm9, %v1768_v53, %v1780_v20  ;;  %v2954_v50 = vld [vmem:[%s3161_s17 + $0xe0] sm:$0xff]  ;;  %v4819_v20 = vld [vmem:[%s3161_s17 + $0x28] sm:$0xff] }
 0x2b9   : > { %2055 = vperm.xlu0 %2858, %v2940_v1   ;;  %v1772_v57 = vperm.slane %v1119_v5, %v3591_v42  ;;  %2857 = vset.pattern.permute.xlu1 %v3065_v62 }
 0x2ba   : > { %v1771_v60 = vsel %vm1230_vm1, %v1770_v14, %v1769_v7  ;;  %2028 = vperm.xlu1 %2857, %v2941_v10   ;;  %v2956_v14 = vld [vmem:[%s3161_s17 + $0xf0] sm:$0xff]  ;;  %v2959_v10 = vld [vmem:[%s3161_s17 + $0x140] sm:$0xff] }
 0x2bb   : > { %v1773_v34 = vsel %vm1234_vm2, %v1772_v57, %v1771_v60  ;;  %v1122_v62 = vpop.xlane.xlu1 %1121 }
 0x2bc   : > { %v1774_v12 = vperm.slane %v1122_v62, %v3594_v63  ;;  %v2961_v62 = vld [vmem:[%s3161_s17 + $0x170] sm:$0xff] }
 0x2be   : > { %v1775_v48 = vsel %vm1238_vm3, %v1774_v12, %v1773_v34  ;;  %2034 = vperm.xlu2 %2856, %v2942_v31   ;;  %v2960_v34 = vld [vmem:[%s3161_s17 + $0x150] sm:$0xff] }
 0x2bf   : > { %v1782_v33 = vsel %vm1301_vm10, %v1775_v48, %v1781_v25  ;;  %v2963_v48 = vld [vmem:[%s3161_s17 + $0x180] sm:$0xff] }
 0x2c0   : > { %2795 = vmatmul.msk.f32.vlgmr.msrb.gmra.mxu0 %vm1303_vm11, %v1782_v33  ;;  %v1845_v2 = vpop.permute.xlu2 %1844  ;;  %v2964_v25 = vld [vmem:[%s3161_s17 + $0x1a0] sm:$0xff] }
 0x2c1   : > { %2064 = vperm.xlu0 %2858, %v2943_v29   ;;  %v1937_v11 = vperm.slane %v1845_v2, %v3585_v54  ;;  %v4831_v29 = vld [vmem:[%s3161_s17 + $0x88] sm:$0xff] }
 0x2c2   : > { %2037 = vperm.xlu1 %2857, %v2944_v59   ;;  %v2966_v59 = vld [vmem:[%s3161_s17 + $0x1b0] sm:$0xff] }
 0x2c6   : > { %2040 = vperm.xlu2 %2856, %v2945_v61  }
 0x2c8   : > { %v1851_v23 = vpop.permute.xlu2 %1850 }
 0x2c9   : > { %2073 = vperm.xlu0 %2858, %v2946_v3   ;;  %v1941_v32 = vperm.slane %v1851_v23, %v3594_v63  ;;  %v4841_v23 = vld [vmem:[%s3161_s17 + $0xa8] sm:$0xff] }
 0x2ca   : > { %v1842_v37 = vpop.permute.xlu0 %1841  ;;  %2043 = vperm.xlu1 %2857, %v2947_v19  }
 0x2cb   : > { %v1936_v21 = vperm.slane %v1842_v37, %v3576_v15 }
 0x2cd   : > { %v1938_v52 = vsel %vm1230_vm1, %v1937_v11, %v1936_v21  ;;  %v2967_v11 = vld [vmem:[%s3161_s17 + $0x1d0] sm:$0xff]  ;;  %v2969_v21 = vld [vmem:[%s3161_s17 + $0x1e0] sm:$0xff] }
 0x2ce   : > { %2049 = vperm.xlu2 %2856, %v2948_v47  }
 0x2d0   : > { %v1857_v28 = vpop.permute.xlu2 %1856 }
 0x2d1   : > { %2082 = vperm.xlu0 %2858, %v2949_v56   ;;  %v1944_v36 = vperm.slane %v1857_v28, %v3585_v54  ;;  %v4854_v56 = vld [vmem:[%s3161_s17 + $0xb8] sm:$0xff] }
 0x2d2   : > { %v1863_v45 = vpop.permute.xlu0 %1862  ;;  %2052 = vperm.xlu1 %2857, %v2950_v58  }
 0x2d3   : > { %v1848_v39 = vpop.permute.xlu1 %1847  ;;  %v1948_v16 = vperm.slane %v1863_v45, %v3594_v63  ;;  %v4860_v45 = vld [vmem:[%s3161_s17 + $0x18] sm:$0xff] }
 0x2d4   : > { %v1939_v30 = vperm.slane %v1848_v39, %v3591_v42 }
 0x2d6   : > { %v1940_v49 = vsel %vm1234_vm2, %v1939_v30, %v1938_v52  ;;  %2058 = vperm.xlu2 %2856, %v2951_v46   ;;  %v4848_v52 = vld [vmem:[%s3161_s17 + $0x8] sm:$0xff]  ;;  %v4867_v30 = vld [vmem:[%s3161_s17 + $0x38] sm:$0xff] }
 0x2d7   : > { %v1942_v17 = vsel %vm1238_vm3, %v1941_v32, %v1940_v49 }
 0x2d8   : > { %v4777_v18 = vpop.permute.xlu2 %1865 }
 0x2d9   : > { %2091 = vperm.xlu0 %2858, %v2952_v13   ;;  %v1950_v39 = vperm.slane %v4777_v18, %v3576_v15 }
 0x2da   : > { %v4779_v9 = vpop.permute.xlu0 %1871  ;;  %2061 = vperm.xlu1 %2857, %v2953_v43  }
 0x2db   : > { %v1854_v4 = vpop.permute.xlu1 %1853  ;;  %v1953_v49 = vperm.slane %v4779_v9, %v3591_v42 }
 0x2dc   : > { %v1943_v0 = vperm.slane %v1854_v4, %v3576_v15  ;;  %v4881_v4 = vld [vmem:[%s3161_s17 + $0x118] sm:$0xff] }
 0x2de   : > { %2067 = vperm.xlu2 %2856, %v2954_v50   ;;  %v1945_v5 = vsel %vm1230_vm1, %v1944_v36, %v1943_v0 }
 0x2e0   : > { %v4784_v40 = vpop.permute.xlu2 %1874 }
 0x2e1   : > { %2100 = vperm.xlu0 %2858, %v2955_v41  }
 0x2e2   : > { %v4787_v38 = vpop.permute.xlu0 %1880  ;;  %2070 = vperm.xlu1 %2857, %v2956_v14   ;;  %v4894_v14 = vld [vmem:[%s3161_s17 + $0x48] sm:$0xff] }
 0x2e3   : > { %v1860_v7 = vpop.permute.xlu1 %1859 }
 0x2e4   : > { %v1946_v1 = vperm.slane %v1860_v7, %v3591_v42 }
 0x2e6   : > { %v1947_v27 = vsel %vm1234_vm2, %v1946_v1, %v1945_v5  ;;  %2076 = vperm.xlu2 %2856, %v2957_v6   ;;  %v1955_v1 = vperm.slane %v4784_v40, %v3594_v63 }
 0x2e7   : > { %v1949_v22 = vsel %vm1238_vm3, %v1948_v16, %v1947_v27 }
 0x2e8   : > { %v4798_v57 = vsel %vm1289_vm4, %v1949_v22, %v1942_v17  ;;  %v4801_v26 = vpop.permute.xlu2 %1883  ;;  %v1958_v17 = vperm.slane %v4787_v38, %v3585_v54 }
 0x2e9   : > { %2109 = vperm.xlu0 %2858, %v5559_v55   ;;  %v1960_v22 = vperm.slane %v4801_v26, %v3591_v42 }
 0x2ea   : > { %v4803_v35 = vpop.permute.xlu0 %1889  ;;  %2079 = vperm.xlu1 %2857, %v2958_v24  }
 0x2eb   : > { %v1869_v60 = vpop.permute.xlu1 %1868  ;;  %v1964_v50 = vperm.slane %v4803_v35, %v3576_v15 }
 0x2ec   : > { %v1951_v32 = vperm.slane %v1869_v60, %v3585_v54 }
 0x2ee   : > { %2085 = vperm.xlu2 %2856, %v2959_v10   ;;  %v1952_v13 = vsel %vm1230_vm1, %v1951_v32, %v1950_v39 }
 0x2ef   : > { %v1954_v16 = vsel %vm1234_vm2, %v1953_v49, %v1952_v13  ;;  %v4958_v13 = vld [vmem:[%s3161_s17 + $0x98] sm:$0xff] }
 0x2f0   : > { %v4808_v51 = vpop.permute.xlu2 %1892  ;;  %v1956_v40 = vsel %vm1238_vm3, %v1955_v1, %v1954_v16 }
 0x2f1   : > { %2118 = vperm.xlu0 %2858, %v4252_v8   ;;  %v1965_v9 = vperm.slane %v4808_v51, %v3585_v54 }
 0x2f2   : > { %v4810_v53 = vpop.permute.xlu0 %1898  ;;  %2088 = vperm.xlu1 %2857, %v2960_v34   ;;  %v4917_v34 = vld [vmem:[%s3161_s17 + $0x58] sm:$0xff] }
 0x2f3   : > { %v4813_v55 = vpop.permute.xlu1 %1877  ;;  %v1966_v35 = vsel %vm1230_vm1, %v1965_v9, %v1964_v50  ;;  %v1969_v10 = vperm.slane %v4810_v53, %v3594_v63 }
 0x2f4   : > { %v1957_v43 = vperm.slane %v4813_v55, %v3576_v15 }
 0x2f6   : > { %2094 = vperm.xlu2 %2856, %v2961_v62   ;;  %v1959_v5 = vsel %vm1230_vm1, %v1958_v17, %v1957_v43 }
 0x2f7   : > { %v1961_v26 = vsel %vm1234_vm2, %v1960_v22, %v1959_v5 }
 0x2f8   : > { %v4816_v12 = vpop.permute.xlu2 %1901 }
 0x2f9   : > { %2861 = vset.pattern.permute.xlu0 %v3066_v44  ;;  %v1971_v0 = vperm.slane %v4816_v12, %v3576_v15 }
 0x2fa   : > { %2247 = vperm.xlu0 %2861, %v4819_v20   ;;  %v4822_v8 = vpop.permute.xlu0 %1907  ;;  %2097 = vperm.xlu1 %2857, %v2963_v48  }
 0x2fb   : > { %v4825_v31 = vpop.permute.xlu1 %1886  ;;  %v1974_v24 = vperm.slane %v4822_v8, %v3591_v42 }
 0x2fc   : > { %v1962_v27 = vperm.slane %v4825_v31, %v3594_v63 }
 0x2fe   : > { %2103 = vperm.xlu2 %2856, %v2964_v25   ;;  %v1963_v8 = vsel %vm1238_vm3, %v1962_v27, %v1961_v26  ;;  %v4932_v25 = vld [vmem:[%s3161_s17 + $0x148] sm:$0xff]  ;;  %v5007_v26 = vld [vmem:[%s3161_s17 + $0x1d8] sm:$0xff] }
 0x300   : > { %v4828_v33 = vpop.permute.xlu2 %1910 }
 0x301   : > { %v1976_v53 = vperm.slane %v4828_v33, %v3594_v63 }
 0x302   : > { %2265 = vperm.xlu0 %2861, %v4831_v29   ;;  %v4834_v2 = vpop.permute.xlu0 %1916  ;;  %2106 = vperm.xlu1 %2857, %v2966_v59  }
 0x303   : > { %v1896_v61 = vpop.permute.xlu1 %1895  ;;  %v1979_v60 = vperm.slane %v4834_v2, %v3585_v54 }
 0x304   : > { %v1967_v38 = vperm.slane %v1896_v61, %v3591_v42  ;;  %v1993_v61 = vsel %vm1291_vm5, %v1956_v40, %v4798_v57 }
 0x306   : > { %2112 = vperm.xlu2 %2856, %v2967_v11   ;;  %v1968_v51 = vsel %vm1234_vm2, %v1967_v38, %v1966_v35  ;;  %v4991_v35 = vld [vmem:[%s3161_s17 + $0x178] sm:$0xff] }
 0x307   : > { %v1970_v2 = vsel %vm1238_vm3, %v1969_v10, %v1968_v51  ;;  %v5001_v10 = vld [vmem:[%s3161_s17 + $0xe8] sm:$0xff] }
 0x308   : > { %v4838_v3 = vpop.permute.xlu2 %1919 }
 0x309   : > { %v1981_v48 = vperm.slane %v4838_v3, %v3591_v42 }
 0x30a   : > { %2271 = vperm.xlu0 %2861, %v4841_v23   ;;  %v4844_v37 = vpop.permute.xlu0 %1925  ;;  %2115 = vperm.xlu1 %2857, %v2969_v21   ;;  %v4945_v21 = vld [vmem:[%s3161_s17 + $0x68] sm:$0xff] }
 0x30b   : > { %v1905_v19 = vpop.permute.xlu1 %1904  ;;  %v1985_v33 = vperm.slane %v4844_v37, %v3576_v15 }
 0x30c   : > { %v1972_v18 = vperm.slane %v1905_v19, %v3585_v54 }
 0x30e   : > { %2859 = vset.pattern.permute.xlu2 %v3066_v44  ;;  %v1973_v6 = vsel %vm1230_vm1, %v1972_v18, %v1971_v0  ;;  %v4965_v0 = vld [vmem:[%s3161_s17 + $0x168] sm:$0xff] }
 0x30f   : > { %2241 = vperm.xlu2 %2859, %v4848_v52   ;;  %v1975_v55 = vsel %vm1234_vm2, %v1974_v24, %v1973_v6  ;;  %v4983_v6 = vld [vmem:[%s3161_s17 + $0xc8] sm:$0xff] }
 0x310   : > { %v4851_v47 = vpop.permute.xlu2 %1928  ;;  %v1977_v11 = vsel %vm1238_vm3, %v1976_v53, %v1975_v55 }
 0x311   : > { %v1986_v31 = vperm.slane %v4851_v47, %v3585_v54  ;;  %v1994_v47 = vsel %vm1293_vm6, %v1963_v8, %v1993_v61  ;;  %v5024_v61 = vld [vmem:[%s3161_s17 + $0xf8] sm:$0xff] }
 0x312   : > { %2274 = vperm.xlu0 %2861, %v4854_v56   ;;  %v4857_v28 = vpop.permute.xlu0 %1934  ;;  %2860 = vset.pattern.permute.xlu1 %v3066_v44  ;;  %v1995_v57 = vsel %vm1295_vm7, %v1970_v2, %v1994_v47  ;;  %v5040_v47 = vld [vmem:[%s3161_s17 + $0x128] sm:$0xff] }
 0x313   : > { %2244 = vperm.xlu1 %2860, %v4860_v45   ;;  %v1914_v58 = vpop.permute.xlu1 %1913  ;;  %v1987_v37 = vsel %vm1230_vm1, %v1986_v31, %v1985_v33  ;;  %v1990_v39 = vperm.slane %v4857_v28, %v3594_v63  ;;  %v1996_v17 = vsel %vm1297_vm8, %v1977_v11, %v1995_v57 }
 0x314   : > { %v1978_v7 = vperm.slane %v1914_v58, %v3576_v15 }
 0x316   : > { %v1980_v62 = vsel %vm1230_vm1, %v1979_v60, %v1978_v7  ;;  %v4997_v60 = vld [vmem:[%s3161_s17 + $0xd8] sm:$0xff] }
 0x317   : > { %2250 = vperm.xlu2 %2859, %v4867_v30   ;;  %v1982_v3 = vsel %vm1234_vm2, %v1981_v48, %v1980_v62 }
 0x318   : > { %v4872_v46 = vpop.permute.xlu2 %2025 }
 0x319   : > { %v2120_v38 = vperm.slane %v4872_v46, %v3576_v15 }
 0x31a   : > { %2292 = vperm.xlu0 %2861, %v4881_v4  }
 0x31b   : > { %v4888_v41 = vpop.permute.xlu0 %2031  ;;  %2253 = vperm.xlu1 %2860, %v4894_v14   ;;  %v1923_v36 = vpop.permute.xlu1 %1922 }
 0x31c   : > { %v1983_v44 = vperm.slane %v1923_v36, %v3594_v63  ;;  %v4974_v36 = vld [vmem:[%s3161_s17 + $0x78] sm:$0xff]  ;;  %v2123_v16 = vperm.slane %v4888_v41, %v3591_v42 }
 0x31e   : > { %v1984_v58 = vsel %vm1238_vm3, %v1983_v44, %v1982_v3  ;;  %v5014_v44 = vld [vmem:[%s3161_s17 + $0x108] sm:$0xff]  ;;  %v5034_v3 = vld [vmem:[%s3161_s17 + $0x1f8] sm:$0xff] }
 0x31f   : > { %2256 = vperm.xlu2 %2859, %v4917_v34   ;;  %v1997_v18 = vsel %vm1299_vm9, %v1984_v58, %v1996_v17 }
 0x320   : > { %v2035_v12 = vpop.permute.xlu2 %2034 }
 0x321   : > { %v2125_v5 = vperm.slane %v2035_v12, %v3594_v63 }
 0x322   : > { %2301 = vperm.xlu0 %2861, %v4932_v25  }
 0x323   : > { %v4936_v59 = vpop.permute.xlu0 %2046  ;;  %2259 = vperm.xlu1 %2860, %v4945_v21   ;;  %v1932_v19 = vpop.permute.xlu1 %1931 }
 0x324   : > { %v1988_v32 = vperm.slane %v1932_v19, %v3591_v42  ;;  %v2132_v12 = vperm.slane %v4936_v59, %v3594_v63 }
 0x326   : > { %v1989_v49 = vsel %vm1234_vm2, %v1988_v32, %v1987_v37  ;;  %v5044_v32 = vld [vmem:[%s3161_s17 + $0x158] sm:$0xff]  ;;  %v3067_v37 = vmov 127  }
 0x327   : > { %2268 = vperm.xlu2 %2859, %v4958_v13   ;;  %v1991_v43 = vsel %vm1238_vm3, %v1990_v39, %v1989_v49  ;;  %v5053_v49 = vld [vmem:[%s3161_s17 + $0x138] sm:$0xff] }
 0x328   : > { %v2041_v50 = vpop.permute.xlu2 %2040  ;;  %v1998_v9 = vsel %vm1301_vm10, %v1991_v43, %v1997_v18  ;;  %v5057_v43 = vld [vmem:[%s3161_s17 + $0x188] sm:$0xff] }
 0x329   : > { %2796 = vmatmul.msk.f32.vlgmr.msrb.gmra.mxu1 %vm1303_vm11, %v1998_v9  ;;  %v2128_v8 = vperm.slane %v2041_v50, %v3585_v54  ;;  %v5064_v9 = vld [vmem:[%s3161_s17 + $0x198] sm:$0xff] }
 0x32a   : > { %2307 = vperm.xlu0 %2861, %v4965_v0  }
 0x32b   : > { %v4969_v28 = vpop.permute.xlu0 %2055  ;;  %2262 = vperm.xlu1 %2860, %v4974_v36  }
 0x32c   : > { %v2029_v7 = vpop.permute.xlu1 %2028 }
 0x32d   : > { %v2121_v1 = vperm.slane %v2029_v7, %v3585_v54 }
 0x32f   : > { %v2122_v27 = vsel %vm1230_vm1, %v2121_v1, %v2120_v38  ;;  %2277 = vperm.xlu2 %2859, %v4983_v6   ;;  %v5070_v38 = vld [vmem:[%s3161_s17 + $0x1a8] sm:$0xff] }
 0x330   : > { %v2124_v46 = vsel %vm1234_vm2, %v2123_v16, %v2122_v27  ;;  %v4987_v22 = vpop.permute.xlu2 %2049 }
 0x331   : > { %v2126_v41 = vsel %vm1238_vm3, %v2125_v5, %v2124_v46  ;;  %v5083_v5 = vld [vmem:[%s3161_s17 + $0x1b8] sm:$0xff] }
 0x332   : > { %2310 = vperm.xlu0 %2861, %v4991_v35  }
 0x333   : > { %v4994_v24 = vpop.permute.xlu0 %2064  ;;  %2280 = vperm.xlu1 %2860, %v4997_v60  }
 0x334   : > { %v2038_v40 = vpop.permute.xlu1 %2037 }
 0x335   : > { %v2127_v55 = vperm.slane %v2038_v40, %v3576_v15 }
 0x337   : > { %2283 = vperm.xlu2 %2859, %v5001_v10   ;;  %v2129_v31 = vsel %vm1230_vm1, %v2128_v8, %v2127_v55  ;;  %v2608_v55 = vld [vmem:[%s5401_s4] sm:$0xff] }
 0x338   : > { %v5004_v51 = vpop.permute.xlu2 %2058  ;;  %2651 = vmatpush.msra.mxu2 %v2608_v55  ;;  %2628 = vmatpush.msra.mxu1 %v2608_v55 }
 0x33a   : > { %2328 = vperm.xlu0 %2861, %v5007_v26  }
 0x33b   : > { %v5011_v62 = vpop.permute.xlu0 %2073  ;;  %2289 = vperm.xlu1 %2860, %v5014_v44  }
 0x33c   : > { %v2044_v53 = vpop.permute.xlu1 %2043 }
 0x33d   : > { %v2130_v48 = vperm.slane %v2044_v53, %v3591_v42 }
 0x33f   : > { %v2131_v2 = vsel %vm1234_vm2, %v2130_v48, %v2129_v31  ;;  %2286 = vperm.xlu2 %2859, %v5024_v61   ;;  %v2137_v48 = vperm.slane %v4969_v28, %v3591_v42 }
 0x340   : > { %v2133_v33 = vsel %vm1238_vm3, %v2132_v12, %v2131_v2  ;;  %v5028_v11 = vpop.permute.xlu2 %2067 }
 0x341   : > { %v5031_v59 = vsel %vm1289_vm4, %v2133_v33, %v2126_v41  ;;  %v5092_v41 = vld [vmem:[%s3161_s17 + $0x1e8] sm:$0xff] }
 0x342   : > { %2334 = vperm.xlu0 %2861, %v5034_v3  }
 0x343   : > { %v5037_v19 = vpop.permute.xlu0 %2082  ;;  %2295 = vperm.xlu1 %2860, %v5040_v47  }
 0x344   : > { %v2053_v58 = vpop.permute.xlu1 %2052 }
 0x345   : > { %v2135_v8 = vperm.slane %v2053_v58, %v3585_v54 }
 0x347   : > { %2304 = vperm.xlu2 %2859, %v5044_v32  }
 0x348   : > { %v5047_v57 = vpop.permute.xlu2 %2076 }
 0x34a   : > { %2864 = vset.pattern.permute.xlu0 %v3067_v37 }
 0x34b   : > { %2437 = vperm.xlu0 %2864, %v4894_v14   ;;  %v5050_v39 = vpop.permute.xlu0 %2091  ;;  %2298 = vperm.xlu1 %2860, %v5053_v49  }
 0x34c   : > { %v2062_v17 = vpop.permute.xlu1 %2061 }
 0x34d   : > { %v2141_v31 = vperm.slane %v2062_v17, %v3576_v15 }
 0x34f   : > { %2313 = vperm.xlu2 %2859, %v5057_v43  }
 0x350   : > { %v2086_v18 = vpop.permute.xlu2 %2085 }
 0x353   : > { %2452 = vperm.xlu0 %2864, %v4958_v13   ;;  %v5061_v50 = vpop.permute.xlu0 %2100  ;;  %2316 = vperm.xlu1 %2860, %v5064_v9   ;;  %v5079_v13 = vld [vmem:[%s3161_s17 + $0x1c8] sm:$0xff]  ;;  %s2719_s17 = scalar_lea.hbm %s5404_s7, %s2805_s16 }
 0x354   : > { %v5067_v14 = vpop.permute.xlu1 %2070  ;;  %v2163_v55 = vperm.slane %v5061_v50, %v3585_v54  ;;  %s2723_s21 = sshll.u32 %s2719_s17, 4  ;;  %s2724_s21 = int_to_ptr.hbm [resolvable:$true] %s2723_s21 }
 0x355   : > { %s3013_s22 = sshra.s32 %s2724_s21, 4  ;;  %s3014_s22 = int_to_ptr.hbm [resolvable:$true] %s3013_s22 }
 0x356   : > { %s3015_s23 = scalar_lea.hbm %s3014_s22, 8  ;;  %p3020_p0 = scmp.lt.s32.totalorder %s3014_s22, %s5404_s7 }
 0x357   : > { %2319 = vperm.xlu2 %2859, %v5070_v38   ;;  %p3016_p11 = scmp.ne.s32.totalorder %s3014_s22, %s3015_s23  ;;  %p3021_p1 = scmp.lt.s32.totalorder %s3019_s13, %s3015_s23 }
 0x358   : > { %v5073_v16 = vpop.permute.xlu2 %2094 }
 0x359   : > { %p3017_p12 = pnand %p3016_p11, %p3146_p5  ;;  %p3022_p2 = por %p3021_p1, %p3020_p0 }
 0x35b   : > { %2455 = vperm.xlu0 %2864, %v4841_v23   ;;  %v5076_v7 = vpop.permute.xlu0 %2109  ;;  %2325 = vperm.xlu1 %2860, %v5079_v13   ;;  %p3018_p13 = pneg %p3017_p12 }
 0x35c   : > { %v2080_v1 = vpop.permute.xlu1 %2079 }
 0x35d   : > { %v2151_v33 = vperm.slane %v2080_v1, %v3591_v42  ;;  %p3023_p3 = pnand %p3022_p2, %p3018_p13 }
 0x35f   : > { %2322 = vperm.xlu2 %2859, %v5083_v5  }
 0x360   : > { %v5086_v27 = vpop.permute.xlu2 %2103 }
 0x363   : > { %2458 = vperm.xlu0 %2864, %v4854_v56   ;;  %v5089_v46 = vpop.permute.xlu0 %2118  ;;  %2331 = vperm.xlu1 %2860, %v5092_v41  }
 0x364   : > { %v2089_v23 = vpop.permute.xlu1 %2088 }
 0x365   : > { %v2156_v2 = vperm.slane %v2089_v23, %v3585_v54 }
 0x367   : > { %2862 = vset.pattern.permute.xlu2 %v3067_v37 }
 0x368   : > { %2425 = vperm.xlu2 %2862, %v4848_v52   ;;  %v5096_v40 = vpop.permute.xlu2 %2112  ;;  %v2134_v52 = vperm.slane %v4987_v22, %v3576_v15  ;;  %v2142_v22 = vperm.slane %v4994_v24, %v3585_v54 }
 0x36a   : > { %v2143_v24 = vsel %vm1230_vm1, %v2142_v22, %v2141_v31 }
 0x36b   : > { %2476 = vperm.xlu0 %2864, %v4881_v4   ;;  %2863 = vset.pattern.permute.xlu1 %v3067_v37  ;;  %v2136_v4 = vsel %vm1230_vm1, %v2135_v8, %v2134_v52  ;;  %v2148_v37 = vperm.slane %v5011_v62, %v3576_v15  ;;  %v2158_v62 = vperm.slane %v5050_v39, %v3591_v42 }
 0x36c   : > { %v5102_v56 = vpop.permute.xlu0 %2247  ;;  %2428 = vperm.xlu1 %2863, %v4860_v45   ;;  %v2098_v12 = vpop.permute.xlu1 %2097  ;;  %v2149_v45 = vperm.slane %v5047_v57, %v3585_v54  ;;  %v2139_v57 = vperm.slane %v5004_v51, %v3594_v63  ;;  %v2153_v51 = vperm.slane %v5037_v19, %v3594_v63  ;;  %v2160_v19 = vperm.slane %v5073_v16, %v3594_v63 }
 0x36d   : > { %v2162_v17 = vperm.slane %v2098_v12, %v3576_v15 }
 0x36e   : > { %v2150_v23 = vsel %vm1230_vm1, %v2149_v45, %v2148_v37  ;;  %v2169_v45 = vperm.slane %v5076_v7, %v3576_v15 }
 0x370   : > { %2440 = vperm.xlu2 %2862, %v4917_v34   ;;  %v5109_v53 = vpop.permute.xlu2 %2241  ;;  %v2155_v34 = vperm.slane %v2086_v18, %v3576_v15  ;;  %v2146_v18 = vperm.slane %v5067_v14, %v3594_v63  ;;  %v2152_v14 = vsel %vm1234_vm2, %v2151_v33, %v2150_v23 }
 0x371   : > { %v2154_v31 = vsel %vm1238_vm3, %v2153_v51, %v2152_v14 }
 0x372   : > { %v2157_v1 = vsel %vm1230_vm1, %v2156_v2, %v2155_v34 }
 0x373   : > { %2485 = vperm.xlu0 %2864, %v4932_v25   ;;  %v2138_v25 = vsel %vm1234_vm2, %v2137_v48, %v2136_v4  ;;  %v2159_v52 = vsel %vm1234_vm2, %v2158_v62, %v2157_v1  ;;  %v2164_v48 = vsel %vm1230_vm1, %v2163_v55, %v2162_v17  ;;  %v2165_v4 = vperm.slane %v5086_v27, %v3591_v42  ;;  %v5196_v55 = vpop.f32.mrf.mxu0 }
 0x374   : > { %v5123_v58 = vpop.permute.xlu0 %2265  ;;  %2431 = vperm.xlu1 %2863, %v4819_v20   ;;  %v2107_v28 = vpop.permute.xlu1 %2106  ;;  %v2144_v20 = vperm.slane %v5028_v11, %v3591_v42  ;;  %v2140_v12 = vsel %vm1238_vm3, %v2139_v57, %v2138_v25  ;;  %v2161_v22 = vsel %vm1238_vm3, %v2160_v19, %v2159_v52 }
 0x375   : > { %v2167_v39 = vperm.slane %v2107_v28, %v3594_v63  ;;  %v2177_v2 = vsel %vm1291_vm5, %v2140_v12, %v5031_v59  ;;  %v2166_v16 = vsel %vm1234_vm2, %v2165_v4, %v2164_v48  ;;  %v2174_v59 = vperm.slane %v5089_v46, %v3594_v63 }
 0x376   : > { %v2145_v11 = vsel %vm1234_vm2, %v2144_v20, %v2143_v24  ;;  %v2336_v46 = vperm.slane %v5109_v53, %v3576_v15 }
 0x377   : > { %v2147_v50 = vsel %vm1238_vm3, %v2146_v18, %v2145_v11  ;;  %v2339_v18 = vperm.slane %v5102_v56, %v3591_v42 }
 0x378   : > { %2443 = vperm.xlu2 %2862, %v4945_v21   ;;  %v2251_v8 = vpop.permute.xlu2 %2250  ;;  %v2170_v21 = vperm.slane %v5096_v40, %v3585_v54  ;;  %v2178_v34 = vsel %vm1293_vm6, %v2147_v50, %v2177_v2  ;;  %v2168_v40 = vsel %vm1238_vm3, %v2167_v39, %v2166_v16 }
 0x379   : > { %v2179_v33 = vsel %vm1295_vm7, %v2154_v31, %v2178_v34  ;;  %v2341_v20 = vperm.slane %v2251_v8, %v3594_v63 }
 0x37a   : > { %v2171_v7 = vsel %vm1230_vm1, %v2170_v21, %v2169_v45 }
 0x37b   : > { %2491 = vperm.xlu0 %2864, %v4965_v0  }
 0x37c   : > { %2449 = vperm.xlu1 %2863, %v4831_v29   ;;  %v2116_v27 = vpop.permute.xlu1 %2115  ;;  %v5175_v28 = vpop.permute.xlu0 %2271  ;;  %v2180_v29 = vsel %vm1297_vm8, %v2161_v22, %v2179_v33 }
 0x37d   : > { %v2172_v0 = vperm.slane %v2116_v27, %v3591_v42  ;;  %v2181_v57 = vsel %vm1299_vm9, %v2168_v40, %v2180_v29  ;;  %v2350_v27 = vperm.slane %v5123_v58, %v3576_v15  ;;  %v2353_v40 = vperm.slane %v5175_v28, %v3591_v42 }
 0x37f   : > { %v2173_v37 = vsel %vm1234_vm2, %v2172_v0, %v2171_v7 }
 0x380   : > { %2434 = vperm.xlu2 %2862, %v4867_v30   ;;  %v2257_v25 = vpop.permute.xlu2 %2256  ;;  %v2175_v17 = vsel %vm1238_vm3, %v2174_v59, %v2173_v37 }
 0x381   : > { %v2182_v24 = vsel %vm1301_vm10, %v2175_v17, %v2181_v57 }
 0x382   : > { %2797 = vmatmul.msk.f32.vlgmr.msrb.gmra.mxu2 %vm1303_vm11, %v2182_v24 }
 0x383   : > { %2494 = vperm.xlu0 %2864, %v4991_v35  }
 0x384   : > { %2446 = vperm.xlu1 %2863, %v4974_v36   ;;  %v5192_v23 = vpop.permute.xlu0 %2274 }
 0x385   : > { %v2245_v30 = vpop.permute.xlu1 %2244  ;;  %v2355_v58 = vperm.slane %v5192_v23, %v3594_v63 }
 0x386   : > { %v2337_v1 = vperm.slane %v2245_v30, %v3585_v54 }
 0x388   : > { %v2338_v35 = vsel %vm1230_vm1, %v2337_v1, %v2336_v46  ;;  %2461 = vperm.xlu2 %2862, %v4983_v6   ;;  %v2269_v62 = vpop.permute.xlu2 %2268 }
 0x389   : > { %v2340_v36 = vsel %vm1234_vm2, %v2339_v18, %v2338_v35 }
 0x38a   : > { %2801 = vmatmul.msk.f32.vlgmr.msra.gmra.mxu2 %vm2609_vm12, %v5196_v55  ;;  %v2342_v56 = vsel %vm1238_vm3, %v2341_v20, %v2340_v36 }
 0x38b   : > { %2512 = vperm.xlu0 %2864, %v5007_v26  }
 0x38c   : > { %2464 = vperm.xlu1 %2863, %v4997_v60   ;;  %v5205_v12 = vpop.permute.xlu0 %2292  ;;  %v2344_v60 = vperm.slane %v2257_v25, %v3585_v54 }
 0x38d   : > { %v2254_v53 = vpop.permute.xlu1 %2253  ;;  %v2365_v28 = vperm.slane %v5205_v12, %v3585_v54 }
 0x38e   : > { %v2343_v14 = vperm.slane %v2254_v53, %v3576_v15 }
 0x390   : > { %2467 = vperm.xlu2 %2862, %v5001_v10   ;;  %v2278_v51 = vpop.permute.xlu2 %2277  ;;  %v2345_v52 = vsel %vm1230_vm1, %v2344_v60, %v2343_v14 }
 0x393   : > { %2518 = vperm.xlu0 %2864, %v5034_v3  }
 0x394   : > { %2473 = vperm.xlu1 %2863, %v5014_v44   ;;  %v2302_v11 = vpop.permute.xlu0 %2301 }
 0x395   : > { %v2260_v6 = vpop.permute.xlu1 %2259  ;;  %v2371_v30 = vperm.slane %v2302_v11, %v3576_v15 }
 0x396   : > { %v2346_v8 = vperm.slane %v2260_v6, %v3591_v42 }
 0x398   : > { %2470 = vperm.xlu2 %2862, %v5024_v61   ;;  %v2284_v26 = vpop.permute.xlu2 %2283  ;;  %v2347_v44 = vsel %vm1234_vm2, %v2346_v8, %v2345_v52 }
 0x39c   : > { %2479 = vperm.xlu1 %2863, %v5040_v47   ;;  %v2308_v19 = vpop.permute.xlu0 %2307 }
 0x39d   : > { %v2263_v10 = vpop.permute.xlu1 %2262  ;;  %v2374_v6 = vperm.slane %v2308_v19, %v3591_v42 }
 0x39e   : > { %v2348_v3 = vperm.slane %v2263_v10, %v3594_v63 }
 0x3a0   : > { %v2349_v48 = vsel %vm1238_vm3, %v2348_v3, %v2347_v44  ;;  %2488 = vperm.xlu2 %2862, %v5044_v32   ;;  %v2287_v61 = vpop.permute.xlu2 %2286 }
 0x3a1   : > { %v2392_v39 = vsel %vm1289_vm4, %v2349_v48, %v2342_v56  ;;  %v2362_v17 = vperm.slane %v2287_v61, %v3594_v63 }
 0x3a4   : > { %2482 = vperm.xlu1 %2863, %v5053_v49   ;;  %v5223_v21 = vpop.permute.xlu0 %2310 }
 0x3a5   : > { %v2281_v50 = vpop.permute.xlu1 %2280  ;;  %v2376_v44 = vperm.slane %v5223_v21, %v3594_v63 }
 0x3a8   : > { %2497 = vperm.xlu2 %2862, %v5057_v43   ;;  %v2305_v47 = vpop.permute.xlu2 %2304 }
 0x3a9   : > { %v2372_v37 = vperm.slane %v2305_v47, %v3585_v54 }
 0x3ab   : > { %v2373_v36 = vsel %vm1230_vm1, %v2372_v37, %v2371_v30 }
 0x3ac   : > { %2500 = vperm.xlu1 %2863, %v5064_v9   ;;  %v2329_v49 = vpop.permute.xlu0 %2328  ;;  %v2358_v9 = vperm.slane %v2281_v50, %v3585_v54  ;;  %v2375_v10 = vsel %vm1234_vm2, %v2374_v6, %v2373_v36 }
 0x3ad   : > { %v2290_v4 = vpop.permute.xlu1 %2289  ;;  %v2386_v48 = vperm.slane %v2329_v49, %v3585_v54  ;;  %v2377_v47 = vsel %vm1238_vm3, %v2376_v44, %v2375_v10 }
 0x3ae   : > { %v2364_v33 = vperm.slane %v2290_v4, %v3576_v15 }
 0x3b0   : > { %2503 = vperm.xlu2 %2862, %v5070_v38   ;;  %v2314_v31 = vpop.permute.xlu2 %2313  ;;  %v2351_v38 = vperm.slane %v2269_v62, %v3585_v54  ;;  %v2366_v23 = vsel %vm1230_vm1, %v2365_v28, %v2364_v33 }
 0x3b1   : > { %v2378_v57 = vperm.slane %v2314_v31, %v3576_v15 }
 0x3b2   : > { %v2352_v0 = vsel %vm1230_vm1, %v2351_v38, %v2350_v27 }
 0x3b3   : > { %v2354_v18 = vsel %vm1234_vm2, %v2353_v40, %v2352_v0 }
 0x3b4   : > { %2509 = vperm.xlu1 %2863, %v5079_v13   ;;  %v2335_v22 = vpop.permute.xlu0 %2334  ;;  %v2357_v13 = vperm.slane %v2278_v51, %v3576_v15  ;;  %v2356_v12 = vsel %vm1238_vm3, %v2355_v58, %v2354_v18 }
 0x3b5   : > { %v2296_v32 = vpop.permute.xlu1 %2295  ;;  %v2393_v14 = vsel %vm1291_vm5, %v2356_v12, %v2392_v39  ;;  %v2390_v4 = vperm.slane %v2335_v22, %v3594_v63 }
 0x3b6   : > { %v2367_v29 = vperm.slane %v2296_v32, %v3591_v42 }
 0x3b8   : > { %2506 = vperm.xlu2 %2862, %v5083_v5   ;;  %v2320_v2 = vpop.permute.xlu2 %2319  ;;  %v2359_v5 = vsel %vm1230_vm1, %v2358_v9, %v2357_v13  ;;  %v2368_v56 = vsel %vm1234_vm2, %v2367_v29, %v2366_v23 }
 0x3b9   : > { %v2381_v53 = vperm.slane %v2320_v2, %v3591_v42 }
 0x3bc   : > { %2515 = vperm.xlu1 %2863, %v5092_v41   ;;  %v2360_v41 = vperm.slane %v2284_v26, %v3591_v42 }
 0x3bd   : > { %v2299_v45 = vpop.permute.xlu1 %2298  ;;  %v2438_v24 = vpop.permute.xlu0 %2437 }
 0x3be   : > { %v2361_v7 = vsel %vm1234_vm2, %v2360_v41, %v2359_v5  ;;  %v2369_v46 = vperm.slane %v2299_v45, %v3594_v63  ;;  %v2527_v1 = vperm.slane %v2438_v24, %v3576_v15 }
 0x3bf   : > { %v2363_v20 = vsel %vm1238_vm3, %v2362_v17, %v2361_v7 }
 0x3c0   : > { %v2323_v43 = vpop.permute.xlu2 %2322  ;;  %v2370_v26 = vsel %vm1238_vm3, %v2369_v46, %v2368_v56  ;;  %v2394_v52 = vsel %vm1293_vm6, %v2363_v20, %v2393_v14 }
 0x3c1   : > { %v2383_v3 = vperm.slane %v2323_v43, %v3594_v63  ;;  %v2395_v61 = vsel %vm1295_vm7, %v2370_v26, %v2394_v52 }
 0x3c2   : > { %v2396_v2 = vsel %vm1297_vm8, %v2377_v47, %v2395_v61 }
 0x3c5   : > { %v2317_v16 = vpop.permute.xlu1 %2316 }
 0x3c6   : > { %v2379_v59 = vperm.slane %v2317_v16, %v3585_v54  ;;  %v2453_v16 = vpop.permute.xlu0 %2452 }
 0x3c8   : > { %v2426_v34 = vpop.permute.xlu2 %2425  ;;  %v2380_v35 = vsel %vm1230_vm1, %v2379_v59, %v2378_v57 }
 0x3c9   : > { %v2382_v8 = vsel %vm1234_vm2, %v2381_v53, %v2380_v35  ;;  %v2520_v9 = vperm.slane %v2426_v34, %v3576_v15 }
 0x3ca   : > { %v2384_v19 = vsel %vm1238_vm3, %v2383_v3, %v2382_v8  ;;  %v2535_v8 = vperm.slane %v2453_v16, %v3585_v54 }
 0x3cb   : > { %v2397_v49 = vsel %vm1299_vm9, %v2384_v19, %v2396_v2 }
 0x3cd   : > { %v2326_v25 = vpop.permute.xlu1 %2325 }
 0x3ce   : > { %v2385_v60 = vperm.slane %v2326_v25, %v3576_v15  ;;  %v2456_v40 = vpop.permute.xlu0 %2455 }
 0x3d0   : > { %v2441_v62 = vpop.permute.xlu2 %2440  ;;  %v2387_v31 = vsel %vm1230_vm1, %v2386_v48, %v2385_v60  ;;  %v2537_v48 = vperm.slane %v2456_v40, %v3591_v42 }
 0x3d1   : > { %v2528_v51 = vperm.slane %v2441_v62, %v3585_v54 }
 0x3d3   : > { %v2529_v11 = vsel %vm1230_vm1, %v2528_v51, %v2527_v1 }
 0x3d5   : > { %v2332_v39 = vpop.permute.xlu1 %2331 }
 0x3d6   : > { %v2388_v50 = vperm.slane %v2332_v39, %v3591_v42  ;;  %v2459_v58 = vpop.permute.xlu0 %2458 }
 0x3d8   : > { %v2389_v32 = vsel %vm1234_vm2, %v2388_v50, %v2387_v31  ;;  %v2444_v45 = vpop.permute.xlu2 %2443 }
 0x3d9   : > { %v2391_v21 = vsel %vm1238_vm3, %v2390_v4, %v2389_v32  ;;  %v2530_v7 = vperm.slane %v2444_v45, %v3591_v42 }
 0x3da   : > { %v2398_v43 = vsel %vm1301_vm10, %v2391_v21, %v2397_v49  ;;  %v2539_v49 = vperm.slane %v2459_v58, %v3594_v63 }
 0x3db   : > { %2798 = vmatmul.msk.f32.vlgmr.msrb.gmra.mxu3 %vm1303_vm11, %v2398_v43  ;;  %v2531_v25 = vsel %vm1234_vm2, %v2530_v7, %v2529_v11 }
 0x3de   : > { %v2429_v27 = vpop.permute.xlu1 %2428  ;;  %v2477_v46 = vpop.permute.xlu0 %2476 }
 0x3df   : > { %v2521_v22 = vperm.slane %v2429_v27, %v3585_v54  ;;  %v2549_v19 = vperm.slane %v2477_v46, %v3585_v54 }
 0x3e0   : > { %v2435_v13 = vpop.permute.xlu2 %2434 }
 0x3e1   : > { %v2522_v38 = vsel %vm1230_vm1, %v2521_v22, %v2520_v9  ;;  %v2525_v34 = vperm.slane %v2435_v13, %v3594_v63 }
 0x3e6   : > { %v2432_v5 = vpop.permute.xlu1 %2431  ;;  %v2486_v1 = vpop.permute.xlu0 %2485 }
 0x3e7   : > { %v2523_v41 = vperm.slane %v2432_v5, %v3591_v42  ;;  %v2555_v32 = vperm.slane %v2486_v1, %v3576_v15 }
 0x3e8   : > { %v2462_v33 = vpop.permute.xlu2 %2461 }
 0x3e9   : > { %v2524_v0 = vsel %vm1234_vm2, %v2523_v41, %v2522_v38  ;;  %v2541_v14 = vperm.slane %v2462_v33, %v3576_v15 }
 0x3ea   : > { %v2526_v17 = vsel %vm1238_vm3, %v2525_v34, %v2524_v0 }
 0x3ee   : > { %v2450_v59 = vpop.permute.xlu1 %2449  ;;  %v2492_v62 = vpop.permute.xlu0 %2491 }
 0x3ef   : > { %v2534_v26 = vperm.slane %v2450_v59, %v3576_v15  ;;  %v2558_v13 = vperm.slane %v2492_v62, %v3591_v42 }
 0x3f0   : > { %v2468_v28 = vpop.permute.xlu2 %2467 }
 0x3f1   : > { %v2536_v10 = vsel %vm1230_vm1, %v2535_v8, %v2534_v26  ;;  %v2544_v52 = vperm.slane %v2468_v28, %v3591_v42 }
 0x3f2   : > { %v2538_v2 = vsel %vm1234_vm2, %v2537_v48, %v2536_v10 }
 0x3f3   : > { %v2540_v5 = vsel %vm1238_vm3, %v2539_v49, %v2538_v2 }
 0x3f6   : > { %v2447_v37 = vpop.permute.xlu1 %2446  ;;  %v2495_v53 = vpop.permute.xlu0 %2494 }
 0x3f7   : > { %v2532_v29 = vperm.slane %v2447_v37, %v3594_v63  ;;  %v2560_v34 = vperm.slane %v2495_v53, %v3594_v63 }
 0x3f8   : > { %v2471_v30 = vpop.permute.xlu2 %2470 }
 0x3f9   : > { %v2533_v57 = vsel %vm1238_vm3, %v2532_v29, %v2531_v25  ;;  %v2546_v21 = vperm.slane %v2471_v30, %v3594_v63 }
 0x3fa   : > { %v2576_v24 = vsel %vm1289_vm4, %v2533_v57, %v2526_v17 }
 0x3fb   : > { %v2577_v41 = vsel %vm1291_vm5, %v2540_v5, %v2576_v24  ;;  %vm2684_vm5 = vcmask 261121  }
 0x3fe   : > { %v2465_v18 = vpop.permute.xlu1 %2464  ;;  %v2513_v60 = vpop.permute.xlu0 %2512 }
 0x3ff   : > { %v2542_v12 = vperm.slane %v2465_v18, %v3585_v54  ;;  %v2570_v29 = vperm.slane %v2513_v60, %v3585_v54 }
 0x400   : > { %v2489_v23 = vpop.permute.xlu2 %2488 }
 0x401   : > { %v2543_v11 = vsel %vm1230_vm1, %v2542_v12, %v2541_v14  ;;  %v2556_v61 = vperm.slane %v2489_v23, %v3585_v54  ;;  %v1802_v14 = vpop.f32.mrf.mxu0 }
 0x402   : > { %v2545_v47 = vsel %vm1234_vm2, %v2544_v52, %v2543_v11 }
 0x403   : > { %v2547_v16 = vsel %vm1238_vm3, %v2546_v21, %v2545_v47  ;;  %v2557_v9 = vsel %vm1230_vm1, %v2556_v61, %v2555_v32 }
 0x404   : > { %v2559_v59 = vsel %vm1234_vm2, %v2558_v13, %v2557_v9  ;;  %v2578_v7 = vsel %vm1293_vm6, %v2547_v16, %v2577_v41  ;;  %v2686_v16 = vld [vmem:[%s5403_s6] sm:$0x1] }
 0x405   : > { %v2803_v9 = vmul.f32 -1.442695, %v2686_v16 }
 0x406   : > { %v2474_v20 = vpop.permute.xlu1 %2473  ;;  %v2519_v58 = vpop.permute.xlu0 %2518 }
 0x407   : > { %v2548_v3 = vperm.slane %v2474_v20, %v3576_v15  ;;  %v2574_v24 = vperm.slane %v2519_v58, %v3594_v63  ;;  %2867 = vpow2.f32 %v2803_v9 }
 0x408   : > { %v2498_v36 = vpop.permute.xlu2 %2497 }
 0x409   : > { %v2562_v4 = vperm.slane %v2498_v36, %v3576_v15  ;;  %v2550_v45 = vsel %vm1230_vm1, %v2549_v19, %v2548_v3  ;;  %v1562_v36 = vpop.f32.mrf.mxu2 }
 0x40e   : > { %v2480_v35 = vpop.permute.xlu1 %2479 }
 0x40f   : > { %v2551_v39 = vperm.slane %v2480_v35, %v3591_v42 }
 0x410   : > { %v2504_v6 = vpop.permute.xlu2 %2503 }
 0x411   : > { %v2552_v27 = vsel %vm1234_vm2, %v2551_v39, %v2550_v45  ;;  %v2565_v22 = vperm.slane %v2504_v6, %v3591_v42  ;;  %v2202_v48 = vpop.f32.mrf.mxu2 }
 0x416   : > { %v2483_v56 = vpop.permute.xlu1 %2482 }
 0x417   : > { %v2553_v31 = vperm.slane %v2483_v56, %v3594_v63 }
 0x418   : > { %v2507_v38 = vpop.permute.xlu2 %2506 }
 0x419   : > { %v2554_v40 = vsel %vm1238_vm3, %v2553_v31, %v2552_v27  ;;  %v2567_v37 = vperm.slane %v2507_v38, %v3594_v63  ;;  %v1442_v63 = vpop.f32.mrf.mxu1  ;;  %v2868_v27 = vpop.eup %2867 }
 0x41a   : > { %v2579_v25 = vsel %vm1295_vm7, %v2554_v40, %v2578_v7  ;;  %v2653_v41 = vpop.f32.mrf.mxu2 }
 0x41b   : > { %v2657_v7 = vrot.slane %v2653_v41, 7 }
 0x41e   : > { %v2501_v51 = vpop.permute.xlu1 %2500 }
 0x41f   : > { %v2563_v44 = vperm.slane %v2501_v51, %v3585_v54  ;;  %v1682_v51 = vpop.f32.mrf.mxu3 }
 0x421   : > { %v2564_v43 = vsel %vm1230_vm1, %v2563_v44, %v2562_v4  ;;  %v2018_v10 = vpop.f32.mrf.mxu1 }
 0x422   : > { %v2566_v0 = vsel %vm1234_vm2, %v2565_v22, %v2564_v43  ;;  %v2690_v22 = vadd.f32 1.0, %v2868_v27 }
 0x423   : > { %v2568_v17 = vsel %vm1238_vm3, %v2567_v37, %v2566_v0  ;;  %v2866_v37 = vld [vmem:[%s5402_s5] ss:$0 sm:$0xff] }
 0x424   : > { %2869 = vrcp.f32 %v2690_v22  ;;  %v2702_v0 = vand.u32 2147483648, %v2690_v22  ;;  %vm2696_vm13 = vweird.f32 %v2690_v22 }
 0x426   : > { %v2510_v50 = vpop.permute.xlu1 %2509  ;;  %v2703_v58 = vor.u32 1.1754944e-38, %v2702_v0 }
 0x427   : > { %v2569_v33 = vperm.slane %v2510_v50, %v3576_v15  ;;  %v2561_v15 = vsel %vm1238_vm3, %v2560_v34, %v2559_v59  ;;  %v2700_v59 = vand.u32 2147483647, %v2690_v22 }
 0x428   : > { %v2580_v18 = vsel %vm1297_vm8, %v2561_v15, %v2579_v25 }
 0x429   : > { %v2571_v46 = vsel %vm1230_vm1, %v2570_v29, %v2569_v33  ;;  %v2581_v54 = vsel %vm1299_vm9, %v2568_v17, %v2580_v18  ;;  %vm2701_vm0 = vcmp.eq.f32.partialorder %v2700_v59, 8.507059e+37  ;;  %vm2706_vm1 = vcmask 253952  }
 0x42a   : > { %v2870_v38 = vpop.eup %2869 }
 0x42b   : > { %v2692_v13 = vmul.f32 %v2870_v38, %v2690_v22  ;;  %vm2697_vm14 = vweird.f32 %v2870_v38 }
 0x42c   : > { %vm2698_vm15 = vmor %vm2696_vm13, %vm2697_vm14 }
 0x42d   : > { %v2693_v5 = vsub.f32 1.0, %v2692_v13 }
 0x42e   : > { %v2516_v28 = vpop.permute.xlu1 %2515 }
 0x42f   : > { %v2572_v57 = vperm.slane %v2516_v28, %v3591_v42  ;;  %v1191_v42 = vld [vmem:[%s5400_s3] sm:$0xff]  ;;  %v2694_v40 = vmul.f32 %v2870_v38, %v2693_v5 }
 0x430   : > { %v1445_v23 = vperm.slane %v1191_v42, 1  ;;  %v1326_v35 = vperm.slane %v1191_v42, 0  ;;  %v1565_v62 = vperm.slane %v1191_v42, 2  ;;  %v1685_v53 = vperm.slane %v1191_v42, 3 }
 0x431   : > { %v2573_v30 = vsel %vm1234_vm2, %v2572_v57, %v2571_v46  ;;  %v1805_v26 = vperm.slane %v1191_v42, 4  ;;  %v2021_v11 = vperm.slane %v1191_v42, 5  ;;  %v2205_v44 = vperm.slane %v1191_v42, 6 }
 0x432   : > { %v2575_v1 = vsel %vm1238_vm3, %v2574_v24, %v2573_v30  ;;  %v1446_v56 = vmul.f32 %v1445_v23, %v1442_v63  ;;  %v1327_v12 = vmul.f32 %v1326_v35, %v5196_v55  ;;  %v1566_v6 = vmul.f32 %v1565_v62, %v1562_v36  ;;  %v2865_v55 = vld [vmem:[%s5400_s3 + $0x8] ss:$0 sm:$0xff] }
 0x433   : > { %v2582_v20 = vsel %vm1301_vm10, %v2575_v1, %v2581_v54  ;;  %v1686_v60 = vmul.f32 %v1685_v53, %v1682_v51  ;;  %v1806_v3 = vmul.f32 %v1805_v26, %v1802_v14  ;;  %v2022_v39 = vmul.f32 %v2021_v11, %v2018_v10 }
 0x434   : > { %2799 = vmatmul.msk.f32.vlgmr.msra.gmra.mxu0 %vm1303_vm11, %v2582_v20  ;;  %v1447_v8 = vadd.f32 %v1446_v56, %v1327_v12  ;;  %v2421_v50 = vperm.slane %v1191_v42, 7  ;;  %v2206_v4 = vmul.f32 %v2205_v44, %v2202_v48  ;;  %v2695_v33 = vadd.f32 %v2870_v38, %v2694_v40 }
 0x436   : > { %v1567_v52 = vadd.f32 %v1566_v6, %v1447_v8  ;;  %v2699_v34 = vsel %vm2698_vm15, %v2870_v38, %v2695_v33 }
 0x437   : > { %v2704_v25 = vsel %vm2701_vm0, %v2703_v58, %v2699_v34 }
 0x438   : > { %v1687_v61 = vadd.f32 %v1686_v60, %v1567_v52  ;;  %2707 = vst.msk [vmem:[%s271_s15 + $0x7] sm:$0x1] %vm2706_vm1, %v2704_v25 }
 0x43a   : > { %v1807_v47 = vadd.f32 %v1806_v3, %v1687_v61 }
 0x43c   : > { %v2023_v31 = vadd.f32 %v2022_v39, %v1807_v47 }
 0x43e   : > { %v2207_v2 = vadd.f32 %v2206_v4, %v2023_v31 }
 0x45e   : > { %v2418_v19 = vpop.f32.mrf.mxu3 }
 0x45f   : > { %v2422_v32 = vmul.f32 %v2421_v50, %v2418_v19 }
 0x461   : > { %v2423_v49 = vadd.f32 %v2422_v32, %v2207_v2 }
 0x4b1   : > { %v2602_v21 = vpop.f32.mrf.mxu0 }
 0x4b2   : > { %v2606_v45 = vmul.f32 %v2865_v55, %v2602_v21 }
 0x4b4   : > { %v2607_v43 = vadd.f32 %v2606_v45, %v2423_v49 }
 0x4b6   : > { %2800 = vmatmul.msk.f32.vlgmr.msra.gmra.mxu1 %vm2609_vm12, %v2607_v43 }
 0x533   : > { %v2630_v29 = vpop.f32.mrf.mxu1 }
 0x534   : > { %v2659_v28 = vsub.f32 %v2630_v29, %v2657_v7 }
 0x536   : > { %v2664_v17 = vadd.f32 %v2866_v37, %v2659_v28 }
 0x538   : > { %v2802_v57 = vmul.f32 -1.442695, %v2664_v17 }
 0x53a   : > { %2871 = vpow2.f32 %v2802_v57 }
 0x540   : > { %v2872_v15 = vpop.eup %2871 }
 0x541   : > { %v2668_v24 = vadd.f32 1.0, %v2872_v15 }
 0x543   : > { %2873 = vrcp.f32 %v2668_v24  ;;  %v2680_v1 = vand.u32 2147483648, %v2668_v24  ;;  %v2678_v20 = vand.u32 2147483647, %v2668_v24  ;;  %vm2674_vm3 = vweird.f32 %v2668_v24 }
 0x545   : > { %v2681_v23 = vor.u32 1.1754944e-38, %v2680_v1  ;;  %vm2679_vm6 = vcmp.eq.f32.partialorder %v2678_v20, 8.507059e+37 }
 0x549   : > { %v2874_v46 = vpop.eup %2873 }
 0x54a   : > { %v2670_v18 = vmul.f32 %v2874_v46, %v2668_v24  ;;  %vm2675_vm2 = vweird.f32 %v2874_v46 }
 0x54b   : > { %vm2676_vm4 = vmor %vm2674_vm3, %vm2675_vm2 }
 0x54c   : > { %v2671_v30 = vsub.f32 1.0, %v2670_v18 }
 0x54e   : > { %v2672_v54 = vmul.f32 %v2874_v46, %v2671_v30 }
 0x550   : > { %v2673_v42 = vadd.f32 %v2874_v46, %v2672_v54 }
 0x552   : > { %v2677_v63 = vsel %vm2676_vm4, %v2874_v46, %v2673_v42 }
 0x553   : > { %v2682_v35 = vsel %vm2679_vm6, %v2681_v23, %v2677_v63 }
 0x554   : > { %2685 = vst.msk [vmem:[%s271_s15 - $0x1] sm:$0xfe] %vm2684_vm5, %v2682_v35 }
 0x555   : > { %3026 = shalt.err (!%p3023_p3)
}
 0x556   : > { %2809 = dma.vmem_to_hbm [thread:$0]  (%p3146_p5), %s2722_s20, 128, %s2724_s21, %s2709_s28  }
 0x557 PF: > { %p2815_p4 = scmp.ge.s32.totalorder %s3061_s27, 2  ;;  %s2735_s8 = sand.u32 1, %s3049_s24  }
 0x558   : > { %s2736_s15 = scalar_lea.sflag [#allocation3], %s2735_s8 }
 0x559   : > { %p2812_p7 = pnand %p2815_p4, %p3150_p6 }
 0x55b   : > { %p2813_p8 = pneg %p2812_p7 }
 0x55d   : > { %3044 = dma.done.wait (%p2813_p8), %s2736_s15, 128  }
 0x55e   : > { %3046 = vsyncadd (%p2813_p8), %s2736_s15, 4294967168  ;;  %p17_p9 = scmp.ge.s32.totalorder %s3133_s30, 4   ;;  %s5572_s24 = smov %s3053_s25 }
 0x55f   : > { %s5573_s25 = smov %s3057_s26  ;;  %s5574_s26 = smov %s3144_s10 }
 0x560   : > { %s5575_s27 = smov %s3133_s30  ;;  %19 = sbr.rel (!%p17_p9) target bundleno = 3 (0x3), region = 84 }
 0x565   :  { %2742 = vsyncpa [#allocation3], 1 }
 0x566   :  { %2744 = vsyncpa [#allocation3 + $0x1], 1 }

</bundles_post_ra>
